<compile_context>
chip_gen: v6e
topology: v6e:2x2x1
jax: 0.10.0
libtpu: 0.0.40
codegen_flags: <defaults>
</compile_context>

<pallas_src>
import math

import numpy as np

import jax
import jax.numpy as jnp
from jax.experimental import pallas as pl
from jax.experimental.pallas import tpu as pltpu

_LANE = 128
_SUB = 8
_ROW_TILE = 8          # rows (sublanes) processed per inner sub-tile = 1 vreg of queries
_MAX_BLOCK_ROWS = 128  # rows per grid block (amortizes per-step overhead)


def _bezier_to_monomial(cp: np.ndarray) -> np.ndarray:
    """Bezier control points (NSEG, n+1, dim) -> monomial coefficients a_k with
    curve(s) = sum_k a_k * s**k on the local parameter s in [0, 1]."""
    nseg, np1, dim = cp.shape
    n = np1 - 1
    mono = np.zeros_like(cp)
    for k in range(n + 1):
        acc = np.zeros((nseg, dim), dtype=cp.dtype)
        for j in range(k + 1):
            acc += ((-1.0) ** (k - j)) * math.comb(k, j) * cp[:, j, :]
        mono[:, k, :] = math.comb(n, k) * acc
    return mono


def _make_raceline_kernel(nseg, order_rt, order, order_speed, dim,
                          mode_t, want_deriv, block_rows, row_tile):
    n_tiles = block_rows // row_tile

    def kernel(x_ref,
               rstart_ref, inv_dr_ref, r_last_ref, inv_r_last_ref,
               tstart_ref, inv_dt_ref, t_last_ref, inv_t_last_ref,
               mono_rt_ref, mono_curve_ref, mono_deriv_ref, mono_speed_ref,
               *out_refs):
        if want_deriv:
            r_out_ref, idx_out_ref, pts_out_ref, vel_out_ref = out_refs
        else:
            r_out_ref, idx_out_ref, pts_out_ref = out_refs

        # ---- hoisted SMEM scalar reads: once per grid step, reused by every
        #      unrolled sub-tile (JAX would re-emit them per tile otherwise) ----
        r_last = r_last_ref[0]
        inv_r_last = inv_r_last_ref[0]
        rstart = [rstart_ref[s] for s in range(nseg)]
        inv_dr = [inv_dr_ref[s] for s in range(nseg)]
        cstride = (order + 1) * dim
        curve_c = [[mono_curve_ref[s * cstride + k * dim + d]
                    for k in range(order + 1) for d in range(dim)]
                   for s in range(nseg)]                       # flat index k*dim+d
        if mode_t:
            t_last = t_last_ref[0]
            inv_t_last = inv_t_last_ref[0]
            tstart = [tstart_ref[s] for s in range(nseg)]
            inv_dt = [inv_dt_ref[s] for s in range(nseg)]
            rt_c = [[mono_rt_ref[s * (order_rt + 1) + k]
                     for k in range(order_rt + 1)]
                    for s in range(nseg)]
        if want_deriv:
            dstride = order * dim
            deriv_c = [[mono_deriv_ref[s * dstride + k * dim + d]
                        for k in range(order) for d in range(dim)]
                       for s in range(nseg)]
            speed_c = [[mono_speed_ref[s * (order_speed + 1) + k]
                        for k in range(order_speed + 1)]
                       for s in range(nseg)]

        def gather_chain(ge_of, tables, shape):
            """Monotone segment-select gather (shared compare per segment).
            ge_of(s): mask 'query lives in a segment >= s'."""
            ncoef = len(tables[0])
            accs = [jnp.broadcast_to(tables[0][j], shape) for j in range(ncoef)]
            for s in range(1, nseg):
                ge = ge_of(s)
                for j in range(ncoef):
                    accs[j] = jnp.where(ge, tables[s][j], accs[j])
            return accs

        def horner(coefs, s):
            acc = coefs[-1]
            for c in reversed(coefs[:-1]):
                acc = acc * s + c
            return acc

        # ---- statically unrolled loop over (row_tile, 128) sub-tiles ----
        for ti in range(n_tiles):
            roff = ti * row_tile
            x = x_ref[roff:roff + row_tile, :]
            shape = x.shape

            idx = jnp.zeros(shape, jnp.int32)
            if mode_t:
                # t % times[-1]   (floor-mod via host-precomputed reciprocal)
                t_mod = x - jnp.floor(x * inv_t_last) * t_last
                # fused bucketize + knot/coef gather over the time knots
                t0 = jnp.broadcast_to(tstart[0], shape)
                wt = jnp.broadcast_to(inv_dt[0], shape)
                rc = [jnp.broadcast_to(rt_c[0][k], shape)
                      for k in range(order_rt + 1)]
                for s in range(1, nseg):
                    ge = t_mod >= tstart[s]
                    idx = jnp.where(ge, s, idx)
                    t0 = jnp.where(ge, tstart[s], t0)
                    wt = jnp.where(ge, inv_dt[s], wt)
                    for k in range(order_rt + 1):
                        rc[k] = jnp.where(ge, rt_c[s][k], rc[k])
                s_t = (t_mod - t0) * wt
                r_val = horner(rc, s_t)
                # r % arclengths[-1]
                r_mod = r_val - jnp.floor(r_val * inv_r_last) * r_last
                # NOTE: the time-bucket indices are REUSED for the arclength
                # curves, exactly matching the PyTorch forward (idxbuckets from
                # r_of_t are passed into the r-parameterized curves).
                r0, wr = gather_chain(lambda s: idx >= s,
                                      [[rstart[s], inv_dr[s]]
                                       for s in range(nseg)], shape)
            else:
                r_mod = x - jnp.floor(x * inv_r_last) * r_last
                r0 = jnp.broadcast_to(rstart[0], shape)
                wr = jnp.broadcast_to(inv_dr[0], shape)
                for s in range(1, nseg):
                    ge = r_mod >= rstart[s]
                    idx = jnp.where(ge, s, idx)
                    r0 = jnp.where(ge, rstart[s], r0)
                    wr = jnp.where(ge, inv_dr[s], wr)
            s_r = (r_mod - r0) * wr

            # store as soon as finalized (shortens live ranges)
            r_out_ref[roff:roff + row_tile, :] = r_mod
            idx_out_ref[roff:roff + row_tile, :] = idx

            def ge_idx(s):
                return idx >= s

            # curve points
            cc = gather_chain(ge_idx, curve_c, shape)
            for d in range(dim):
                pts_out_ref[d, roff:roff + row_tile, :] = horner(
                    [cc[k * dim + d] for k in range(order + 1)], s_r)

            if want_deriv:
                dc = gather_chain(ge_idx, deriv_c, shape)
                tang = [horner([dc[k * dim + d] for k in range(order)], s_r)
                        for d in range(dim)]
                sc = gather_chain(ge_idx, speed_c, shape)
                spd = horner(sc, s_r)
                sumsq = tang[0] * tang[0]
                for d in range(1, dim):
                    sumsq = sumsq + tang[d] * tang[d]
                # Faithful to the torch module: no epsilon guard (a degenerate
                # zero tangent would produce inf/NaN there too).
                scale = spd * jax.lax.rsqrt(sumsq)
                for d in range(dim):
                    vel_out_ref[d, roff:roff + row_tile, :] = tang[d] * scale

    return kernel


class RacelineHelperPallas:
    """JAX/Pallas re-implementation of RacelineHelper.forward."""

    def __init__(self, arclengths, times, curve_control_points,
                 speed_of_r_coefs, r_of_t_coefs):
        arclengths = np.asarray(arclengths, dtype=np.float64)
        times = np.asarray(times, dtype=np.float64)
        cp_curve = np.asarray(curve_control_points, dtype=np.float64)
        cp_speed = np.asarray(speed_of_r_coefs, dtype=np.float64)
        cp_rt = np.asarray(r_of_t_coefs, dtype=np.float64)
        if cp_speed.ndim == 2:
            cp_speed = cp_speed[..., None]
        if cp_rt.ndim == 2:
            cp_rt = cp_rt[..., None]

        nseg, kp1, dim = cp_curve.shape
        assert cp_rt.shape[0] == nseg and cp_speed.shape[0] == nseg
        self.nseg, self.order, self.dim = nseg, kp1 - 1, dim
        self.order_speed = cp_speed.shape[1] - 1
        self.order_rt = cp_rt.shape[1] - 1

        dr = arclengths[1:] - arclengths[:-1]
        dt = times[1:] - times[:-1]
        if not (np.all(dr > 0) and np.all(dt > 0)):
            raise ValueError("x values must be in ascending order")

        # derivative control points (CompositeBezierCurve.derivative());
        # the 2nd-derivative curve built in the torch module is unused in forward.
        cp_deriv = self.order * (cp_curve[:, 1:, :] - cp_curve[:, :-1, :]) / dr[:, None, None]

        f32 = jnp.float32
        # knot tables (reciprocal widths / periods precomputed on the host)
        self.rstart = jnp.asarray(arclengths[:-1], f32)
        self.inv_dr = jnp.asarray(1.0 / dr, f32)
        self.r_last = jnp.asarray(arclengths[-1:], f32)            # shape (1,)
        self.inv_r_last = jnp.asarray(1.0 / arclengths[-1:], f32)  # shape (1,)
        self.tstart = jnp.asarray(times[:-1], f32)
        self.inv_dt = jnp.asarray(1.0 / dt, f32)
        self.t_last = jnp.asarray(times[-1:], f32)
        self.inv_t_last = jnp.asarray(1.0 / times[-1:], f32)

        # Bezier -> monomial (Horner) coefficients, binomials folded in on host,
        # flattened [seg, k, d] row-major for SMEM scalar indexing.
        self.mono_curve = jnp.asarray(_bezier_to_monomial(cp_curve).reshape(-1), f32)
        self.mono_deriv = jnp.asarray(_bezier_to_monomial(cp_deriv).reshape(-1), f32)
        self.mono_speed = jnp.asarray(_bezier_to_monomial(cp_speed).reshape(-1), f32)
        self.mono_rt = jnp.asarray(_bezier_to_monomial(cp_rt).reshape(-1), f32)

    def __call__(self, t=None, r=None, deriv=False, idxbuckets=None):
        if (t is not None) and (r is not None):
            raise ValueError("Can't pass both t and r")
        if (t is None) and (r is None):
            raise ValueError("Must pass either t or r")
        if idxbuckets is not None:
            # TODO(synk): externally supplied idxbuckets are not plumbed into the kernel.
            raise NotImplementedError("idxbuckets input not supported")

        mode_t = t is not None
        x = jnp.asarray(t if mode_t else r, jnp.float32)
        orig_shape = x.shape
        B = int(x.size)

        # Lane-dense layout: flatten queries onto (rows, 128) tiles.
        rows = max(1, (B + _LANE - 1) // _LANE)
        rows8 = ((rows + _SUB - 1) // _SUB) * _SUB
        if rows8 >= 2 * _ROW_TILE:
            # >= 2 grid blocks so both v7x TensorCores get work; <= _MAX_BLOCK_ROWS
            # rows per block so the per-grid-step overhead stays amortized.
            min_blocks = max(2, -(-rows8 // _MAX_BLOCK_ROWS))
            block_rows = -(-rows8 // min_blocks)
            block_rows = ((block_rows + _ROW_TILE - 1) // _ROW_TILE) * _ROW_TILE
            block_rows = min(block_rows, _MAX_BLOCK_ROWS)
        else:
            block_rows = rows8
        padded_rows = ((rows8 + block_rows - 1) // block_rows) * block_rows
        nblk = padded_rows // block_rows
        padded_n = padded_rows * _LANE

        x_flat = x.reshape(-1)
        if padded_n != B:
            x_flat = jnp.pad(x_flat, (0, padded_n - B))
        x2 = x_flat.reshape(padded_rows, _LANE)

        kernel = _make_raceline_kernel(self.nseg, self.order_rt, self.order,
                                       self.order_speed, self.dim, mode_t,
                                       deriv, block_rows, _ROW_TILE)

        smem_spec = pl.BlockSpec(memory_space=pltpu.MemorySpace.SMEM)
        q_spec = pl.BlockSpec((block_rows, _LANE), lambda i: (i, 0))
        v_spec = pl.BlockSpec((self.dim, block_rows, _LANE), lambda i: (0, i, 0))

        in_specs = [q_spec] + [smem_spec] * 12
        out_specs = [q_spec, q_spec, v_spec]
        out_shapes = [
            jax.ShapeDtypeStruct((padded_rows, _LANE), jnp.float32),            # r (modded)
            jax.ShapeDtypeStruct((padded_rows, _LANE), jnp.int32),              # idxbuckets
            jax.ShapeDtypeStruct((self.dim, padded_rows, _LANE), jnp.float32),  # points
        ]
        if deriv:
            out_specs.append(v_spec)
            out_shapes.append(
                jax.ShapeDtypeStruct((self.dim, padded_rows, _LANE), jnp.float32))

        # Advisory cost estimate so XLA schedules this small custom call sanely.
        ncoef = (self.order + 1) * self.dim + 2
        if mode_t:
            ncoef += (self.order_rt + 1) + 2
        if deriv:
            ncoef += self.order * self.dim + (self.order_speed + 1)
        cost = pl.CostEstimate(
            flops=int(padded_n * (2 * self.nseg * ncoef + 8 * ncoef)),
            transcendentals=int(padded_n * (1 if deriv else 0)),
            bytes_accessed=int(padded_n * 4 * (3 + (2 if deriv else 1) * self.dim)),
        )

        results = pl.pallas_call(
            kernel,
            grid=(nblk,),
            in_specs=in_specs,
            out_specs=tuple(out_specs),
            out_shape=tuple(out_shapes),
            compiler_params=pltpu.CompilerParams(
                dimension_semantics=("parallel",)),
            cost_estimate=cost,
        )(x2, self.rstart, self.inv_dr, self.r_last, self.inv_r_last,
          self.tstart, self.inv_dt, self.t_last, self.inv_t_last,
          self.mono_rt, self.mono_curve, self.mono_deriv, self.mono_speed)

        if deriv:
            r_out, idx_out, pts_out, vel_out = results
        else:
            r_out, idx_out, pts_out = results

        r_out = r_out.reshape(-1)[:B].reshape(orig_shape)
        idx = idx_out.reshape(-1)[:B].reshape(orig_shape)
        # TODO(synk): this moveaxis is a full XLA transpose pass in HBM; a
        # channel-major consumer could take the (dim, N) slab directly and skip it.
        pts = jnp.moveaxis(pts_out, 0, -1).reshape(-1, self.dim)[:B]
        pts = pts.reshape(orig_shape + (self.dim,))
        if deriv:
            vel = jnp.moveaxis(vel_out, 0, -1).reshape(-1, self.dim)[:B]
            vel = vel.reshape(orig_shape + (self.dim,))
            return r_out, pts, vel, idx
        return r_out, pts, None, idx


if __name__ == "__main__":
    key = jax.random.PRNGKey(0)
    k1, k2, k3, k4, k5 = jax.random.split(key, 5)

    NSEG, D, K, KS, KT = 8, 3, 3, 3, 2
    # strictly increasing arclength / time knots (NSEG+1 each)
    seg_r = jax.random.uniform(k1, (NSEG,), minval=0.5, maxval=1.5)
    arclengths = jnp.concatenate([jnp.zeros((1,)), jnp.cumsum(seg_r)])
    seg_t = jax.random.uniform(k2, (NSEG,), minval=0.2, maxval=0.8)
    times = jnp.concatenate([jnp.zeros((1,)), jnp.cumsum(seg_t)])

    curve_control_points = jax.random.normal(k3, (NSEG, K + 1, D))        # cubic 3D spline
    speed_of_r_coefs = 1.0 + jax.random.uniform(k4, (NSEG, KS + 1, 1))    # positive speeds
    # r_of_t: quadratic Beziers mapping time segment i -> arclength segment i
    mid = 0.5 * (arclengths[:-1] + arclengths[1:]) + 0.05 * jax.random.normal(k5, (NSEG,))
    r_of_t_coefs = jnp.stack([arclengths[:-1], mid, arclengths[1:]], axis=1)[..., None]

    helper = RacelineHelperPallas(arclengths, times, curve_control_points,
                                  speed_of_r_coefs, r_of_t_coefs)

    # t-path (with derivative outputs)
    t_eval = jnp.linspace(0.0, 2.0 * float(times[-1]), 16).reshape(2, 8)
    r_out, points, velocity, idxb = helper(t=t_eval, deriv=True)
    jax.block_until_ready((r_out, points, velocity, idxb))

    # r-path (no derivative)
    r_eval = jnp.linspace(0.0, 1.5 * float(arclengths[-1]), 8)
    r2, pts2, none_vel, idx2 = helper(r=r_eval, deriv=False)
    jax.block_until_ready((r2, pts2, idx2))

    # r-path reference check at segment midpoints (safely interior -> no
    # bucket-boundary ambiguity between f32 kernel and f64 reference).
    a_np = np.asarray(arclengths, dtype=np.float64)
    cp_np = np.asarray(curve_control_points, dtype=np.float64)
    sp_np = np.asarray(speed_of_r_coefs, dtype=np.float64)
    dr_np = a_np[1:] - a_np[:-1]
    r_mid = jnp.asarray((a_np[:-1] + a_np[1:]) * 0.5, jnp.float32)
    r3, pts3, vel3, idx3 = helper(r=r_mid, deriv=True)
    jax.block_until_ready((r3, pts3, vel3, idx3))

    def bez(cp, s):
        n = cp.shape[0] - 1
        return sum(math.comb(n, j) * (s ** j) * ((1.0 - s) ** (n - j)) * cp[j]
                   for j in range(n + 1))

    pts_ref = np.stack([bez(cp_np[i], 0.5) for i in range(NSEG)])
    dcp = K * (cp_np[:, 1:] - cp_np[:, :-1]) / dr_np[:, None, None]
    tan_ref = np.stack([bez(dcp[i], 0.5) for i in range(NSEG)])
    tan_ref = tan_ref / np.linalg.norm(tan_ref, axis=-1, keepdims=True)
    spd_ref = np.stack([bez(sp_np[i], 0.5) for i in range(NSEG)])
    vel_ref = tan_ref * spd_ref
    np.testing.assert_allclose(np.asarray(pts3), pts_ref, rtol=2e-3, atol=2e-3)
    np.testing.assert_allclose(np.asarray(vel3), vel_ref, rtol=2e-3, atol=2e-3)
    np.testing.assert_array_equal(np.asarray(idx3), np.arange(NSEG))

    # Larger batch exercises the multi-block grid (>=2 blocks for v7x megacore)
    # and the unrolled sub-tile path; per-query math is identical, so the first
    # 16 results must match the small-batch run.
    t_big = jnp.linspace(0.0, 3.0 * float(times[-1]), 4096)
    r_b, p_b, v_b, i_b = helper(t=t_big, deriv=True)
    jax.block_until_ready((r_b, p_b, v_b, i_b))
    r_s, p_s, v_s, _ = helper(t=t_big[:16], deriv=True)
    np.testing.assert_allclose(np.asarray(p_b)[:16], np.asarray(p_s), rtol=0.0, atol=1e-6)
    np.testing.assert_allclose(np.asarray(v_b)[:16], np.asarray(v_s), rtol=0.0, atol=1e-6)
    assert bool(jnp.all(jnp.isfinite(p_b))) and bool(jnp.all(jnp.isfinite(v_b)))

    assert bool(jnp.all(jnp.isfinite(points))) and bool(jnp.all(jnp.isfinite(velocity)))
    assert none_vel is None
    print("KERNEL_OK")
</pallas_src>

<mosaic_0001>
module attributes {stable_mosaic.version = 11 : i64} {
  func.func @kernel(%arg0: i32, %arg1: memref<8x128xf32, #tpu.memory_space<vmem>>, %arg2: memref<8xf32, #tpu.memory_space<smem>>, %arg3: memref<8xf32, #tpu.memory_space<smem>>, %arg4: memref<1xf32, #tpu.memory_space<smem>>, %arg5: memref<1xf32, #tpu.memory_space<smem>>, %arg6: memref<8xf32, #tpu.memory_space<smem>>, %arg7: memref<8xf32, #tpu.memory_space<smem>>, %arg8: memref<1xf32, #tpu.memory_space<smem>>, %arg9: memref<1xf32, #tpu.memory_space<smem>>, %arg10: memref<24xf32, #tpu.memory_space<smem>>, %arg11: memref<96xf32, #tpu.memory_space<smem>>, %arg12: memref<72xf32, #tpu.memory_space<smem>>, %arg13: memref<32xf32, #tpu.memory_space<smem>>, %arg14: memref<8x128xf32, #tpu.memory_space<vmem>>, %arg15: memref<8x128xi32, #tpu.memory_space<vmem>>, %arg16: memref<3x8x128xf32, #tpu.memory_space<vmem>>, %arg17: memref<3x8x128xf32, #tpu.memory_space<vmem>>) attributes {dimension_semantics = [#tpu.dimension_semantics<parallel>], iteration_bounds = array<i64: 1>, scalar_prefetch = 0 : i64, scratch_operands = 0 : i64, tpu.core_type = #tpu.core_type<tc>, window_params = [{transform_indices = @transform_0, window_bounds = array<i64: 8, 128>}, {transform_indices = @transform_1, window_bounds = array<i64: 8>}, {transform_indices = @transform_2, window_bounds = array<i64: 8>}, {transform_indices = @transform_3, window_bounds = array<i64: 1>}, {transform_indices = @transform_4, window_bounds = array<i64: 1>}, {transform_indices = @transform_5, window_bounds = array<i64: 8>}, {transform_indices = @transform_6, window_bounds = array<i64: 8>}, {transform_indices = @transform_7, window_bounds = array<i64: 1>}, {transform_indices = @transform_8, window_bounds = array<i64: 1>}, {transform_indices = @transform_9, window_bounds = array<i64: 24>}, {transform_indices = @transform_10, window_bounds = array<i64: 96>}, {transform_indices = @transform_11, window_bounds = array<i64: 72>}, {transform_indices = @transform_12, window_bounds = array<i64: 32>}, {transform_indices = @transform_13, window_bounds = array<i64: 8, 128>}, {transform_indices = @transform_14, window_bounds = array<i64: 8, 128>}, {transform_indices = @transform_15, window_bounds = array<i64: 3, 8, 128>}, {transform_indices = @transform_16, window_bounds = array<i64: 3, 8, 128>}]} {
    %c0 = arith.constant 0 : index
    %0 = memref.load %arg4[%c0] : memref<1xf32, #tpu.memory_space<smem>>
    %c0_0 = arith.constant 0 : index
    %1 = memref.load %arg5[%c0_0] : memref<1xf32, #tpu.memory_space<smem>>
    %c0_1 = arith.constant 0 : index
    %2 = memref.load %arg2[%c0_1] : memref<8xf32, #tpu.memory_space<smem>>
    %c1 = arith.constant 1 : index
    %3 = memref.load %arg2[%c1] : memref<8xf32, #tpu.memory_space<smem>>
    %c2 = arith.constant 2 : index
    %4 = memref.load %arg2[%c2] : memref<8xf32, #tpu.memory_space<smem>>
    %c3 = arith.constant 3 : index
    %5 = memref.load %arg2[%c3] : memref<8xf32, #tpu.memory_space<smem>>
    %c4 = arith.constant 4 : index
    %6 = memref.load %arg2[%c4] : memref<8xf32, #tpu.memory_space<smem>>
    %c5 = arith.constant 5 : index
    %7 = memref.load %arg2[%c5] : memref<8xf32, #tpu.memory_space<smem>>
    %c6 = arith.constant 6 : index
    %8 = memref.load %arg2[%c6] : memref<8xf32, #tpu.memory_space<smem>>
    %c7 = arith.constant 7 : index
    %9 = memref.load %arg2[%c7] : memref<8xf32, #tpu.memory_space<smem>>
    %c0_2 = arith.constant 0 : index
    %10 = memref.load %arg3[%c0_2] : memref<8xf32, #tpu.memory_space<smem>>
    %c1_3 = arith.constant 1 : index
    %11 = memref.load %arg3[%c1_3] : memref<8xf32, #tpu.memory_space<smem>>
    %c2_4 = arith.constant 2 : index
    %12 = memref.load %arg3[%c2_4] : memref<8xf32, #tpu.memory_space<smem>>
    %c3_5 = arith.constant 3 : index
    %13 = memref.load %arg3[%c3_5] : memref<8xf32, #tpu.memory_space<smem>>
    %c4_6 = arith.constant 4 : index
    %14 = memref.load %arg3[%c4_6] : memref<8xf32, #tpu.memory_space<smem>>
    %c5_7 = arith.constant 5 : index
    %15 = memref.load %arg3[%c5_7] : memref<8xf32, #tpu.memory_space<smem>>
    %c6_8 = arith.constant 6 : index
    %16 = memref.load %arg3[%c6_8] : memref<8xf32, #tpu.memory_space<smem>>
    %c7_9 = arith.constant 7 : index
    %17 = memref.load %arg3[%c7_9] : memref<8xf32, #tpu.memory_space<smem>>
    %c0_10 = arith.constant 0 : index
    %18 = memref.load %arg11[%c0_10] : memref<96xf32, #tpu.memory_space<smem>>
    %c1_11 = arith.constant 1 : index
    %19 = memref.load %arg11[%c1_11] : memref<96xf32, #tpu.memory_space<smem>>
    %c2_12 = arith.constant 2 : index
    %20 = memref.load %arg11[%c2_12] : memref<96xf32, #tpu.memory_space<smem>>
    %c3_13 = arith.constant 3 : index
    %21 = memref.load %arg11[%c3_13] : memref<96xf32, #tpu.memory_space<smem>>
    %c4_14 = arith.constant 4 : index
    %22 = memref.load %arg11[%c4_14] : memref<96xf32, #tpu.memory_space<smem>>
    %c5_15 = arith.constant 5 : index
    %23 = memref.load %arg11[%c5_15] : memref<96xf32, #tpu.memory_space<smem>>
    %c6_16 = arith.constant 6 : index
    %24 = memref.load %arg11[%c6_16] : memref<96xf32, #tpu.memory_space<smem>>
    %c7_17 = arith.constant 7 : index
    %25 = memref.load %arg11[%c7_17] : memref<96xf32, #tpu.memory_space<smem>>
    %c8 = arith.constant 8 : index
    %26 = memref.load %arg11[%c8] : memref<96xf32, #tpu.memory_space<smem>>
    %c9 = arith.constant 9 : index
    %27 = memref.load %arg11[%c9] : memref<96xf32, #tpu.memory_space<smem>>
    %c10 = arith.constant 10 : index
    %28 = memref.load %arg11[%c10] : memref<96xf32, #tpu.memory_space<smem>>
    %c11 = arith.constant 11 : index
    %29 = memref.load %arg11[%c11] : memref<96xf32, #tpu.memory_space<smem>>
    %c12 = arith.constant 12 : index
    %30 = memref.load %arg11[%c12] : memref<96xf32, #tpu.memory_space<smem>>
    %c13 = arith.constant 13 : index
    %31 = memref.load %arg11[%c13] : memref<96xf32, #tpu.memory_space<smem>>
    %c14 = arith.constant 14 : index
    %32 = memref.load %arg11[%c14] : memref<96xf32, #tpu.memory_space<smem>>
    %c15 = arith.constant 15 : index
    %33 = memref.load %arg11[%c15] : memref<96xf32, #tpu.memory_space<smem>>
    %c16 = arith.constant 16 : index
    %34 = memref.load %arg11[%c16] : memref<96xf32, #tpu.memory_space<smem>>
    %c17 = arith.constant 17 : index
    %35 = memref.load %arg11[%c17] : memref<96xf32, #tpu.memory_space<smem>>
    %c18 = arith.constant 18 : index
    %36 = memref.load %arg11[%c18] : memref<96xf32, #tpu.memory_space<smem>>
    %c19 = arith.constant 19 : index
    %37 = memref.load %arg11[%c19] : memref<96xf32, #tpu.memory_space<smem>>
    %c20 = arith.constant 20 : index
    %38 = memref.load %arg11[%c20] : memref<96xf32, #tpu.memory_space<smem>>
    %c21 = arith.constant 21 : index
    %39 = memref.load %arg11[%c21] : memref<96xf32, #tpu.memory_space<smem>>
    %c22 = arith.constant 22 : index
    %40 = memref.load %arg11[%c22] : memref<96xf32, #tpu.memory_space<smem>>
    %c23 = arith.constant 23 : index
    %41 = memref.load %arg11[%c23] : memref<96xf32, #tpu.memory_space<smem>>
    %c24 = arith.constant 24 : index
    %42 = memref.load %arg11[%c24] : memref<96xf32, #tpu.memory_space<smem>>
    %c25 = arith.constant 25 : index
    %43 = memref.load %arg11[%c25] : memref<96xf32, #tpu.memory_space<smem>>
    %c26 = arith.constant 26 : index
    %44 = memref.load %arg11[%c26] : memref<96xf32, #tpu.memory_space<smem>>
    %c27 = arith.constant 27 : index
    %45 = memref.load %arg11[%c27] : memref<96xf32, #tpu.memory_space<smem>>
    %c28 = arith.constant 28 : index
    %46 = memref.load %arg11[%c28] : memref<96xf32, #tpu.memory_space<smem>>
    %c29 = arith.constant 29 : index
    %47 = memref.load %arg11[%c29] : memref<96xf32, #tpu.memory_space<smem>>
    %c30 = arith.constant 30 : index
    %48 = memref.load %arg11[%c30] : memref<96xf32, #tpu.memory_space<smem>>
    %c31 = arith.constant 31 : index
    %49 = memref.load %arg11[%c31] : memref<96xf32, #tpu.memory_space<smem>>
    %c32 = arith.constant 32 : index
    %50 = memref.load %arg11[%c32] : memref<96xf32, #tpu.memory_space<smem>>
    %c33 = arith.constant 33 : index
    %51 = memref.load %arg11[%c33] : memref<96xf32, #tpu.memory_space<smem>>
    %c34 = arith.constant 34 : index
    %52 = memref.load %arg11[%c34] : memref<96xf32, #tpu.memory_space<smem>>
    %c35 = arith.constant 35 : index
    %53 = memref.load %arg11[%c35] : memref<96xf32, #tpu.memory_space<smem>>
    %c36 = arith.constant 36 : index
    %54 = memref.load %arg11[%c36] : memref<96xf32, #tpu.memory_space<smem>>
    %c37 = arith.constant 37 : index
    %55 = memref.load %arg11[%c37] : memref<96xf32, #tpu.memory_space<smem>>
    %c38 = arith.constant 38 : index
    %56 = memref.load %arg11[%c38] : memref<96xf32, #tpu.memory_space<smem>>
    %c39 = arith.constant 39 : index
    %57 = memref.load %arg11[%c39] : memref<96xf32, #tpu.memory_space<smem>>
    %c40 = arith.constant 40 : index
    %58 = memref.load %arg11[%c40] : memref<96xf32, #tpu.memory_space<smem>>
    %c41 = arith.constant 41 : index
    %59 = memref.load %arg11[%c41] : memref<96xf32, #tpu.memory_space<smem>>
    %c42 = arith.constant 42 : index
    %60 = memref.load %arg11[%c42] : memref<96xf32, #tpu.memory_space<smem>>
    %c43 = arith.constant 43 : index
    %61 = memref.load %arg11[%c43] : memref<96xf32, #tpu.memory_space<smem>>
    %c44 = arith.constant 44 : index
    %62 = memref.load %arg11[%c44] : memref<96xf32, #tpu.memory_space<smem>>
    %c45 = arith.constant 45 : index
    %63 = memref.load %arg11[%c45] : memref<96xf32, #tpu.memory_space<smem>>
    %c46 = arith.constant 46 : index
    %64 = memref.load %arg11[%c46] : memref<96xf32, #tpu.memory_space<smem>>
    %c47 = arith.constant 47 : index
    %65 = memref.load %arg11[%c47] : memref<96xf32, #tpu.memory_space<smem>>
    %c48 = arith.constant 48 : index
    %66 = memref.load %arg11[%c48] : memref<96xf32, #tpu.memory_space<smem>>
    %c49 = arith.constant 49 : index
    %67 = memref.load %arg11[%c49] : memref<96xf32, #tpu.memory_space<smem>>
    %c50 = arith.constant 50 : index
    %68 = memref.load %arg11[%c50] : memref<96xf32, #tpu.memory_space<smem>>
    %c51 = arith.constant 51 : index
    %69 = memref.load %arg11[%c51] : memref<96xf32, #tpu.memory_space<smem>>
    %c52 = arith.constant 52 : index
    %70 = memref.load %arg11[%c52] : memref<96xf32, #tpu.memory_space<smem>>
    %c53 = arith.constant 53 : index
    %71 = memref.load %arg11[%c53] : memref<96xf32, #tpu.memory_space<smem>>
    %c54 = arith.constant 54 : index
    %72 = memref.load %arg11[%c54] : memref<96xf32, #tpu.memory_space<smem>>
    %c55 = arith.constant 55 : index
    %73 = memref.load %arg11[%c55] : memref<96xf32, #tpu.memory_space<smem>>
    %c56 = arith.constant 56 : index
    %74 = memref.load %arg11[%c56] : memref<96xf32, #tpu.memory_space<smem>>
    %c57 = arith.constant 57 : index
    %75 = memref.load %arg11[%c57] : memref<96xf32, #tpu.memory_space<smem>>
    %c58 = arith.constant 58 : index
    %76 = memref.load %arg11[%c58] : memref<96xf32, #tpu.memory_space<smem>>
    %c59 = arith.constant 59 : index
    %77 = memref.load %arg11[%c59] : memref<96xf32, #tpu.memory_space<smem>>
    %c60 = arith.constant 60 : index
    %78 = memref.load %arg11[%c60] : memref<96xf32, #tpu.memory_space<smem>>
    %c61 = arith.constant 61 : index
    %79 = memref.load %arg11[%c61] : memref<96xf32, #tpu.memory_space<smem>>
    %c62 = arith.constant 62 : index
    %80 = memref.load %arg11[%c62] : memref<96xf32, #tpu.memory_space<smem>>
    %c63 = arith.constant 63 : index
    %81 = memref.load %arg11[%c63] : memref<96xf32, #tpu.memory_space<smem>>
    %c64 = arith.constant 64 : index
    %82 = memref.load %arg11[%c64] : memref<96xf32, #tpu.memory_space<smem>>
    %c65 = arith.constant 65 : index
    %83 = memref.load %arg11[%c65] : memref<96xf32, #tpu.memory_space<smem>>
    %c66 = arith.constant 66 : index
    %84 = memref.load %arg11[%c66] : memref<96xf32, #tpu.memory_space<smem>>
    %c67 = arith.constant 67 : index
    %85 = memref.load %arg11[%c67] : memref<96xf32, #tpu.memory_space<smem>>
    %c68 = arith.constant 68 : index
    %86 = memref.load %arg11[%c68] : memref<96xf32, #tpu.memory_space<smem>>
    %c69 = arith.constant 69 : index
    %87 = memref.load %arg11[%c69] : memref<96xf32, #tpu.memory_space<smem>>
    %c70 = arith.constant 70 : index
    %88 = memref.load %arg11[%c70] : memref<96xf32, #tpu.memory_space<smem>>
    %c71 = arith.constant 71 : index
    %89 = memref.load %arg11[%c71] : memref<96xf32, #tpu.memory_space<smem>>
    %c72 = arith.constant 72 : index
    %90 = memref.load %arg11[%c72] : memref<96xf32, #tpu.memory_space<smem>>
    %c73 = arith.constant 73 : index
    %91 = memref.load %arg11[%c73] : memref<96xf32, #tpu.memory_space<smem>>
    %c74 = arith.constant 74 : index
    %92 = memref.load %arg11[%c74] : memref<96xf32, #tpu.memory_space<smem>>
    %c75 = arith.constant 75 : index
    %93 = memref.load %arg11[%c75] : memref<96xf32, #tpu.memory_space<smem>>
    %c76 = arith.constant 76 : index
    %94 = memref.load %arg11[%c76] : memref<96xf32, #tpu.memory_space<smem>>
    %c77 = arith.constant 77 : index
    %95 = memref.load %arg11[%c77] : memref<96xf32, #tpu.memory_space<smem>>
    %c78 = arith.constant 78 : index
    %96 = memref.load %arg11[%c78] : memref<96xf32, #tpu.memory_space<smem>>
    %c79 = arith.constant 79 : index
    %97 = memref.load %arg11[%c79] : memref<96xf32, #tpu.memory_space<smem>>
    %c80 = arith.constant 80 : index
    %98 = memref.load %arg11[%c80] : memref<96xf32, #tpu.memory_space<smem>>
    %c81 = arith.constant 81 : index
    %99 = memref.load %arg11[%c81] : memref<96xf32, #tpu.memory_space<smem>>
    %c82 = arith.constant 82 : index
    %100 = memref.load %arg11[%c82] : memref<96xf32, #tpu.memory_space<smem>>
    %c83 = arith.constant 83 : index
    %101 = memref.load %arg11[%c83] : memref<96xf32, #tpu.memory_space<smem>>
    %c84 = arith.constant 84 : index
    %102 = memref.load %arg11[%c84] : memref<96xf32, #tpu.memory_space<smem>>
    %c85 = arith.constant 85 : index
    %103 = memref.load %arg11[%c85] : memref<96xf32, #tpu.memory_space<smem>>
    %c86 = arith.constant 86 : index
    %104 = memref.load %arg11[%c86] : memref<96xf32, #tpu.memory_space<smem>>
    %c87 = arith.constant 87 : index
    %105 = memref.load %arg11[%c87] : memref<96xf32, #tpu.memory_space<smem>>
    %c88 = arith.constant 88 : index
    %106 = memref.load %arg11[%c88] : memref<96xf32, #tpu.memory_space<smem>>
    %c89 = arith.constant 89 : index
    %107 = memref.load %arg11[%c89] : memref<96xf32, #tpu.memory_space<smem>>
    %c90 = arith.constant 90 : index
    %108 = memref.load %arg11[%c90] : memref<96xf32, #tpu.memory_space<smem>>
    %c91 = arith.constant 91 : index
    %109 = memref.load %arg11[%c91] : memref<96xf32, #tpu.memory_space<smem>>
    %c92 = arith.constant 92 : index
    %110 = memref.load %arg11[%c92] : memref<96xf32, #tpu.memory_space<smem>>
    %c93 = arith.constant 93 : index
    %111 = memref.load %arg11[%c93] : memref<96xf32, #tpu.memory_space<smem>>
    %c94 = arith.constant 94 : index
    %112 = memref.load %arg11[%c94] : memref<96xf32, #tpu.memory_space<smem>>
    %c95 = arith.constant 95 : index
    %113 = memref.load %arg11[%c95] : memref<96xf32, #tpu.memory_space<smem>>
    %c0_18 = arith.constant 0 : index
    %114 = memref.load %arg8[%c0_18] : memref<1xf32, #tpu.memory_space<smem>>
    %c0_19 = arith.constant 0 : index
    %115 = memref.load %arg9[%c0_19] : memref<1xf32, #tpu.memory_space<smem>>
    %c0_20 = arith.constant 0 : index
    %116 = memref.load %arg6[%c0_20] : memref<8xf32, #tpu.memory_space<smem>>
    %c1_21 = arith.constant 1 : index
    %117 = memref.load %arg6[%c1_21] : memref<8xf32, #tpu.memory_space<smem>>
    %c2_22 = arith.constant 2 : index
    %118 = memref.load %arg6[%c2_22] : memref<8xf32, #tpu.memory_space<smem>>
    %c3_23 = arith.constant 3 : index
    %119 = memref.load %arg6[%c3_23] : memref<8xf32, #tpu.memory_space<smem>>
    %c4_24 = arith.constant 4 : index
    %120 = memref.load %arg6[%c4_24] : memref<8xf32, #tpu.memory_space<smem>>
    %c5_25 = arith.constant 5 : index
    %121 = memref.load %arg6[%c5_25] : memref<8xf32, #tpu.memory_space<smem>>
    %c6_26 = arith.constant 6 : index
    %122 = memref.load %arg6[%c6_26] : memref<8xf32, #tpu.memory_space<smem>>
    %c7_27 = arith.constant 7 : index
    %123 = memref.load %arg6[%c7_27] : memref<8xf32, #tpu.memory_space<smem>>
    %c0_28 = arith.constant 0 : index
    %124 = memref.load %arg7[%c0_28] : memref<8xf32, #tpu.memory_space<smem>>
    %c1_29 = arith.constant 1 : index
    %125 = memref.load %arg7[%c1_29] : memref<8xf32, #tpu.memory_space<smem>>
    %c2_30 = arith.constant 2 : index
    %126 = memref.load %arg7[%c2_30] : memref<8xf32, #tpu.memory_space<smem>>
    %c3_31 = arith.constant 3 : index
    %127 = memref.load %arg7[%c3_31] : memref<8xf32, #tpu.memory_space<smem>>
    %c4_32 = arith.constant 4 : index
    %128 = memref.load %arg7[%c4_32] : memref<8xf32, #tpu.memory_space<smem>>
    %c5_33 = arith.constant 5 : index
    %129 = memref.load %arg7[%c5_33] : memref<8xf32, #tpu.memory_space<smem>>
    %c6_34 = arith.constant 6 : index
    %130 = memref.load %arg7[%c6_34] : memref<8xf32, #tpu.memory_space<smem>>
    %c7_35 = arith.constant 7 : index
    %131 = memref.load %arg7[%c7_35] : memref<8xf32, #tpu.memory_space<smem>>
    %c0_36 = arith.constant 0 : index
    %132 = memref.load %arg10[%c0_36] : memref<24xf32, #tpu.memory_space<smem>>
    %c1_37 = arith.constant 1 : index
    %133 = memref.load %arg10[%c1_37] : memref<24xf32, #tpu.memory_space<smem>>
    %c2_38 = arith.constant 2 : index
    %134 = memref.load %arg10[%c2_38] : memref<24xf32, #tpu.memory_space<smem>>
    %c3_39 = arith.constant 3 : index
    %135 = memref.load %arg10[%c3_39] : memref<24xf32, #tpu.memory_space<smem>>
    %c4_40 = arith.constant 4 : index
    %136 = memref.load %arg10[%c4_40] : memref<24xf32, #tpu.memory_space<smem>>
    %c5_41 = arith.constant 5 : index
    %137 = memref.load %arg10[%c5_41] : memref<24xf32, #tpu.memory_space<smem>>
    %c6_42 = arith.constant 6 : index
    %138 = memref.load %arg10[%c6_42] : memref<24xf32, #tpu.memory_space<smem>>
    %c7_43 = arith.constant 7 : index
    %139 = memref.load %arg10[%c7_43] : memref<24xf32, #tpu.memory_space<smem>>
    %c8_44 = arith.constant 8 : index
    %140 = memref.load %arg10[%c8_44] : memref<24xf32, #tpu.memory_space<smem>>
    %c9_45 = arith.constant 9 : index
    %141 = memref.load %arg10[%c9_45] : memref<24xf32, #tpu.memory_space<smem>>
    %c10_46 = arith.constant 10 : index
    %142 = memref.load %arg10[%c10_46] : memref<24xf32, #tpu.memory_space<smem>>
    %c11_47 = arith.constant 11 : index
    %143 = memref.load %arg10[%c11_47] : memref<24xf32, #tpu.memory_space<smem>>
    %c12_48 = arith.constant 12 : index
    %144 = memref.load %arg10[%c12_48] : memref<24xf32, #tpu.memory_space<smem>>
    %c13_49 = arith.constant 13 : index
    %145 = memref.load %arg10[%c13_49] : memref<24xf32, #tpu.memory_space<smem>>
    %c14_50 = arith.constant 14 : index
    %146 = memref.load %arg10[%c14_50] : memref<24xf32, #tpu.memory_space<smem>>
    %c15_51 = arith.constant 15 : index
    %147 = memref.load %arg10[%c15_51] : memref<24xf32, #tpu.memory_space<smem>>
    %c16_52 = arith.constant 16 : index
    %148 = memref.load %arg10[%c16_52] : memref<24xf32, #tpu.memory_space<smem>>
    %c17_53 = arith.constant 17 : index
    %149 = memref.load %arg10[%c17_53] : memref<24xf32, #tpu.memory_space<smem>>
    %c18_54 = arith.constant 18 : index
    %150 = memref.load %arg10[%c18_54] : memref<24xf32, #tpu.memory_space<smem>>
    %c19_55 = arith.constant 19 : index
    %151 = memref.load %arg10[%c19_55] : memref<24xf32, #tpu.memory_space<smem>>
    %c20_56 = arith.constant 20 : index
    %152 = memref.load %arg10[%c20_56] : memref<24xf32, #tpu.memory_space<smem>>
    %c21_57 = arith.constant 21 : index
    %153 = memref.load %arg10[%c21_57] : memref<24xf32, #tpu.memory_space<smem>>
    %c22_58 = arith.constant 22 : index
    %154 = memref.load %arg10[%c22_58] : memref<24xf32, #tpu.memory_space<smem>>
    %c23_59 = arith.constant 23 : index
    %155 = memref.load %arg10[%c23_59] : memref<24xf32, #tpu.memory_space<smem>>
    %c0_60 = arith.constant 0 : index
    %156 = memref.load %arg12[%c0_60] : memref<72xf32, #tpu.memory_space<smem>>
    %c1_61 = arith.constant 1 : index
    %157 = memref.load %arg12[%c1_61] : memref<72xf32, #tpu.memory_space<smem>>
    %c2_62 = arith.constant 2 : index
    %158 = memref.load %arg12[%c2_62] : memref<72xf32, #tpu.memory_space<smem>>
    %c3_63 = arith.constant 3 : index
    %159 = memref.load %arg12[%c3_63] : memref<72xf32, #tpu.memory_space<smem>>
    %c4_64 = arith.constant 4 : index
    %160 = memref.load %arg12[%c4_64] : memref<72xf32, #tpu.memory_space<smem>>
    %c5_65 = arith.constant 5 : index
    %161 = memref.load %arg12[%c5_65] : memref<72xf32, #tpu.memory_space<smem>>
    %c6_66 = arith.constant 6 : index
    %162 = memref.load %arg12[%c6_66] : memref<72xf32, #tpu.memory_space<smem>>
    %c7_67 = arith.constant 7 : index
    %163 = memref.load %arg12[%c7_67] : memref<72xf32, #tpu.memory_space<smem>>
    %c8_68 = arith.constant 8 : index
    %164 = memref.load %arg12[%c8_68] : memref<72xf32, #tpu.memory_space<smem>>
    %c9_69 = arith.constant 9 : index
    %165 = memref.load %arg12[%c9_69] : memref<72xf32, #tpu.memory_space<smem>>
    %c10_70 = arith.constant 10 : index
    %166 = memref.load %arg12[%c10_70] : memref<72xf32, #tpu.memory_space<smem>>
    %c11_71 = arith.constant 11 : index
    %167 = memref.load %arg12[%c11_71] : memref<72xf32, #tpu.memory_space<smem>>
    %c12_72 = arith.constant 12 : index
    %168 = memref.load %arg12[%c12_72] : memref<72xf32, #tpu.memory_space<smem>>
    %c13_73 = arith.constant 13 : index
    %169 = memref.load %arg12[%c13_73] : memref<72xf32, #tpu.memory_space<smem>>
    %c14_74 = arith.constant 14 : index
    %170 = memref.load %arg12[%c14_74] : memref<72xf32, #tpu.memory_space<smem>>
    %c15_75 = arith.constant 15 : index
    %171 = memref.load %arg12[%c15_75] : memref<72xf32, #tpu.memory_space<smem>>
    %c16_76 = arith.constant 16 : index
    %172 = memref.load %arg12[%c16_76] : memref<72xf32, #tpu.memory_space<smem>>
    %c17_77 = arith.constant 17 : index
    %173 = memref.load %arg12[%c17_77] : memref<72xf32, #tpu.memory_space<smem>>
    %c18_78 = arith.constant 18 : index
    %174 = memref.load %arg12[%c18_78] : memref<72xf32, #tpu.memory_space<smem>>
    %c19_79 = arith.constant 19 : index
    %175 = memref.load %arg12[%c19_79] : memref<72xf32, #tpu.memory_space<smem>>
    %c20_80 = arith.constant 20 : index
    %176 = memref.load %arg12[%c20_80] : memref<72xf32, #tpu.memory_space<smem>>
    %c21_81 = arith.constant 21 : index
    %177 = memref.load %arg12[%c21_81] : memref<72xf32, #tpu.memory_space<smem>>
    %c22_82 = arith.constant 22 : index
    %178 = memref.load %arg12[%c22_82] : memref<72xf32, #tpu.memory_space<smem>>
    %c23_83 = arith.constant 23 : index
    %179 = memref.load %arg12[%c23_83] : memref<72xf32, #tpu.memory_space<smem>>
    %c24_84 = arith.constant 24 : index
    %180 = memref.load %arg12[%c24_84] : memref<72xf32, #tpu.memory_space<smem>>
    %c25_85 = arith.constant 25 : index
    %181 = memref.load %arg12[%c25_85] : memref<72xf32, #tpu.memory_space<smem>>
    %c26_86 = arith.constant 26 : index
    %182 = memref.load %arg12[%c26_86] : memref<72xf32, #tpu.memory_space<smem>>
    %c27_87 = arith.constant 27 : index
    %183 = memref.load %arg12[%c27_87] : memref<72xf32, #tpu.memory_space<smem>>
    %c28_88 = arith.constant 28 : index
    %184 = memref.load %arg12[%c28_88] : memref<72xf32, #tpu.memory_space<smem>>
    %c29_89 = arith.constant 29 : index
    %185 = memref.load %arg12[%c29_89] : memref<72xf32, #tpu.memory_space<smem>>
    %c30_90 = arith.constant 30 : index
    %186 = memref.load %arg12[%c30_90] : memref<72xf32, #tpu.memory_space<smem>>
    %c31_91 = arith.constant 31 : index
    %187 = memref.load %arg12[%c31_91] : memref<72xf32, #tpu.memory_space<smem>>
    %c32_92 = arith.constant 32 : index
    %188 = memref.load %arg12[%c32_92] : memref<72xf32, #tpu.memory_space<smem>>
    %c33_93 = arith.constant 33 : index
    %189 = memref.load %arg12[%c33_93] : memref<72xf32, #tpu.memory_space<smem>>
    %c34_94 = arith.constant 34 : index
    %190 = memref.load %arg12[%c34_94] : memref<72xf32, #tpu.memory_space<smem>>
    %c35_95 = arith.constant 35 : index
    %191 = memref.load %arg12[%c35_95] : memref<72xf32, #tpu.memory_space<smem>>
    %c36_96 = arith.constant 36 : index
    %192 = memref.load %arg12[%c36_96] : memref<72xf32, #tpu.memory_space<smem>>
    %c37_97 = arith.constant 37 : index
    %193 = memref.load %arg12[%c37_97] : memref<72xf32, #tpu.memory_space<smem>>
    %c38_98 = arith.constant 38 : index
    %194 = memref.load %arg12[%c38_98] : memref<72xf32, #tpu.memory_space<smem>>
    %c39_99 = arith.constant 39 : index
    %195 = memref.load %arg12[%c39_99] : memref<72xf32, #tpu.memory_space<smem>>
    %c40_100 = arith.constant 40 : index
    %196 = memref.load %arg12[%c40_100] : memref<72xf32, #tpu.memory_space<smem>>
    %c41_101 = arith.constant 41 : index
    %197 = memref.load %arg12[%c41_101] : memref<72xf32, #tpu.memory_space<smem>>
    %c42_102 = arith.constant 42 : index
    %198 = memref.load %arg12[%c42_102] : memref<72xf32, #tpu.memory_space<smem>>
    %c43_103 = arith.constant 43 : index
    %199 = memref.load %arg12[%c43_103] : memref<72xf32, #tpu.memory_space<smem>>
    %c44_104 = arith.constant 44 : index
    %200 = memref.load %arg12[%c44_104] : memref<72xf32, #tpu.memory_space<smem>>
    %c45_105 = arith.constant 45 : index
    %201 = memref.load %arg12[%c45_105] : memref<72xf32, #tpu.memory_space<smem>>
    %c46_106 = arith.constant 46 : index
    %202 = memref.load %arg12[%c46_106] : memref<72xf32, #tpu.memory_space<smem>>
    %c47_107 = arith.constant 47 : index
    %203 = memref.load %arg12[%c47_107] : memref<72xf32, #tpu.memory_space<smem>>
    %c48_108 = arith.constant 48 : index
    %204 = memref.load %arg12[%c48_108] : memref<72xf32, #tpu.memory_space<smem>>
    %c49_109 = arith.constant 49 : index
    %205 = memref.load %arg12[%c49_109] : memref<72xf32, #tpu.memory_space<smem>>
    %c50_110 = arith.constant 50 : index
    %206 = memref.load %arg12[%c50_110] : memref<72xf32, #tpu.memory_space<smem>>
    %c51_111 = arith.constant 51 : index
    %207 = memref.load %arg12[%c51_111] : memref<72xf32, #tpu.memory_space<smem>>
    %c52_112 = arith.constant 52 : index
    %208 = memref.load %arg12[%c52_112] : memref<72xf32, #tpu.memory_space<smem>>
    %c53_113 = arith.constant 53 : index
    %209 = memref.load %arg12[%c53_113] : memref<72xf32, #tpu.memory_space<smem>>
    %c54_114 = arith.constant 54 : index
    %210 = memref.load %arg12[%c54_114] : memref<72xf32, #tpu.memory_space<smem>>
    %c55_115 = arith.constant 55 : index
    %211 = memref.load %arg12[%c55_115] : memref<72xf32, #tpu.memory_space<smem>>
    %c56_116 = arith.constant 56 : index
    %212 = memref.load %arg12[%c56_116] : memref<72xf32, #tpu.memory_space<smem>>
    %c57_117 = arith.constant 57 : index
    %213 = memref.load %arg12[%c57_117] : memref<72xf32, #tpu.memory_space<smem>>
    %c58_118 = arith.constant 58 : index
    %214 = memref.load %arg12[%c58_118] : memref<72xf32, #tpu.memory_space<smem>>
    %c59_119 = arith.constant 59 : index
    %215 = memref.load %arg12[%c59_119] : memref<72xf32, #tpu.memory_space<smem>>
    %c60_120 = arith.constant 60 : index
    %216 = memref.load %arg12[%c60_120] : memref<72xf32, #tpu.memory_space<smem>>
    %c61_121 = arith.constant 61 : index
    %217 = memref.load %arg12[%c61_121] : memref<72xf32, #tpu.memory_space<smem>>
    %c62_122 = arith.constant 62 : index
    %218 = memref.load %arg12[%c62_122] : memref<72xf32, #tpu.memory_space<smem>>
    %c63_123 = arith.constant 63 : index
    %219 = memref.load %arg12[%c63_123] : memref<72xf32, #tpu.memory_space<smem>>
    %c64_124 = arith.constant 64 : index
    %220 = memref.load %arg12[%c64_124] : memref<72xf32, #tpu.memory_space<smem>>
    %c65_125 = arith.constant 65 : index
    %221 = memref.load %arg12[%c65_125] : memref<72xf32, #tpu.memory_space<smem>>
    %c66_126 = arith.constant 66 : index
    %222 = memref.load %arg12[%c66_126] : memref<72xf32, #tpu.memory_space<smem>>
    %c67_127 = arith.constant 67 : index
    %223 = memref.load %arg12[%c67_127] : memref<72xf32, #tpu.memory_space<smem>>
    %c68_128 = arith.constant 68 : index
    %224 = memref.load %arg12[%c68_128] : memref<72xf32, #tpu.memory_space<smem>>
    %c69_129 = arith.constant 69 : index
    %225 = memref.load %arg12[%c69_129] : memref<72xf32, #tpu.memory_space<smem>>
    %c70_130 = arith.constant 70 : index
    %226 = memref.load %arg12[%c70_130] : memref<72xf32, #tpu.memory_space<smem>>
    %c71_131 = arith.constant 71 : index
    %227 = memref.load %arg12[%c71_131] : memref<72xf32, #tpu.memory_space<smem>>
    %c0_132 = arith.constant 0 : index
    %228 = memref.load %arg13[%c0_132] : memref<32xf32, #tpu.memory_space<smem>>
    %c1_133 = arith.constant 1 : index
    %229 = memref.load %arg13[%c1_133] : memref<32xf32, #tpu.memory_space<smem>>
    %c2_134 = arith.constant 2 : index
    %230 = memref.load %arg13[%c2_134] : memref<32xf32, #tpu.memory_space<smem>>
    %c3_135 = arith.constant 3 : index
    %231 = memref.load %arg13[%c3_135] : memref<32xf32, #tpu.memory_space<smem>>
    %c4_136 = arith.constant 4 : index
    %232 = memref.load %arg13[%c4_136] : memref<32xf32, #tpu.memory_space<smem>>
    %c5_137 = arith.constant 5 : index
    %233 = memref.load %arg13[%c5_137] : memref<32xf32, #tpu.memory_space<smem>>
    %c6_138 = arith.constant 6 : index
    %234 = memref.load %arg13[%c6_138] : memref<32xf32, #tpu.memory_space<smem>>
    %c7_139 = arith.constant 7 : index
    %235 = memref.load %arg13[%c7_139] : memref<32xf32, #tpu.memory_space<smem>>
    %c8_140 = arith.constant 8 : index
    %236 = memref.load %arg13[%c8_140] : memref<32xf32, #tpu.memory_space<smem>>
    %c9_141 = arith.constant 9 : index
    %237 = memref.load %arg13[%c9_141] : memref<32xf32, #tpu.memory_space<smem>>
    %c10_142 = arith.constant 10 : index
    %238 = memref.load %arg13[%c10_142] : memref<32xf32, #tpu.memory_space<smem>>
    %c11_143 = arith.constant 11 : index
    %239 = memref.load %arg13[%c11_143] : memref<32xf32, #tpu.memory_space<smem>>
    %c12_144 = arith.constant 12 : index
    %240 = memref.load %arg13[%c12_144] : memref<32xf32, #tpu.memory_space<smem>>
    %c13_145 = arith.constant 13 : index
    %241 = memref.load %arg13[%c13_145] : memref<32xf32, #tpu.memory_space<smem>>
    %c14_146 = arith.constant 14 : index
    %242 = memref.load %arg13[%c14_146] : memref<32xf32, #tpu.memory_space<smem>>
    %c15_147 = arith.constant 15 : index
    %243 = memref.load %arg13[%c15_147] : memref<32xf32, #tpu.memory_space<smem>>
    %c16_148 = arith.constant 16 : index
    %244 = memref.load %arg13[%c16_148] : memref<32xf32, #tpu.memory_space<smem>>
    %c17_149 = arith.constant 17 : index
    %245 = memref.load %arg13[%c17_149] : memref<32xf32, #tpu.memory_space<smem>>
    %c18_150 = arith.constant 18 : index
    %246 = memref.load %arg13[%c18_150] : memref<32xf32, #tpu.memory_space<smem>>
    %c19_151 = arith.constant 19 : index
    %247 = memref.load %arg13[%c19_151] : memref<32xf32, #tpu.memory_space<smem>>
    %c20_152 = arith.constant 20 : index
    %248 = memref.load %arg13[%c20_152] : memref<32xf32, #tpu.memory_space<smem>>
    %c21_153 = arith.constant 21 : index
    %249 = memref.load %arg13[%c21_153] : memref<32xf32, #tpu.memory_space<smem>>
    %c22_154 = arith.constant 22 : index
    %250 = memref.load %arg13[%c22_154] : memref<32xf32, #tpu.memory_space<smem>>
    %c23_155 = arith.constant 23 : index
    %251 = memref.load %arg13[%c23_155] : memref<32xf32, #tpu.memory_space<smem>>
    %c24_156 = arith.constant 24 : index
    %252 = memref.load %arg13[%c24_156] : memref<32xf32, #tpu.memory_space<smem>>
    %c25_157 = arith.constant 25 : index
    %253 = memref.load %arg13[%c25_157] : memref<32xf32, #tpu.memory_space<smem>>
    %c26_158 = arith.constant 26 : index
    %254 = memref.load %arg13[%c26_158] : memref<32xf32, #tpu.memory_space<smem>>
    %c27_159 = arith.constant 27 : index
    %255 = memref.load %arg13[%c27_159] : memref<32xf32, #tpu.memory_space<smem>>
    %c28_160 = arith.constant 28 : index
    %256 = memref.load %arg13[%c28_160] : memref<32xf32, #tpu.memory_space<smem>>
    %c29_161 = arith.constant 29 : index
    %257 = memref.load %arg13[%c29_161] : memref<32xf32, #tpu.memory_space<smem>>
    %c30_162 = arith.constant 30 : index
    %258 = memref.load %arg13[%c30_162] : memref<32xf32, #tpu.memory_space<smem>>
    %c31_163 = arith.constant 31 : index
    %259 = memref.load %arg13[%c31_163] : memref<32xf32, #tpu.memory_space<smem>>
    %c0_164 = arith.constant 0 : index
    %c0_165 = arith.constant 0 : index
    %260 = vector.load %arg1[%c0_164, %c0_165] : memref<8x128xf32, #tpu.memory_space<vmem>>, vector<8x128xf32>
    %c0_i32 = arith.constant 0 : i32
    %261 = vector.broadcast %c0_i32 : i32 to vector<8x128xi32>
    %262 = vector.broadcast %115 : f32 to vector<8x128xf32>
    %263 = arith.mulf %260, %262 : vector<8x128xf32>
    %264 = math.floor %263 : vector<8x128xf32>
    %265 = vector.broadcast %114 : f32 to vector<8x128xf32>
    %266 = arith.mulf %264, %265 : vector<8x128xf32>
    %267 = arith.subf %260, %266 : vector<8x128xf32>
    %268 = vector.broadcast %116 : f32 to vector<8x128xf32>
    %269 = vector.broadcast %124 : f32 to vector<8x128xf32>
    %270 = vector.broadcast %132 : f32 to vector<8x128xf32>
    %271 = vector.broadcast %133 : f32 to vector<8x128xf32>
    %272 = vector.broadcast %134 : f32 to vector<8x128xf32>
    %273 = vector.broadcast %117 : f32 to vector<8x128xf32>
    %274 = arith.cmpf oge, %267, %273 : vector<8x128xf32>
    %c1_i32 = arith.constant 1 : i32
    %275 = vector.broadcast %c1_i32 : i32 to vector<8x128xi32>
    %276 = arith.select %274, %275, %261 : vector<8x128xi1>, vector<8x128xi32>
    %277 = vector.broadcast %117 : f32 to vector<8x128xf32>
    %278 = arith.select %274, %277, %268 : vector<8x128xi1>, vector<8x128xf32>
    %279 = vector.broadcast %125 : f32 to vector<8x128xf32>
    %280 = arith.select %274, %279, %269 : vector<8x128xi1>, vector<8x128xf32>
    %281 = vector.broadcast %135 : f32 to vector<8x128xf32>
    %282 = arith.select %274, %281, %270 : vector<8x128xi1>, vector<8x128xf32>
    %283 = vector.broadcast %136 : f32 to vector<8x128xf32>
    %284 = arith.select %274, %283, %271 : vector<8x128xi1>, vector<8x128xf32>
    %285 = vector.broadcast %137 : f32 to vector<8x128xf32>
    %286 = arith.select %274, %285, %272 : vector<8x128xi1>, vector<8x128xf32>
    %287 = vector.broadcast %118 : f32 to vector<8x128xf32>
    %288 = arith.cmpf oge, %267, %287 : vector<8x128xf32>
    %c2_i32 = arith.constant 2 : i32
    %289 = vector.broadcast %c2_i32 : i32 to vector<8x128xi32>
    %290 = arith.select %288, %289, %276 : vector<8x128xi1>, vector<8x128xi32>
    %291 = vector.broadcast %118 : f32 to vector<8x128xf32>
    %292 = arith.select %288, %291, %278 : vector<8x128xi1>, vector<8x128xf32>
    %293 = vector.broadcast %126 : f32 to vector<8x128xf32>
    %294 = arith.select %288, %293, %280 : vector<8x128xi1>, vector<8x128xf32>
    %295 = vector.broadcast %138 : f32 to vector<8x128xf32>
    %296 = arith.select %288, %295, %282 : vector<8x128xi1>, vector<8x128xf32>
    %297 = vector.broadcast %139 : f32 to vector<8x128xf32>
    %298 = arith.select %288, %297, %284 : vector<8x128xi1>, vector<8x128xf32>
    %299 = vector.broadcast %140 : f32 to vector<8x128xf32>
    %300 = arith.select %288, %299, %286 : vector<8x128xi1>, vector<8x128xf32>
    %301 = vector.broadcast %119 : f32 to vector<8x128xf32>
    %302 = arith.cmpf oge, %267, %301 : vector<8x128xf32>
    %c3_i32 = arith.constant 3 : i32
    %303 = vector.broadcast %c3_i32 : i32 to vector<8x128xi32>
    %304 = arith.select %302, %303, %290 : vector<8x128xi1>, vector<8x128xi32>
    %305 = vector.broadcast %119 : f32 to vector<8x128xf32>
    %306 = arith.select %302, %305, %292 : vector<8x128xi1>, vector<8x128xf32>
    %307 = vector.broadcast %127 : f32 to vector<8x128xf32>
    %308 = arith.select %302, %307, %294 : vector<8x128xi1>, vector<8x128xf32>
    %309 = vector.broadcast %141 : f32 to vector<8x128xf32>
    %310 = arith.select %302, %309, %296 : vector<8x128xi1>, vector<8x128xf32>
    %311 = vector.broadcast %142 : f32 to vector<8x128xf32>
    %312 = arith.select %302, %311, %298 : vector<8x128xi1>, vector<8x128xf32>
    %313 = vector.broadcast %143 : f32 to vector<8x128xf32>
    %314 = arith.select %302, %313, %300 : vector<8x128xi1>, vector<8x128xf32>
    %315 = vector.broadcast %120 : f32 to vector<8x128xf32>
    %316 = arith.cmpf oge, %267, %315 : vector<8x128xf32>
    %c4_i32 = arith.constant 4 : i32
    %317 = vector.broadcast %c4_i32 : i32 to vector<8x128xi32>
    %318 = arith.select %316, %317, %304 : vector<8x128xi1>, vector<8x128xi32>
    %319 = vector.broadcast %120 : f32 to vector<8x128xf32>
    %320 = arith.select %316, %319, %306 : vector<8x128xi1>, vector<8x128xf32>
    %321 = vector.broadcast %128 : f32 to vector<8x128xf32>
    %322 = arith.select %316, %321, %308 : vector<8x128xi1>, vector<8x128xf32>
    %323 = vector.broadcast %144 : f32 to vector<8x128xf32>
    %324 = arith.select %316, %323, %310 : vector<8x128xi1>, vector<8x128xf32>
    %325 = vector.broadcast %145 : f32 to vector<8x128xf32>
    %326 = arith.select %316, %325, %312 : vector<8x128xi1>, vector<8x128xf32>
    %327 = vector.broadcast %146 : f32 to vector<8x128xf32>
    %328 = arith.select %316, %327, %314 : vector<8x128xi1>, vector<8x128xf32>
    %329 = vector.broadcast %121 : f32 to vector<8x128xf32>
    %330 = arith.cmpf oge, %267, %329 : vector<8x128xf32>
    %c5_i32 = arith.constant 5 : i32
    %331 = vector.broadcast %c5_i32 : i32 to vector<8x128xi32>
    %332 = arith.select %330, %331, %318 : vector<8x128xi1>, vector<8x128xi32>
    %333 = vector.broadcast %121 : f32 to vector<8x128xf32>
    %334 = arith.select %330, %333, %320 : vector<8x128xi1>, vector<8x128xf32>
    %335 = vector.broadcast %129 : f32 to vector<8x128xf32>
    %336 = arith.select %330, %335, %322 : vector<8x128xi1>, vector<8x128xf32>
    %337 = vector.broadcast %147 : f32 to vector<8x128xf32>
    %338 = arith.select %330, %337, %324 : vector<8x128xi1>, vector<8x128xf32>
    %339 = vector.broadcast %148 : f32 to vector<8x128xf32>
    %340 = arith.select %330, %339, %326 : vector<8x128xi1>, vector<8x128xf32>
    %341 = vector.broadcast %149 : f32 to vector<8x128xf32>
    %342 = arith.select %330, %341, %328 : vector<8x128xi1>, vector<8x128xf32>
    %343 = vector.broadcast %122 : f32 to vector<8x128xf32>
    %344 = arith.cmpf oge, %267, %343 : vector<8x128xf32>
    %c6_i32 = arith.constant 6 : i32
    %345 = vector.broadcast %c6_i32 : i32 to vector<8x128xi32>
    %346 = arith.select %344, %345, %332 : vector<8x128xi1>, vector<8x128xi32>
    %347 = vector.broadcast %122 : f32 to vector<8x128xf32>
    %348 = arith.select %344, %347, %334 : vector<8x128xi1>, vector<8x128xf32>
    %349 = vector.broadcast %130 : f32 to vector<8x128xf32>
    %350 = arith.select %344, %349, %336 : vector<8x128xi1>, vector<8x128xf32>
    %351 = vector.broadcast %150 : f32 to vector<8x128xf32>
    %352 = arith.select %344, %351, %338 : vector<8x128xi1>, vector<8x128xf32>
    %353 = vector.broadcast %151 : f32 to vector<8x128xf32>
    %354 = arith.select %344, %353, %340 : vector<8x128xi1>, vector<8x128xf32>
    %355 = vector.broadcast %152 : f32 to vector<8x128xf32>
    %356 = arith.select %344, %355, %342 : vector<8x128xi1>, vector<8x128xf32>
    %357 = vector.broadcast %123 : f32 to vector<8x128xf32>
    %358 = arith.cmpf oge, %267, %357 : vector<8x128xf32>
    %c7_i32 = arith.constant 7 : i32
    %359 = vector.broadcast %c7_i32 : i32 to vector<8x128xi32>
    %360 = arith.select %358, %359, %346 : vector<8x128xi1>, vector<8x128xi32>
    %361 = vector.broadcast %123 : f32 to vector<8x128xf32>
    %362 = arith.select %358, %361, %348 : vector<8x128xi1>, vector<8x128xf32>
    %363 = vector.broadcast %131 : f32 to vector<8x128xf32>
    %364 = arith.select %358, %363, %350 : vector<8x128xi1>, vector<8x128xf32>
    %365 = vector.broadcast %153 : f32 to vector<8x128xf32>
    %366 = arith.select %358, %365, %352 : vector<8x128xi1>, vector<8x128xf32>
    %367 = vector.broadcast %154 : f32 to vector<8x128xf32>
    %368 = arith.select %358, %367, %354 : vector<8x128xi1>, vector<8x128xf32>
    %369 = vector.broadcast %155 : f32 to vector<8x128xf32>
    %370 = arith.select %358, %369, %356 : vector<8x128xi1>, vector<8x128xf32>
    %371 = arith.subf %267, %362 : vector<8x128xf32>
    %372 = arith.mulf %371, %364 : vector<8x128xf32>
    %373 = arith.mulf %370, %372 : vector<8x128xf32>
    %374 = arith.addf %373, %368 : vector<8x128xf32>
    %375 = arith.mulf %374, %372 : vector<8x128xf32>
    %376 = arith.addf %375, %366 : vector<8x128xf32>
    %377 = vector.broadcast %1 : f32 to vector<8x128xf32>
    %378 = arith.mulf %376, %377 : vector<8x128xf32>
    %379 = math.floor %378 : vector<8x128xf32>
    %380 = vector.broadcast %0 : f32 to vector<8x128xf32>
    %381 = arith.mulf %379, %380 : vector<8x128xf32>
    %382 = arith.subf %376, %381 : vector<8x128xf32>
    %383 = vector.broadcast %2 : f32 to vector<8x128xf32>
    %384 = vector.broadcast %10 : f32 to vector<8x128xf32>
    %c1_i32_166 = arith.constant 1 : i32
    %385 = vector.broadcast %c1_i32_166 : i32 to vector<8x128xi32>
    %386 = arith.cmpi sge, %360, %385 : vector<8x128xi32>
    %387 = vector.broadcast %3 : f32 to vector<8x128xf32>
    %388 = arith.select %386, %387, %383 : vector<8x128xi1>, vector<8x128xf32>
    %389 = vector.broadcast %11 : f32 to vector<8x128xf32>
    %390 = arith.select %386, %389, %384 : vector<8x128xi1>, vector<8x128xf32>
    %c2_i32_167 = arith.constant 2 : i32
    %391 = vector.broadcast %c2_i32_167 : i32 to vector<8x128xi32>
    %392 = arith.cmpi sge, %360, %391 : vector<8x128xi32>
    %393 = vector.broadcast %4 : f32 to vector<8x128xf32>
    %394 = arith.select %392, %393, %388 : vector<8x128xi1>, vector<8x128xf32>
    %395 = vector.broadcast %12 : f32 to vector<8x128xf32>
    %396 = arith.select %392, %395, %390 : vector<8x128xi1>, vector<8x128xf32>
    %c3_i32_168 = arith.constant 3 : i32
    %397 = vector.broadcast %c3_i32_168 : i32 to vector<8x128xi32>
    %398 = arith.cmpi sge, %360, %397 : vector<8x128xi32>
    %399 = vector.broadcast %5 : f32 to vector<8x128xf32>
    %400 = arith.select %398, %399, %394 : vector<8x128xi1>, vector<8x128xf32>
    %401 = vector.broadcast %13 : f32 to vector<8x128xf32>
    %402 = arith.select %398, %401, %396 : vector<8x128xi1>, vector<8x128xf32>
    %c4_i32_169 = arith.constant 4 : i32
    %403 = vector.broadcast %c4_i32_169 : i32 to vector<8x128xi32>
    %404 = arith.cmpi sge, %360, %403 : vector<8x128xi32>
    %405 = vector.broadcast %6 : f32 to vector<8x128xf32>
    %406 = arith.select %404, %405, %400 : vector<8x128xi1>, vector<8x128xf32>
    %407 = vector.broadcast %14 : f32 to vector<8x128xf32>
    %408 = arith.select %404, %407, %402 : vector<8x128xi1>, vector<8x128xf32>
    %c5_i32_170 = arith.constant 5 : i32
    %409 = vector.broadcast %c5_i32_170 : i32 to vector<8x128xi32>
    %410 = arith.cmpi sge, %360, %409 : vector<8x128xi32>
    %411 = vector.broadcast %7 : f32 to vector<8x128xf32>
    %412 = arith.select %410, %411, %406 : vector<8x128xi1>, vector<8x128xf32>
    %413 = vector.broadcast %15 : f32 to vector<8x128xf32>
    %414 = arith.select %410, %413, %408 : vector<8x128xi1>, vector<8x128xf32>
    %c6_i32_171 = arith.constant 6 : i32
    %415 = vector.broadcast %c6_i32_171 : i32 to vector<8x128xi32>
    %416 = arith.cmpi sge, %360, %415 : vector<8x128xi32>
    %417 = vector.broadcast %8 : f32 to vector<8x128xf32>
    %418 = arith.select %416, %417, %412 : vector<8x128xi1>, vector<8x128xf32>
    %419 = vector.broadcast %16 : f32 to vector<8x128xf32>
    %420 = arith.select %416, %419, %414 : vector<8x128xi1>, vector<8x128xf32>
    %c7_i32_172 = arith.constant 7 : i32
    %421 = vector.broadcast %c7_i32_172 : i32 to vector<8x128xi32>
    %422 = arith.cmpi sge, %360, %421 : vector<8x128xi32>
    %423 = vector.broadcast %9 : f32 to vector<8x128xf32>
    %424 = arith.select %422, %423, %418 : vector<8x128xi1>, vector<8x128xf32>
    %425 = vector.broadcast %17 : f32 to vector<8x128xf32>
    %426 = arith.select %422, %425, %420 : vector<8x128xi1>, vector<8x128xf32>
    %427 = arith.subf %382, %424 : vector<8x128xf32>
    %428 = arith.mulf %427, %426 : vector<8x128xf32>
    %c0_173 = arith.constant 0 : index
    %c0_174 = arith.constant 0 : index
    %429 = vector.load %arg14[%c0_173, %c0_174] : memref<8x128xf32, #tpu.memory_space<vmem>>, vector<8x128xf32>
    tpu.vector_store %arg14[%c0_173, %c0_174], %382 {strides = array<i32>} : memref<8x128xf32, #tpu.memory_space<vmem>>, vector<8x128xf32>,
    %c0_175 = arith.constant 0 : index
    %c0_176 = arith.constant 0 : index
    %430 = vector.load %arg15[%c0_175, %c0_176] : memref<8x128xi32, #tpu.memory_space<vmem>>, vector<8x128xi32>
    tpu.vector_store %arg15[%c0_175, %c0_176], %360 {strides = array<i32>} : memref<8x128xi32, #tpu.memory_space<vmem>>, vector<8x128xi32>,
    %431 = vector.broadcast %18 : f32 to vector<8x128xf32>
    %432 = vector.broadcast %19 : f32 to vector<8x128xf32>
    %433 = vector.broadcast %20 : f32 to vector<8x128xf32>
    %434 = vector.broadcast %21 : f32 to vector<8x128xf32>
    %435 = vector.broadcast %22 : f32 to vector<8x128xf32>
    %436 = vector.broadcast %23 : f32 to vector<8x128xf32>
    %437 = vector.broadcast %24 : f32 to vector<8x128xf32>
    %438 = vector.broadcast %25 : f32 to vector<8x128xf32>
    %439 = vector.broadcast %26 : f32 to vector<8x128xf32>
    %440 = vector.broadcast %27 : f32 to vector<8x128xf32>
    %441 = vector.broadcast %28 : f32 to vector<8x128xf32>
    %442 = vector.broadcast %29 : f32 to vector<8x128xf32>
    %c1_i32_177 = arith.constant 1 : i32
    %443 = vector.broadcast %c1_i32_177 : i32 to vector<8x128xi32>
    %444 = arith.cmpi sge, %360, %443 : vector<8x128xi32>
    %445 = vector.broadcast %30 : f32 to vector<8x128xf32>
    %446 = arith.select %444, %445, %431 : vector<8x128xi1>, vector<8x128xf32>
    %447 = vector.broadcast %31 : f32 to vector<8x128xf32>
    %448 = arith.select %444, %447, %432 : vector<8x128xi1>, vector<8x128xf32>
    %449 = vector.broadcast %32 : f32 to vector<8x128xf32>
    %450 = arith.select %444, %449, %433 : vector<8x128xi1>, vector<8x128xf32>
    %451 = vector.broadcast %33 : f32 to vector<8x128xf32>
    %452 = arith.select %444, %451, %434 : vector<8x128xi1>, vector<8x128xf32>
    %453 = vector.broadcast %34 : f32 to vector<8x128xf32>
    %454 = arith.select %444, %453, %435 : vector<8x128xi1>, vector<8x128xf32>
    %455 = vector.broadcast %35 : f32 to vector<8x128xf32>
    %456 = arith.select %444, %455, %436 : vector<8x128xi1>, vector<8x128xf32>
    %457 = vector.broadcast %36 : f32 to vector<8x128xf32>
    %458 = arith.select %444, %457, %437 : vector<8x128xi1>, vector<8x128xf32>
    %459 = vector.broadcast %37 : f32 to vector<8x128xf32>
    %460 = arith.select %444, %459, %438 : vector<8x128xi1>, vector<8x128xf32>
    %461 = vector.broadcast %38 : f32 to vector<8x128xf32>
    %462 = arith.select %444, %461, %439 : vector<8x128xi1>, vector<8x128xf32>
    %463 = vector.broadcast %39 : f32 to vector<8x128xf32>
    %464 = arith.select %444, %463, %440 : vector<8x128xi1>, vector<8x128xf32>
    %465 = vector.broadcast %40 : f32 to vector<8x128xf32>
    %466 = arith.select %444, %465, %441 : vector<8x128xi1>, vector<8x128xf32>
    %467 = vector.broadcast %41 : f32 to vector<8x128xf32>
    %468 = arith.select %444, %467, %442 : vector<8x128xi1>, vector<8x128xf32>
    %c2_i32_178 = arith.constant 2 : i32
    %469 = vector.broadcast %c2_i32_178 : i32 to vector<8x128xi32>
    %470 = arith.cmpi sge, %360, %469 : vector<8x128xi32>
    %471 = vector.broadcast %42 : f32 to vector<8x128xf32>
    %472 = arith.select %470, %471, %446 : vector<8x128xi1>, vector<8x128xf32>
    %473 = vector.broadcast %43 : f32 to vector<8x128xf32>
    %474 = arith.select %470, %473, %448 : vector<8x128xi1>, vector<8x128xf32>
    %475 = vector.broadcast %44 : f32 to vector<8x128xf32>
    %476 = arith.select %470, %475, %450 : vector<8x128xi1>, vector<8x128xf32>
    %477 = vector.broadcast %45 : f32 to vector<8x128xf32>
    %478 = arith.select %470, %477, %452 : vector<8x128xi1>, vector<8x128xf32>
    %479 = vector.broadcast %46 : f32 to vector<8x128xf32>
    %480 = arith.select %470, %479, %454 : vector<8x128xi1>, vector<8x128xf32>
    %481 = vector.broadcast %47 : f32 to vector<8x128xf32>
    %482 = arith.select %470, %481, %456 : vector<8x128xi1>, vector<8x128xf32>
    %483 = vector.broadcast %48 : f32 to vector<8x128xf32>
    %484 = arith.select %470, %483, %458 : vector<8x128xi1>, vector<8x128xf32>
    %485 = vector.broadcast %49 : f32 to vector<8x128xf32>
    %486 = arith.select %470, %485, %460 : vector<8x128xi1>, vector<8x128xf32>
    %487 = vector.broadcast %50 : f32 to vector<8x128xf32>
    %488 = arith.select %470, %487, %462 : vector<8x128xi1>, vector<8x128xf32>
    %489 = vector.broadcast %51 : f32 to vector<8x128xf32>
    %490 = arith.select %470, %489, %464 : vector<8x128xi1>, vector<8x128xf32>
    %491 = vector.broadcast %52 : f32 to vector<8x128xf32>
    %492 = arith.select %470, %491, %466 : vector<8x128xi1>, vector<8x128xf32>
    %493 = vector.broadcast %53 : f32 to vector<8x128xf32>
    %494 = arith.select %470, %493, %468 : vector<8x128xi1>, vector<8x128xf32>
    %c3_i32_179 = arith.constant 3 : i32
    %495 = vector.broadcast %c3_i32_179 : i32 to vector<8x128xi32>
    %496 = arith.cmpi sge, %360, %495 : vector<8x128xi32>
    %497 = vector.broadcast %54 : f32 to vector<8x128xf32>
    %498 = arith.select %496, %497, %472 : vector<8x128xi1>, vector<8x128xf32>
    %499 = vector.broadcast %55 : f32 to vector<8x128xf32>
    %500 = arith.select %496, %499, %474 : vector<8x128xi1>, vector<8x128xf32>
    %501 = vector.broadcast %56 : f32 to vector<8x128xf32>
    %502 = arith.select %496, %501, %476 : vector<8x128xi1>, vector<8x128xf32>
    %503 = vector.broadcast %57 : f32 to vector<8x128xf32>
    %504 = arith.select %496, %503, %478 : vector<8x128xi1>, vector<8x128xf32>
    %505 = vector.broadcast %58 : f32 to vector<8x128xf32>
    %506 = arith.select %496, %505, %480 : vector<8x128xi1>, vector<8x128xf32>
    %507 = vector.broadcast %59 : f32 to vector<8x128xf32>
    %508 = arith.select %496, %507, %482 : vector<8x128xi1>, vector<8x128xf32>
    %509 = vector.broadcast %60 : f32 to vector<8x128xf32>
    %510 = arith.select %496, %509, %484 : vector<8x128xi1>, vector<8x128xf32>
    %511 = vector.broadcast %61 : f32 to vector<8x128xf32>
    %512 = arith.select %496, %511, %486 : vector<8x128xi1>, vector<8x128xf32>
    %513 = vector.broadcast %62 : f32 to vector<8x128xf32>
    %514 = arith.select %496, %513, %488 : vector<8x128xi1>, vector<8x128xf32>
    %515 = vector.broadcast %63 : f32 to vector<8x128xf32>
    %516 = arith.select %496, %515, %490 : vector<8x128xi1>, vector<8x128xf32>
    %517 = vector.broadcast %64 : f32 to vector<8x128xf32>
    %518 = arith.select %496, %517, %492 : vector<8x128xi1>, vector<8x128xf32>
    %519 = vector.broadcast %65 : f32 to vector<8x128xf32>
    %520 = arith.select %496, %519, %494 : vector<8x128xi1>, vector<8x128xf32>
    %c4_i32_180 = arith.constant 4 : i32
    %521 = vector.broadcast %c4_i32_180 : i32 to vector<8x128xi32>
    %522 = arith.cmpi sge, %360, %521 : vector<8x128xi32>
    %523 = vector.broadcast %66 : f32 to vector<8x128xf32>
    %524 = arith.select %522, %523, %498 : vector<8x128xi1>, vector<8x128xf32>
    %525 = vector.broadcast %67 : f32 to vector<8x128xf32>
    %526 = arith.select %522, %525, %500 : vector<8x128xi1>, vector<8x128xf32>
    %527 = vector.broadcast %68 : f32 to vector<8x128xf32>
    %528 = arith.select %522, %527, %502 : vector<8x128xi1>, vector<8x128xf32>
    %529 = vector.broadcast %69 : f32 to vector<8x128xf32>
    %530 = arith.select %522, %529, %504 : vector<8x128xi1>, vector<8x128xf32>
    %531 = vector.broadcast %70 : f32 to vector<8x128xf32>
    %532 = arith.select %522, %531, %506 : vector<8x128xi1>, vector<8x128xf32>
    %533 = vector.broadcast %71 : f32 to vector<8x128xf32>
    %534 = arith.select %522, %533, %508 : vector<8x128xi1>, vector<8x128xf32>
    %535 = vector.broadcast %72 : f32 to vector<8x128xf32>
    %536 = arith.select %522, %535, %510 : vector<8x128xi1>, vector<8x128xf32>
    %537 = vector.broadcast %73 : f32 to vector<8x128xf32>
    %538 = arith.select %522, %537, %512 : vector<8x128xi1>, vector<8x128xf32>
    %539 = vector.broadcast %74 : f32 to vector<8x128xf32>
    %540 = arith.select %522, %539, %514 : vector<8x128xi1>, vector<8x128xf32>
    %541 = vector.broadcast %75 : f32 to vector<8x128xf32>
    %542 = arith.select %522, %541, %516 : vector<8x128xi1>, vector<8x128xf32>
    %543 = vector.broadcast %76 : f32 to vector<8x128xf32>
    %544 = arith.select %522, %543, %518 : vector<8x128xi1>, vector<8x128xf32>
    %545 = vector.broadcast %77 : f32 to vector<8x128xf32>
    %546 = arith.select %522, %545, %520 : vector<8x128xi1>, vector<8x128xf32>
    %c5_i32_181 = arith.constant 5 : i32
    %547 = vector.broadcast %c5_i32_181 : i32 to vector<8x128xi32>
    %548 = arith.cmpi sge, %360, %547 : vector<8x128xi32>
    %549 = vector.broadcast %78 : f32 to vector<8x128xf32>
    %550 = arith.select %548, %549, %524 : vector<8x128xi1>, vector<8x128xf32>
    %551 = vector.broadcast %79 : f32 to vector<8x128xf32>
    %552 = arith.select %548, %551, %526 : vector<8x128xi1>, vector<8x128xf32>
    %553 = vector.broadcast %80 : f32 to vector<8x128xf32>
    %554 = arith.select %548, %553, %528 : vector<8x128xi1>, vector<8x128xf32>
    %555 = vector.broadcast %81 : f32 to vector<8x128xf32>
    %556 = arith.select %548, %555, %530 : vector<8x128xi1>, vector<8x128xf32>
    %557 = vector.broadcast %82 : f32 to vector<8x128xf32>
    %558 = arith.select %548, %557, %532 : vector<8x128xi1>, vector<8x128xf32>
    %559 = vector.broadcast %83 : f32 to vector<8x128xf32>
    %560 = arith.select %548, %559, %534 : vector<8x128xi1>, vector<8x128xf32>
    %561 = vector.broadcast %84 : f32 to vector<8x128xf32>
    %562 = arith.select %548, %561, %536 : vector<8x128xi1>, vector<8x128xf32>
    %563 = vector.broadcast %85 : f32 to vector<8x128xf32>
    %564 = arith.select %548, %563, %538 : vector<8x128xi1>, vector<8x128xf32>
    %565 = vector.broadcast %86 : f32 to vector<8x128xf32>
    %566 = arith.select %548, %565, %540 : vector<8x128xi1>, vector<8x128xf32>
    %567 = vector.broadcast %87 : f32 to vector<8x128xf32>
    %568 = arith.select %548, %567, %542 : vector<8x128xi1>, vector<8x128xf32>
    %569 = vector.broadcast %88 : f32 to vector<8x128xf32>
    %570 = arith.select %548, %569, %544 : vector<8x128xi1>, vector<8x128xf32>
    %571 = vector.broadcast %89 : f32 to vector<8x128xf32>
    %572 = arith.select %548, %571, %546 : vector<8x128xi1>, vector<8x128xf32>
    %c6_i32_182 = arith.constant 6 : i32
    %573 = vector.broadcast %c6_i32_182 : i32 to vector<8x128xi32>
    %574 = arith.cmpi sge, %360, %573 : vector<8x128xi32>
    %575 = vector.broadcast %90 : f32 to vector<8x128xf32>
    %576 = arith.select %574, %575, %550 : vector<8x128xi1>, vector<8x128xf32>
    %577 = vector.broadcast %91 : f32 to vector<8x128xf32>
    %578 = arith.select %574, %577, %552 : vector<8x128xi1>, vector<8x128xf32>
    %579 = vector.broadcast %92 : f32 to vector<8x128xf32>
    %580 = arith.select %574, %579, %554 : vector<8x128xi1>, vector<8x128xf32>
    %581 = vector.broadcast %93 : f32 to vector<8x128xf32>
    %582 = arith.select %574, %581, %556 : vector<8x128xi1>, vector<8x128xf32>
    %583 = vector.broadcast %94 : f32 to vector<8x128xf32>
    %584 = arith.select %574, %583, %558 : vector<8x128xi1>, vector<8x128xf32>
    %585 = vector.broadcast %95 : f32 to vector<8x128xf32>
    %586 = arith.select %574, %585, %560 : vector<8x128xi1>, vector<8x128xf32>
    %587 = vector.broadcast %96 : f32 to vector<8x128xf32>
    %588 = arith.select %574, %587, %562 : vector<8x128xi1>, vector<8x128xf32>
    %589 = vector.broadcast %97 : f32 to vector<8x128xf32>
    %590 = arith.select %574, %589, %564 : vector<8x128xi1>, vector<8x128xf32>
    %591 = vector.broadcast %98 : f32 to vector<8x128xf32>
    %592 = arith.select %574, %591, %566 : vector<8x128xi1>, vector<8x128xf32>
    %593 = vector.broadcast %99 : f32 to vector<8x128xf32>
    %594 = arith.select %574, %593, %568 : vector<8x128xi1>, vector<8x128xf32>
    %595 = vector.broadcast %100 : f32 to vector<8x128xf32>
    %596 = arith.select %574, %595, %570 : vector<8x128xi1>, vector<8x128xf32>
    %597 = vector.broadcast %101 : f32 to vector<8x128xf32>
    %598 = arith.select %574, %597, %572 : vector<8x128xi1>, vector<8x128xf32>
    %c7_i32_183 = arith.constant 7 : i32
    %599 = vector.broadcast %c7_i32_183 : i32 to vector<8x128xi32>
    %600 = arith.cmpi sge, %360, %599 : vector<8x128xi32>
    %601 = vector.broadcast %102 : f32 to vector<8x128xf32>
    %602 = arith.select %600, %601, %576 : vector<8x128xi1>, vector<8x128xf32>
    %603 = vector.broadcast %103 : f32 to vector<8x128xf32>
    %604 = arith.select %600, %603, %578 : vector<8x128xi1>, vector<8x128xf32>
    %605 = vector.broadcast %104 : f32 to vector<8x128xf32>
    %606 = arith.select %600, %605, %580 : vector<8x128xi1>, vector<8x128xf32>
    %607 = vector.broadcast %105 : f32 to vector<8x128xf32>
    %608 = arith.select %600, %607, %582 : vector<8x128xi1>, vector<8x128xf32>
    %609 = vector.broadcast %106 : f32 to vector<8x128xf32>
    %610 = arith.select %600, %609, %584 : vector<8x128xi1>, vector<8x128xf32>
    %611 = vector.broadcast %107 : f32 to vector<8x128xf32>
    %612 = arith.select %600, %611, %586 : vector<8x128xi1>, vector<8x128xf32>
    %613 = vector.broadcast %108 : f32 to vector<8x128xf32>
    %614 = arith.select %600, %613, %588 : vector<8x128xi1>, vector<8x128xf32>
    %615 = vector.broadcast %109 : f32 to vector<8x128xf32>
    %616 = arith.select %600, %615, %590 : vector<8x128xi1>, vector<8x128xf32>
    %617 = vector.broadcast %110 : f32 to vector<8x128xf32>
    %618 = arith.select %600, %617, %592 : vector<8x128xi1>, vector<8x128xf32>
    %619 = vector.broadcast %111 : f32 to vector<8x128xf32>
    %620 = arith.select %600, %619, %594 : vector<8x128xi1>, vector<8x128xf32>
    %621 = vector.broadcast %112 : f32 to vector<8x128xf32>
    %622 = arith.select %600, %621, %596 : vector<8x128xi1>, vector<8x128xf32>
    %623 = vector.broadcast %113 : f32 to vector<8x128xf32>
    %624 = arith.select %600, %623, %598 : vector<8x128xi1>, vector<8x128xf32>
    %625 = arith.mulf %620, %428 : vector<8x128xf32>
    %626 = arith.addf %625, %614 : vector<8x128xf32>
    %627 = arith.mulf %626, %428 : vector<8x128xf32>
    %628 = arith.addf %627, %608 : vector<8x128xf32>
    %629 = arith.mulf %628, %428 : vector<8x128xf32>
    %630 = arith.addf %629, %602 : vector<8x128xf32>
    %c0_184 = arith.constant 0 : index
    %c0_185 = arith.constant 0 : index
    %c0_186 = arith.constant 0 : index
    %631 = vector.load %arg16[%c0_184, %c0_185, %c0_186] : memref<3x8x128xf32, #tpu.memory_space<vmem>>, vector<1x8x128xf32>
    %632 = vector.shape_cast %631 : vector<1x8x128xf32> to vector<8x128xf32>
    %633 = vector.shape_cast %630 : vector<8x128xf32> to vector<1x8x128xf32>
    tpu.vector_store %arg16[%c0_184, %c0_185, %c0_186], %633 {strides = array<i32>} : memref<3x8x128xf32, #tpu.memory_space<vmem>>, vector<1x8x128xf32>,
    %634 = arith.mulf %622, %428 : vector<8x128xf32>
    %635 = arith.addf %634, %616 : vector<8x128xf32>
    %636 = arith.mulf %635, %428 : vector<8x128xf32>
    %637 = arith.addf %636, %610 : vector<8x128xf32>
    %638 = arith.mulf %637, %428 : vector<8x128xf32>
    %639 = arith.addf %638, %604 : vector<8x128xf32>
    %c1_187 = arith.constant 1 : index
    %c0_188 = arith.constant 0 : index
    %c0_189 = arith.constant 0 : index
    %640 = vector.load %arg16[%c1_187, %c0_188, %c0_189] : memref<3x8x128xf32, #tpu.memory_space<vmem>>, vector<1x8x128xf32>
    %641 = vector.shape_cast %640 : vector<1x8x128xf32> to vector<8x128xf32>
    %642 = vector.shape_cast %639 : vector<8x128xf32> to vector<1x8x128xf32>
    tpu.vector_store %arg16[%c1_187, %c0_188, %c0_189], %642 {strides = array<i32>} : memref<3x8x128xf32, #tpu.memory_space<vmem>>, vector<1x8x128xf32>,
    %643 = arith.mulf %624, %428 : vector<8x128xf32>
    %644 = arith.addf %643, %618 : vector<8x128xf32>
    %645 = arith.mulf %644, %428 : vector<8x128xf32>
    %646 = arith.addf %645, %612 : vector<8x128xf32>
    %647 = arith.mulf %646, %428 : vector<8x128xf32>
    %648 = arith.addf %647, %606 : vector<8x128xf32>
    %c2_190 = arith.constant 2 : index
    %c0_191 = arith.constant 0 : index
    %c0_192 = arith.constant 0 : index
    %649 = vector.load %arg16[%c2_190, %c0_191, %c0_192] : memref<3x8x128xf32, #tpu.memory_space<vmem>>, vector<1x8x128xf32>
    %650 = vector.shape_cast %649 : vector<1x8x128xf32> to vector<8x128xf32>
    %651 = vector.shape_cast %648 : vector<8x128xf32> to vector<1x8x128xf32>
    tpu.vector_store %arg16[%c2_190, %c0_191, %c0_192], %651 {strides = array<i32>} : memref<3x8x128xf32, #tpu.memory_space<vmem>>, vector<1x8x128xf32>,
    %652 = vector.broadcast %156 : f32 to vector<8x128xf32>
    %653 = vector.broadcast %157 : f32 to vector<8x128xf32>
    %654 = vector.broadcast %158 : f32 to vector<8x128xf32>
    %655 = vector.broadcast %159 : f32 to vector<8x128xf32>
    %656 = vector.broadcast %160 : f32 to vector<8x128xf32>
    %657 = vector.broadcast %161 : f32 to vector<8x128xf32>
    %658 = vector.broadcast %162 : f32 to vector<8x128xf32>
    %659 = vector.broadcast %163 : f32 to vector<8x128xf32>
    %660 = vector.broadcast %164 : f32 to vector<8x128xf32>
    %c1_i32_193 = arith.constant 1 : i32
    %661 = vector.broadcast %c1_i32_193 : i32 to vector<8x128xi32>
    %662 = arith.cmpi sge, %360, %661 : vector<8x128xi32>
    %663 = vector.broadcast %165 : f32 to vector<8x128xf32>
    %664 = arith.select %662, %663, %652 : vector<8x128xi1>, vector<8x128xf32>
    %665 = vector.broadcast %166 : f32 to vector<8x128xf32>
    %666 = arith.select %662, %665, %653 : vector<8x128xi1>, vector<8x128xf32>
    %667 = vector.broadcast %167 : f32 to vector<8x128xf32>
    %668 = arith.select %662, %667, %654 : vector<8x128xi1>, vector<8x128xf32>
    %669 = vector.broadcast %168 : f32 to vector<8x128xf32>
    %670 = arith.select %662, %669, %655 : vector<8x128xi1>, vector<8x128xf32>
    %671 = vector.broadcast %169 : f32 to vector<8x128xf32>
    %672 = arith.select %662, %671, %656 : vector<8x128xi1>, vector<8x128xf32>
    %673 = vector.broadcast %170 : f32 to vector<8x128xf32>
    %674 = arith.select %662, %673, %657 : vector<8x128xi1>, vector<8x128xf32>
    %675 = vector.broadcast %171 : f32 to vector<8x128xf32>
    %676 = arith.select %662, %675, %658 : vector<8x128xi1>, vector<8x128xf32>
    %677 = vector.broadcast %172 : f32 to vector<8x128xf32>
    %678 = arith.select %662, %677, %659 : vector<8x128xi1>, vector<8x128xf32>
    %679 = vector.broadcast %173 : f32 to vector<8x128xf32>
    %680 = arith.select %662, %679, %660 : vector<8x128xi1>, vector<8x128xf32>
    %c2_i32_194 = arith.constant 2 : i32
    %681 = vector.broadcast %c2_i32_194 : i32 to vector<8x128xi32>
    %682 = arith.cmpi sge, %360, %681 : vector<8x128xi32>
    %683 = vector.broadcast %174 : f32 to vector<8x128xf32>
    %684 = arith.select %682, %683, %664 : vector<8x128xi1>, vector<8x128xf32>
    %685 = vector.broadcast %175 : f32 to vector<8x128xf32>
    %686 = arith.select %682, %685, %666 : vector<8x128xi1>, vector<8x128xf32>
    %687 = vector.broadcast %176 : f32 to vector<8x128xf32>
    %688 = arith.select %682, %687, %668 : vector<8x128xi1>, vector<8x128xf32>
    %689 = vector.broadcast %177 : f32 to vector<8x128xf32>
    %690 = arith.select %682, %689, %670 : vector<8x128xi1>, vector<8x128xf32>
    %691 = vector.broadcast %178 : f32 to vector<8x128xf32>
    %692 = arith.select %682, %691, %672 : vector<8x128xi1>, vector<8x128xf32>
    %693 = vector.broadcast %179 : f32 to vector<8x128xf32>
    %694 = arith.select %682, %693, %674 : vector<8x128xi1>, vector<8x128xf32>
    %695 = vector.broadcast %180 : f32 to vector<8x128xf32>
    %696 = arith.select %682, %695, %676 : vector<8x128xi1>, vector<8x128xf32>
    %697 = vector.broadcast %181 : f32 to vector<8x128xf32>
    %698 = arith.select %682, %697, %678 : vector<8x128xi1>, vector<8x128xf32>
    %699 = vector.broadcast %182 : f32 to vector<8x128xf32>
    %700 = arith.select %682, %699, %680 : vector<8x128xi1>, vector<8x128xf32>
    %c3_i32_195 = arith.constant 3 : i32
    %701 = vector.broadcast %c3_i32_195 : i32 to vector<8x128xi32>
    %702 = arith.cmpi sge, %360, %701 : vector<8x128xi32>
    %703 = vector.broadcast %183 : f32 to vector<8x128xf32>
    %704 = arith.select %702, %703, %684 : vector<8x128xi1>, vector<8x128xf32>
    %705 = vector.broadcast %184 : f32 to vector<8x128xf32>
    %706 = arith.select %702, %705, %686 : vector<8x128xi1>, vector<8x128xf32>
    %707 = vector.broadcast %185 : f32 to vector<8x128xf32>
    %708 = arith.select %702, %707, %688 : vector<8x128xi1>, vector<8x128xf32>
    %709 = vector.broadcast %186 : f32 to vector<8x128xf32>
    %710 = arith.select %702, %709, %690 : vector<8x128xi1>, vector<8x128xf32>
    %711 = vector.broadcast %187 : f32 to vector<8x128xf32>
    %712 = arith.select %702, %711, %692 : vector<8x128xi1>, vector<8x128xf32>
    %713 = vector.broadcast %188 : f32 to vector<8x128xf32>
    %714 = arith.select %702, %713, %694 : vector<8x128xi1>, vector<8x128xf32>
    %715 = vector.broadcast %189 : f32 to vector<8x128xf32>
    %716 = arith.select %702, %715, %696 : vector<8x128xi1>, vector<8x128xf32>
    %717 = vector.broadcast %190 : f32 to vector<8x128xf32>
    %718 = arith.select %702, %717, %698 : vector<8x128xi1>, vector<8x128xf32>
    %719 = vector.broadcast %191 : f32 to vector<8x128xf32>
    %720 = arith.select %702, %719, %700 : vector<8x128xi1>, vector<8x128xf32>
    %c4_i32_196 = arith.constant 4 : i32
    %721 = vector.broadcast %c4_i32_196 : i32 to vector<8x128xi32>
    %722 = arith.cmpi sge, %360, %721 : vector<8x128xi32>
    %723 = vector.broadcast %192 : f32 to vector<8x128xf32>
    %724 = arith.select %722, %723, %704 : vector<8x128xi1>, vector<8x128xf32>
    %725 = vector.broadcast %193 : f32 to vector<8x128xf32>
    %726 = arith.select %722, %725, %706 : vector<8x128xi1>, vector<8x128xf32>
    %727 = vector.broadcast %194 : f32 to vector<8x128xf32>
    %728 = arith.select %722, %727, %708 : vector<8x128xi1>, vector<8x128xf32>
    %729 = vector.broadcast %195 : f32 to vector<8x128xf32>
    %730 = arith.select %722, %729, %710 : vector<8x128xi1>, vector<8x128xf32>
    %731 = vector.broadcast %196 : f32 to vector<8x128xf32>
    %732 = arith.select %722, %731, %712 : vector<8x128xi1>, vector<8x128xf32>
    %733 = vector.broadcast %197 : f32 to vector<8x128xf32>
    %734 = arith.select %722, %733, %714 : vector<8x128xi1>, vector<8x128xf32>
    %735 = vector.broadcast %198 : f32 to vector<8x128xf32>
    %736 = arith.select %722, %735, %716 : vector<8x128xi1>, vector<8x128xf32>
    %737 = vector.broadcast %199 : f32 to vector<8x128xf32>
    %738 = arith.select %722, %737, %718 : vector<8x128xi1>, vector<8x128xf32>
    %739 = vector.broadcast %200 : f32 to vector<8x128xf32>
    %740 = arith.select %722, %739, %720 : vector<8x128xi1>, vector<8x128xf32>
    %c5_i32_197 = arith.constant 5 : i32
    %741 = vector.broadcast %c5_i32_197 : i32 to vector<8x128xi32>
    %742 = arith.cmpi sge, %360, %741 : vector<8x128xi32>
    %743 = vector.broadcast %201 : f32 to vector<8x128xf32>
    %744 = arith.select %742, %743, %724 : vector<8x128xi1>, vector<8x128xf32>
    %745 = vector.broadcast %202 : f32 to vector<8x128xf32>
    %746 = arith.select %742, %745, %726 : vector<8x128xi1>, vector<8x128xf32>
    %747 = vector.broadcast %203 : f32 to vector<8x128xf32>
    %748 = arith.select %742, %747, %728 : vector<8x128xi1>, vector<8x128xf32>
    %749 = vector.broadcast %204 : f32 to vector<8x128xf32>
    %750 = arith.select %742, %749, %730 : vector<8x128xi1>, vector<8x128xf32>
    %751 = vector.broadcast %205 : f32 to vector<8x128xf32>
    %752 = arith.select %742, %751, %732 : vector<8x128xi1>, vector<8x128xf32>
    %753 = vector.broadcast %206 : f32 to vector<8x128xf32>
    %754 = arith.select %742, %753, %734 : vector<8x128xi1>, vector<8x128xf32>
    %755 = vector.broadcast %207 : f32 to vector<8x128xf32>
    %756 = arith.select %742, %755, %736 : vector<8x128xi1>, vector<8x128xf32>
    %757 = vector.broadcast %208 : f32 to vector<8x128xf32>
    %758 = arith.select %742, %757, %738 : vector<8x128xi1>, vector<8x128xf32>
    %759 = vector.broadcast %209 : f32 to vector<8x128xf32>
    %760 = arith.select %742, %759, %740 : vector<8x128xi1>, vector<8x128xf32>
    %c6_i32_198 = arith.constant 6 : i32
    %761 = vector.broadcast %c6_i32_198 : i32 to vector<8x128xi32>
    %762 = arith.cmpi sge, %360, %761 : vector<8x128xi32>
    %763 = vector.broadcast %210 : f32 to vector<8x128xf32>
    %764 = arith.select %762, %763, %744 : vector<8x128xi1>, vector<8x128xf32>
    %765 = vector.broadcast %211 : f32 to vector<8x128xf32>
    %766 = arith.select %762, %765, %746 : vector<8x128xi1>, vector<8x128xf32>
    %767 = vector.broadcast %212 : f32 to vector<8x128xf32>
    %768 = arith.select %762, %767, %748 : vector<8x128xi1>, vector<8x128xf32>
    %769 = vector.broadcast %213 : f32 to vector<8x128xf32>
    %770 = arith.select %762, %769, %750 : vector<8x128xi1>, vector<8x128xf32>
    %771 = vector.broadcast %214 : f32 to vector<8x128xf32>
    %772 = arith.select %762, %771, %752 : vector<8x128xi1>, vector<8x128xf32>
    %773 = vector.broadcast %215 : f32 to vector<8x128xf32>
    %774 = arith.select %762, %773, %754 : vector<8x128xi1>, vector<8x128xf32>
    %775 = vector.broadcast %216 : f32 to vector<8x128xf32>
    %776 = arith.select %762, %775, %756 : vector<8x128xi1>, vector<8x128xf32>
    %777 = vector.broadcast %217 : f32 to vector<8x128xf32>
    %778 = arith.select %762, %777, %758 : vector<8x128xi1>, vector<8x128xf32>
    %779 = vector.broadcast %218 : f32 to vector<8x128xf32>
    %780 = arith.select %762, %779, %760 : vector<8x128xi1>, vector<8x128xf32>
    %c7_i32_199 = arith.constant 7 : i32
    %781 = vector.broadcast %c7_i32_199 : i32 to vector<8x128xi32>
    %782 = arith.cmpi sge, %360, %781 : vector<8x128xi32>
    %783 = vector.broadcast %219 : f32 to vector<8x128xf32>
    %784 = arith.select %782, %783, %764 : vector<8x128xi1>, vector<8x128xf32>
    %785 = vector.broadcast %220 : f32 to vector<8x128xf32>
    %786 = arith.select %782, %785, %766 : vector<8x128xi1>, vector<8x128xf32>
    %787 = vector.broadcast %221 : f32 to vector<8x128xf32>
    %788 = arith.select %782, %787, %768 : vector<8x128xi1>, vector<8x128xf32>
    %789 = vector.broadcast %222 : f32 to vector<8x128xf32>
    %790 = arith.select %782, %789, %770 : vector<8x128xi1>, vector<8x128xf32>
    %791 = vector.broadcast %223 : f32 to vector<8x128xf32>
    %792 = arith.select %782, %791, %772 : vector<8x128xi1>, vector<8x128xf32>
    %793 = vector.broadcast %224 : f32 to vector<8x128xf32>
    %794 = arith.select %782, %793, %774 : vector<8x128xi1>, vector<8x128xf32>
    %795 = vector.broadcast %225 : f32 to vector<8x128xf32>
    %796 = arith.select %782, %795, %776 : vector<8x128xi1>, vector<8x128xf32>
    %797 = vector.broadcast %226 : f32 to vector<8x128xf32>
    %798 = arith.select %782, %797, %778 : vector<8x128xi1>, vector<8x128xf32>
    %799 = vector.broadcast %227 : f32 to vector<8x128xf32>
    %800 = arith.select %782, %799, %780 : vector<8x128xi1>, vector<8x128xf32>
    %801 = arith.mulf %796, %428 : vector<8x128xf32>
    %802 = arith.addf %801, %790 : vector<8x128xf32>
    %803 = arith.mulf %802, %428 : vector<8x128xf32>
    %804 = arith.addf %803, %784 : vector<8x128xf32>
    %805 = arith.mulf %798, %428 : vector<8x128xf32>
    %806 = arith.addf %805, %792 : vector<8x128xf32>
    %807 = arith.mulf %806, %428 : vector<8x128xf32>
    %808 = arith.addf %807, %786 : vector<8x128xf32>
    %809 = arith.mulf %800, %428 : vector<8x128xf32>
    %810 = arith.addf %809, %794 : vector<8x128xf32>
    %811 = arith.mulf %810, %428 : vector<8x128xf32>
    %812 = arith.addf %811, %788 : vector<8x128xf32>
    %813 = vector.broadcast %228 : f32 to vector<8x128xf32>
    %814 = vector.broadcast %229 : f32 to vector<8x128xf32>
    %815 = vector.broadcast %230 : f32 to vector<8x128xf32>
    %816 = vector.broadcast %231 : f32 to vector<8x128xf32>
    %c1_i32_200 = arith.constant 1 : i32
    %817 = vector.broadcast %c1_i32_200 : i32 to vector<8x128xi32>
    %818 = arith.cmpi sge, %360, %817 : vector<8x128xi32>
    %819 = vector.broadcast %232 : f32 to vector<8x128xf32>
    %820 = arith.select %818, %819, %813 : vector<8x128xi1>, vector<8x128xf32>
    %821 = vector.broadcast %233 : f32 to vector<8x128xf32>
    %822 = arith.select %818, %821, %814 : vector<8x128xi1>, vector<8x128xf32>
    %823 = vector.broadcast %234 : f32 to vector<8x128xf32>
    %824 = arith.select %818, %823, %815 : vector<8x128xi1>, vector<8x128xf32>
    %825 = vector.broadcast %235 : f32 to vector<8x128xf32>
    %826 = arith.select %818, %825, %816 : vector<8x128xi1>, vector<8x128xf32>
    %c2_i32_201 = arith.constant 2 : i32
    %827 = vector.broadcast %c2_i32_201 : i32 to vector<8x128xi32>
    %828 = arith.cmpi sge, %360, %827 : vector<8x128xi32>
    %829 = vector.broadcast %236 : f32 to vector<8x128xf32>
    %830 = arith.select %828, %829, %820 : vector<8x128xi1>, vector<8x128xf32>
    %831 = vector.broadcast %237 : f32 to vector<8x128xf32>
    %832 = arith.select %828, %831, %822 : vector<8x128xi1>, vector<8x128xf32>
    %833 = vector.broadcast %238 : f32 to vector<8x128xf32>
    %834 = arith.select %828, %833, %824 : vector<8x128xi1>, vector<8x128xf32>
    %835 = vector.broadcast %239 : f32 to vector<8x128xf32>
    %836 = arith.select %828, %835, %826 : vector<8x128xi1>, vector<8x128xf32>
    %c3_i32_202 = arith.constant 3 : i32
    %837 = vector.broadcast %c3_i32_202 : i32 to vector<8x128xi32>
    %838 = arith.cmpi sge, %360, %837 : vector<8x128xi32>
    %839 = vector.broadcast %240 : f32 to vector<8x128xf32>
    %840 = arith.select %838, %839, %830 : vector<8x128xi1>, vector<8x128xf32>
    %841 = vector.broadcast %241 : f32 to vector<8x128xf32>
    %842 = arith.select %838, %841, %832 : vector<8x128xi1>, vector<8x128xf32>
    %843 = vector.broadcast %242 : f32 to vector<8x128xf32>
    %844 = arith.select %838, %843, %834 : vector<8x128xi1>, vector<8x128xf32>
    %845 = vector.broadcast %243 : f32 to vector<8x128xf32>
    %846 = arith.select %838, %845, %836 : vector<8x128xi1>, vector<8x128xf32>
    %c4_i32_203 = arith.constant 4 : i32
    %847 = vector.broadcast %c4_i32_203 : i32 to vector<8x128xi32>
    %848 = arith.cmpi sge, %360, %847 : vector<8x128xi32>
    %849 = vector.broadcast %244 : f32 to vector<8x128xf32>
    %850 = arith.select %848, %849, %840 : vector<8x128xi1>, vector<8x128xf32>
    %851 = vector.broadcast %245 : f32 to vector<8x128xf32>
    %852 = arith.select %848, %851, %842 : vector<8x128xi1>, vector<8x128xf32>
    %853 = vector.broadcast %246 : f32 to vector<8x128xf32>
    %854 = arith.select %848, %853, %844 : vector<8x128xi1>, vector<8x128xf32>
    %855 = vector.broadcast %247 : f32 to vector<8x128xf32>
    %856 = arith.select %848, %855, %846 : vector<8x128xi1>, vector<8x128xf32>
    %c5_i32_204 = arith.constant 5 : i32
    %857 = vector.broadcast %c5_i32_204 : i32 to vector<8x128xi32>
    %858 = arith.cmpi sge, %360, %857 : vector<8x128xi32>
    %859 = vector.broadcast %248 : f32 to vector<8x128xf32>
    %860 = arith.select %858, %859, %850 : vector<8x128xi1>, vector<8x128xf32>
    %861 = vector.broadcast %249 : f32 to vector<8x128xf32>
    %862 = arith.select %858, %861, %852 : vector<8x128xi1>, vector<8x128xf32>
    %863 = vector.broadcast %250 : f32 to vector<8x128xf32>
    %864 = arith.select %858, %863, %854 : vector<8x128xi1>, vector<8x128xf32>
    %865 = vector.broadcast %251 : f32 to vector<8x128xf32>
    %866 = arith.select %858, %865, %856 : vector<8x128xi1>, vector<8x128xf32>
    %c6_i32_205 = arith.constant 6 : i32
    %867 = vector.broadcast %c6_i32_205 : i32 to vector<8x128xi32>
    %868 = arith.cmpi sge, %360, %867 : vector<8x128xi32>
    %869 = vector.broadcast %252 : f32 to vector<8x128xf32>
    %870 = arith.select %868, %869, %860 : vector<8x128xi1>, vector<8x128xf32>
    %871 = vector.broadcast %253 : f32 to vector<8x128xf32>
    %872 = arith.select %868, %871, %862 : vector<8x128xi1>, vector<8x128xf32>
    %873 = vector.broadcast %254 : f32 to vector<8x128xf32>
    %874 = arith.select %868, %873, %864 : vector<8x128xi1>, vector<8x128xf32>
    %875 = vector.broadcast %255 : f32 to vector<8x128xf32>
    %876 = arith.select %868, %875, %866 : vector<8x128xi1>, vector<8x128xf32>
    %c7_i32_206 = arith.constant 7 : i32
    %877 = vector.broadcast %c7_i32_206 : i32 to vector<8x128xi32>
    %878 = arith.cmpi sge, %360, %877 : vector<8x128xi32>
    %879 = vector.broadcast %256 : f32 to vector<8x128xf32>
    %880 = arith.select %878, %879, %870 : vector<8x128xi1>, vector<8x128xf32>
    %881 = vector.broadcast %257 : f32 to vector<8x128xf32>
    %882 = arith.select %878, %881, %872 : vector<8x128xi1>, vector<8x128xf32>
    %883 = vector.broadcast %258 : f32 to vector<8x128xf32>
    %884 = arith.select %878, %883, %874 : vector<8x128xi1>, vector<8x128xf32>
    %885 = vector.broadcast %259 : f32 to vector<8x128xf32>
    %886 = arith.select %878, %885, %876 : vector<8x128xi1>, vector<8x128xf32>
    %887 = arith.mulf %886, %428 : vector<8x128xf32>
    %888 = arith.addf %887, %884 : vector<8x128xf32>
    %889 = arith.mulf %888, %428 : vector<8x128xf32>
    %890 = arith.addf %889, %882 : vector<8x128xf32>
    %891 = arith.mulf %890, %428 : vector<8x128xf32>
    %892 = arith.addf %891, %880 : vector<8x128xf32>
    %893 = arith.mulf %804, %804 : vector<8x128xf32>
    %894 = arith.mulf %808, %808 : vector<8x128xf32>
    %895 = arith.addf %893, %894 : vector<8x128xf32>
    %896 = arith.mulf %812, %812 : vector<8x128xf32>
    %897 = arith.addf %895, %896 : vector<8x128xf32>
    %898 = math.rsqrt %897 : vector<8x128xf32>
    %899 = arith.mulf %892, %898 : vector<8x128xf32>
    %900 = arith.mulf %804, %899 : vector<8x128xf32>
    %c0_207 = arith.constant 0 : index
    %c0_208 = arith.constant 0 : index
    %c0_209 = arith.constant 0 : index
    %901 = vector.load %arg17[%c0_207, %c0_208, %c0_209] : memref<3x8x128xf32, #tpu.memory_space<vmem>>, vector<1x8x128xf32>
    %902 = vector.shape_cast %901 : vector<1x8x128xf32> to vector<8x128xf32>
    %903 = vector.shape_cast %900 : vector<8x128xf32> to vector<1x8x128xf32>
    tpu.vector_store %arg17[%c0_207, %c0_208, %c0_209], %903 {strides = array<i32>} : memref<3x8x128xf32, #tpu.memory_space<vmem>>, vector<1x8x128xf32>,
    %904 = arith.mulf %808, %899 : vector<8x128xf32>
    %c1_210 = arith.constant 1 : index
    %c0_211 = arith.constant 0 : index
    %c0_212 = arith.constant 0 : index
    %905 = vector.load %arg17[%c1_210, %c0_211, %c0_212] : memref<3x8x128xf32, #tpu.memory_space<vmem>>, vector<1x8x128xf32>
    %906 = vector.shape_cast %905 : vector<1x8x128xf32> to vector<8x128xf32>
    %907 = vector.shape_cast %904 : vector<8x128xf32> to vector<1x8x128xf32>
    tpu.vector_store %arg17[%c1_210, %c0_211, %c0_212], %907 {strides = array<i32>} : memref<3x8x128xf32, #tpu.memory_space<vmem>>, vector<1x8x128xf32>,
    %908 = arith.mulf %812, %899 : vector<8x128xf32>
    %c2_213 = arith.constant 2 : index
    %c0_214 = arith.constant 0 : index
    %c0_215 = arith.constant 0 : index
    %909 = vector.load %arg17[%c2_213, %c0_214, %c0_215] : memref<3x8x128xf32, #tpu.memory_space<vmem>>, vector<1x8x128xf32>
    %910 = vector.shape_cast %909 : vector<1x8x128xf32> to vector<8x128xf32>
    %911 = vector.shape_cast %908 : vector<8x128xf32> to vector<1x8x128xf32>
    tpu.vector_store %arg17[%c2_213, %c0_214, %c0_215], %911 {strides = array<i32>} : memref<3x8x128xf32, #tpu.memory_space<vmem>>, vector<1x8x128xf32>,
    return
  }
  func.func @transform_0(%arg0: i32) -> (i32, i32) {
    %c0_i32 = arith.constant 0 : i32
    %c0_i32_0 = arith.constant 0 : i32
    return %arg0, %c0_i32 : i32, i32
  }
  func.func @transform_1(%arg0: i32) -> i32 {
    %c0_i32 = arith.constant 0 : i32
    %c0_i32_0 = arith.constant 0 : i32
    return %c0_i32 : i32
  }
  func.func @transform_2(%arg0: i32) -> i32 {
    %c0_i32 = arith.constant 0 : i32
    %c0_i32_0 = arith.constant 0 : i32
    return %c0_i32 : i32
  }
  func.func @transform_3(%arg0: i32) -> i32 {
    %c0_i32 = arith.constant 0 : i32
    %c0_i32_0 = arith.constant 0 : i32
    return %c0_i32 : i32
  }
  func.func @transform_4(%arg0: i32) -> i32 {
    %c0_i32 = arith.constant 0 : i32
    %c0_i32_0 = arith.constant 0 : i32
    return %c0_i32 : i32
  }
  func.func @transform_5(%arg0: i32) -> i32 {
    %c0_i32 = arith.constant 0 : i32
    %c0_i32_0 = arith.constant 0 : i32
    return %c0_i32 : i32
  }
  func.func @transform_6(%arg0: i32) -> i32 {
    %c0_i32 = arith.constant 0 : i32
    %c0_i32_0 = arith.constant 0 : i32
    return %c0_i32 : i32
  }
  func.func @transform_7(%arg0: i32) -> i32 {
    %c0_i32 = arith.constant 0 : i32
    %c0_i32_0 = arith.constant 0 : i32
    return %c0_i32 : i32
  }
  func.func @transform_8(%arg0: i32) -> i32 {
    %c0_i32 = arith.constant 0 : i32
    %c0_i32_0 = arith.constant 0 : i32
    return %c0_i32 : i32
  }
  func.func @transform_9(%arg0: i32) -> i32 {
    %c0_i32 = arith.constant 0 : i32
    %c0_i32_0 = arith.constant 0 : i32
    return %c0_i32 : i32
  }
  func.func @transform_10(%arg0: i32) -> i32 {
    %c0_i32 = arith.constant 0 : i32
    %c0_i32_0 = arith.constant 0 : i32
    return %c0_i32 : i32
  }
  func.func @transform_11(%arg0: i32) -> i32 {
    %c0_i32 = arith.constant 0 : i32
    %c0_i32_0 = arith.constant 0 : i32
    return %c0_i32 : i32
  }
  func.func @transform_12(%arg0: i32) -> i32 {
    %c0_i32 = arith.constant 0 : i32
    %c0_i32_0 = arith.constant 0 : i32
    return %c0_i32 : i32
  }
  func.func @transform_13(%arg0: i32) -> (i32, i32) {
    %c0_i32 = arith.constant 0 : i32
    %c0_i32_0 = arith.constant 0 : i32
    return %arg0, %c0_i32 : i32, i32
  }
  func.func @transform_14(%arg0: i32) -> (i32, i32) {
    %c0_i32 = arith.constant 0 : i32
    %c0_i32_0 = arith.constant 0 : i32
    return %arg0, %c0_i32 : i32, i32
  }
  func.func @transform_15(%arg0: i32) -> (i32, i32, i32) {
    %c0_i32 = arith.constant 0 : i32
    %c0_i32_0 = arith.constant 0 : i32
    %c0_i32_1 = arith.constant 0 : i32
    return %c0_i32, %arg0, %c0_i32_0 : i32, i32, i32
  }
  func.func @transform_16(%arg0: i32) -> (i32, i32, i32) {
    %c0_i32 = arith.constant 0 : i32
    %c0_i32_0 = arith.constant 0 : i32
    %c0_i32_1 = arith.constant 0 : i32
    return %c0_i32, %arg0, %c0_i32_0 : i32, i32, i32
  }
}

</mosaic_0001>

<bundles_post_ra>
// kernel: tpu_custom_call.1
= control target key start
LH: loop header
LB: loop body
LE: loop exit
PB: predicated region body
PF: predicated region fallthrough
CT: control target
= control target key end

     0   :  { %s3068_s0 = inlined_call_operand.hbm [shape: f32[8,128], index: 0, kind: input, shape index: {}]   ;;  %s3069_s1 = inlined_call_operand.vmem [shape: f32[8], index: 1, kind: input, shape index: {}]   ;;  %s3070_s2 = inlined_call_operand.vmem [shape: f32[8], index: 2, kind: input, shape index: {}]   ;;  %s3071_s3 = inlined_call_operand.<no memory space> [shape: f32[1], index: 3, kind: input, shape index: {}]   ;;  %s3072_s4 = inlined_call_operand.<no memory space> [shape: f32[1], index: 4, kind: input, shape index: {}]   ;;  %s3073_s5 = inlined_call_operand.vmem [shape: f32[8], index: 5, kind: input, shape index: {}]   ;;  %s3074_s6 = inlined_call_operand.vmem [shape: f32[8], index: 6, kind: input, shape index: {}]   ;;  %s3075_s7 = inlined_call_operand.<no memory space> [shape: f32[1], index: 7, kind: input, shape index: {}]   ;;  %s3076_s8 = inlined_call_operand.<no memory space> [shape: f32[1], index: 8, kind: input, shape index: {}]   ;;  %s3077_s9 = inlined_call_operand.vmem [shape: f32[24], index: 9, kind: input, shape index: {}]   ;;  %s3078_s10 = inlined_call_operand.vmem [shape: f32[96], index: 10, kind: input, shape index: {}]   ;;  %s3079_s11 = inlined_call_operand.vmem [shape: f32[72], index: 11, kind: input, shape index: {}]   ;;  %s3080_s12 = inlined_call_operand.vmem [shape: f32[32], index: 12, kind: input, shape index: {}]   ;;  %s3081_s13 = inlined_call_operand.hbm [shape: f32[8,128], index: 13, kind: output, shape index: {0}]   ;;  %s3082_s14 = inlined_call_operand.hbm [shape: s32[8,128], index: 14, kind: output, shape index: {1}]   ;;  %s3083_s15 = inlined_call_operand.hbm [shape: f32[3,8,128], index: 15, kind: output, shape index: {2}]   ;;  %s3084_s16 = inlined_call_operand.hbm [shape: f32[3,8,128], index: 16, kind: output, shape index: {3}]  }
   0x1   :  { %3089 = sst [smem:[#allocation127_spill]] %s3068_s0 }
   0x2   :  { %3090 = sst [smem:[#allocation128_spill]] %s3071_s3 }
   0x3   :  { %3091 = sst [smem:[#allocation129_spill]] %s3072_s4 }
   0x4   :  { %3092 = sst [smem:[#allocation130_spill]] %s3081_s13 }
   0x5   :  { %3093 = sst [smem:[#allocation131_spill]] %s3082_s14 }
   0x6   :  { %3094 = sst [smem:[#allocation132_spill]] %s3083_s15 }
   0x7   :  { %3095 = sst [smem:[#allocation133_spill]] %s3084_s16 }
   0x8   :  { %26 = vsyncpa [#allocation7], 0 }
   0x9   :  { %27 = vsyncpa [#allocation9], 0 }
   0xa   :  { %28 = vsyncpa [#allocation12], 0 }
   0xb   :  { %29 = vsyncpa [#allocation15], 0 }
   0xc   :  { %30 = vsyncpa [#allocation18], 0 }
   0xd   :  { %31 = vsyncpa [#allocation21], 0 }
   0xe   :  { %32 = vsyncpa [#allocation8], 0 }
   0xf   :  { %33 = vsyncpa [#allocation24], 0  ;;  %s61_s23 = sshll.u32 %s3070_s2, 4  ;;  %s62_s23 = int_to_ptr.vmem [resolvable:$true] %s61_s23 }
  0x10   :  { %34 = vsyncpa [#allocation27], 0  ;;  %s85_s26 = sshll.u32 %s3074_s6, 4  ;;  %s1332_s27 = scalar_lea.vmem %s62_s23, 16  ;;  %s86_s26 = int_to_ptr.vmem [resolvable:$true] %s85_s26 }
  0x11   :  { %p1333_p0 = scmp.ne.s32.totalorder %s62_s23, %s1332_s27  ;;  %p1337_p1 = scmp.lt.s32.totalorder %s62_s23, %s62_s23 }
  0x12   :  { %p1338_p2 = scmp.lt.s32.totalorder %s1332_s27, %s1332_s27 }
  0x14   :  { %p1339_p3 = por %p1338_p2, %p1337_p1 }
  0x16   :  { %p1340_p4 = pnand %p1339_p3, %p1333_p0 }
  0x18   :  { %1343 = shalt.err (!%p1340_p4)
}
  0x19   :  { %s1546_s28 = smov [#allocation11]   ;;  %s1344_s29 = scalar_lea.vmem %s86_s26, 16 }
  0x1a   :  { %64 = dma.vmem_to_smem %s62_s23, 16, %s1546_s28, [#allocation12]  }
  0x1b   :  { %p1345_p5 = scmp.ne.s32.totalorder %s86_s26, %s1344_s29  ;;  %p1349_p6 = scmp.lt.s32.totalorder %s86_s26, %s86_s26 }
  0x1c   :  { %p1350_p7 = scmp.lt.s32.totalorder %s1344_s29, %s1344_s29 }
  0x1e   :  { %p1351_p8 = por %p1350_p7, %p1349_p6 }
  0x20   :  { %p1352_p9 = pnand %p1351_p8, %p1345_p5 }
  0x22   :  { %1355 = shalt.err (!%p1352_p9)
}
  0x23   :  { %s1547_s2 = smov [#allocation14]   ;;  %s109_s0 = sshll.u32 %s3078_s10, 4  ;;  %s110_s0 = int_to_ptr.vmem [resolvable:$true] %s109_s0 }
  0x24   :  { %88 = dma.vmem_to_smem %s86_s26, 16, %s1547_s2, [#allocation15]  }
  0x25   :  { %s1356_s17 = scalar_lea.vmem %s110_s0, 16  ;;  %p1361_p11 = scmp.lt.s32.totalorder %s110_s0, %s110_s0 }
  0x26   :  { %p1357_p10 = scmp.ne.s32.totalorder %s110_s0, %s1356_s17  ;;  %p1362_p12 = scmp.lt.s32.totalorder %s1356_s17, %s1356_s17 }
  0x28   :  { %p1363_p13 = por %p1362_p12, %p1361_p11 }
  0x2a   :  { %p1364_p0 = pnand %p1363_p13, %p1357_p10 }
  0x2c   :  { %1367 = shalt.err (!%p1364_p0)
}
  0x2d   :  { %s1548_s18 = smov [#allocation17]   ;;  %s1549_s19 = smov [#allocation6]  }
  0x2e   :  { %112 = dma.vmem_to_smem %s110_s0, 16, %s1548_s18, [#allocation18]  }
  0x2f   :  { %s41_s20 = sshll.u32 %s1549_s19, 4  ;;  %s51_s23 = sshll.u32 %s3069_s1, 4  ;;  %s42_s20 = int_to_ptr.vmem [resolvable:$true] %s41_s20  ;;  %s52_s23 = int_to_ptr.vmem [resolvable:$true] %s51_s23 }
  0x30   :  { %s1376_s24 = scalar_lea.vmem %s42_s20, 128  ;;  %p1381_p2 = scmp.lt.s32.totalorder %s42_s20, %s42_s20 }
  0x31   :  { %p1377_p1 = scmp.ne.s32.totalorder %s42_s20, %s1376_s24  ;;  %p1382_p3 = scmp.lt.s32.totalorder %s1376_s24, %s1376_s24 }
  0x33   :  { %p1383_p4 = por %p1382_p3, %p1381_p2 }
  0x35   :  { %p1384_p5 = pnand %p1383_p4, %p1377_p1 }
  0x37   :  { %1387 = shalt.err (!%p1384_p5)
}
  0x38   :  { %s3096_s26 = sld [smem:[#allocation127_spill]]  ;;  %s75_s29 = sshll.u32 %s3073_s5, 4  ;;  %s76_s29 = int_to_ptr.vmem [resolvable:$true] %s75_s29 }
  0x39   :  { %s1388_s2 = scalar_lea.vmem %s52_s23, 16  ;;  %p1393_p7 = scmp.lt.s32.totalorder %s52_s23, %s52_s23 }
  0x3a   :  { %p1389_p6 = scmp.ne.s32.totalorder %s52_s23, %s1388_s2  ;;  %p1394_p8 = scmp.lt.s32.totalorder %s1388_s2, %s1388_s2 }
  0x3c   :  { %p1395_p9 = por %p1394_p8, %p1393_p7 }
  0x3e   :  { %44 = dma.hbm_to_vmem [thread:$0]  %s3096_s26, 128, %s42_s20, [#allocation7]  }
  0x3f   :  { %p1396_p10 = pnand %p1395_p9, %p1389_p6 }
  0x41   :  { %1399 = shalt.err (!%p1396_p10)
}
  0x42   :  { %s1550_s1 = smov [#allocation10]   ;;  %s1400_s6 = scalar_lea.vmem %s76_s29, 16 }
  0x43   :  { %54 = dma.vmem_to_smem %s52_s23, 16, %s1550_s1, [#allocation9]  }
  0x44   :  { %p1401_p11 = scmp.ne.s32.totalorder %s76_s29, %s1400_s6  ;;  %p1405_p12 = scmp.lt.s32.totalorder %s76_s29, %s76_s29 }
  0x45   :  { %p1406_p13 = scmp.lt.s32.totalorder %s1400_s6, %s1400_s6 }
  0x47   :  { %p1407_p0 = por %p1406_p13, %p1405_p12 }
  0x49   :  { %p1408_p1 = pnand %p1407_p0, %p1401_p11 }
  0x4b   :  { %1411 = shalt.err (!%p1408_p1)
}
  0x4c   :  { %s1551_s30 = smov [#allocation13]   ;;  %s99_s17 = sshll.u32 %s3077_s9, 4  ;;  %s100_s17 = int_to_ptr.vmem [resolvable:$true] %s99_s17 }
  0x4d   :  { %78 = dma.vmem_to_smem %s76_s29, 16, %s1551_s30, [#allocation12]  }
  0x4e   :  { %s119_s20 = sshll.u32 %s3079_s11, 4  ;;  %s1412_s21 = scalar_lea.vmem %s100_s17, 16  ;;  %s120_s20 = int_to_ptr.vmem [resolvable:$true] %s119_s20 }
  0x4f   :  { %p1413_p2 = scmp.ne.s32.totalorder %s100_s17, %s1412_s21  ;;  %p1417_p3 = scmp.lt.s32.totalorder %s100_s17, %s100_s17 }
  0x50   :  { %p1418_p4 = scmp.lt.s32.totalorder %s1412_s21, %s1412_s21 }
  0x52   :  { %p1419_p5 = por %p1418_p4, %p1417_p3 }
  0x54   :  { %p1420_p6 = pnand %p1419_p5, %p1413_p2 }
  0x56   :  { %1423 = shalt.err (!%p1420_p6)
}
  0x57   :  { %s1552_s22 = smov [#allocation16]   ;;  %s1424_s23 = scalar_lea.vmem %s120_s20, 16 }
  0x58   :  { %102 = dma.vmem_to_smem %s100_s17, 16, %s1552_s22, [#allocation15]  }
  0x59   :  { %p1425_p7 = scmp.ne.s32.totalorder %s120_s20, %s1424_s23  ;;  %p1429_p8 = scmp.lt.s32.totalorder %s120_s20, %s120_s20 }
  0x5a   :  { %p1430_p9 = scmp.lt.s32.totalorder %s1424_s23, %s1424_s23 }
  0x5c   :  { %p1431_p10 = por %p1430_p9, %p1429_p8 }
  0x5e   :  { %p1432_p11 = pnand %p1431_p10, %p1425_p7 }
  0x60   :  { %1435 = shalt.err (!%p1432_p11)
}
  0x61   :  { %s1553_s9 = smov [#allocation19]   ;;  %s129_s10 = sshll.u32 %s3080_s12, 4  ;;  %s130_s10 = int_to_ptr.vmem [resolvable:$true] %s129_s10 }
  0x62   :  { %122 = dma.vmem_to_smem %s120_s20, 16, %s1553_s9, [#allocation18]  }
  0x63   :  { %s1436_s25 = scalar_lea.vmem %s130_s10, 16  ;;  %p1441_p13 = scmp.lt.s32.totalorder %s130_s10, %s130_s10 }
  0x64   :  { %p1437_p12 = scmp.ne.s32.totalorder %s130_s10, %s1436_s25  ;;  %p1442_p0 = scmp.lt.s32.totalorder %s1436_s25, %s1436_s25 }
  0x66   :  { %p1443_p1 = por %p1442_p0, %p1441_p13 }
  0x68   :  { %p1444_p2 = pnand %p1443_p1, %p1437_p12 }
  0x6a   :  { %1447 = shalt.err (!%p1444_p2)
}
  0x6b   :  { %s1554_s26 = smov [#allocation20]  }
  0x6c   :  { %132 = dma.vmem_to_smem %s130_s10, 16, %s1554_s26, [#allocation21]  }
  0x6d   :  { %1528 = dma.done.wait [#allocation7], 128  }
  0x6e   :  { %1529 = vsyncadd [#allocation7], 4294967168 }
  0x6f   :  { %1530 = dma.done.wait [#allocation9], 16  }
  0x70   :  { %1531 = vsyncadd [#allocation9], 4294967280 }
  0x71   :  { %1532 = dma.done.wait [#allocation12], 32  }
  0x72   :  { %1533 = vsyncadd [#allocation12], 4294967264 }
  0x73   :  { %1534 = dma.done.wait [#allocation15], 32  }
  0x74   :  { %1535 = vsyncadd [#allocation15], 4294967264 }
  0x75   :  { %1536 = dma.done.wait [#allocation18], 32  }
  0x76   :  { %1537 = vsyncadd [#allocation18], 4294967264 }
  0x77   :  { %1538 = dma.done.wait [#allocation21], 16  }
  0x78   :  { %1539 = vsyncadd [#allocation21], 4294967280 }
  0x79   :  { %160 = sfence }
  0x7a   :  { %s1674_s12 = sld [smem:[#allocation13 + $0x1]]  ;;  %v421_v0 = vld [vmem:[#allocation6] sm:$0xff]  ;;  %v422_v1 = vstv %s3076_s8  ;;  %v425_v3 = vstv %s3075_s7  ;;  %v1555_v12 = vmov 0  }
  0x7b   :  { %s1679_s29 = sld [smem:[#allocation13 + $0x2]]  ;;  %v423_v2 = vmul.f32 %v422_v1, %v421_v0 }
  0x7c   :  { %s1681_s2 = sld [smem:[#allocation13 + $0x3]] }
  0x7d   :  { %s1686_s30 = sld [smem:[#allocation13 + $0x4]]  ;;  %v424_v4 = vfloor.f32 %v423_v2 }
  0x7e   :  { %s1688_s5 = sld [smem:[#allocation13 + $0x5]] }
  0x7f   :  { %s1690_s8 = sld [smem:[#allocation13 + $0x6]]  ;;  %v426_v5 = vmul.f32 %v425_v3, %v424_v4 }
  0x80   :  { %s1692_s0 = sld [smem:[#allocation13 + $0x7]]  ;;  %v433_v6 = vstv %s1674_s12 }
  0x81   :  { %v1695_v7 = vsub.f32 %v421_v0, %v426_v5  ;;  %v445_v8 = vstv %s1679_s29  ;;  %s1699_s7 = sld [smem:[#allocation10]] }
  0x82   :  { %v457_v9 = vstv %s1681_s2  ;;  %s1709_s17 = sld [smem:[#allocation10 + $0x1]] }
  0x83   :  { %vm1704_vm0 = vcmp.ge.f32.partialorder %v1695_v7, %v433_v6  ;;  %v469_v11 = vstv %s1686_s30  ;;  %vm1716_vm1 = vcmp.ge.f32.partialorder %v1695_v7, %v445_v8  ;;  %s1721_s18 = sld [smem:[#allocation10 + $0x2]]  ;;  %vm1728_vm2 = vcmp.ge.f32.partialorder %v1695_v7, %v457_v9 }
  0x84   :  { %v435_v13 = vsel %vm1704_vm0, 1, %v1555_v12  ;;  %v481_v15 = vstv %s1688_s5  ;;  %s1733_s19 = sld [smem:[#allocation10 + $0x3]]  ;;  %vm1740_vm3 = vcmp.ge.f32.partialorder %v1695_v7, %v469_v11 }
  0x85   :  { %v447_v16 = vsel %vm1716_vm1, 2, %v435_v13  ;;  %v493_v18 = vstv %s1690_s8  ;;  %s1745_s20 = sld [smem:[#allocation10 + $0x4]]  ;;  %vm1752_vm4 = vcmp.ge.f32.partialorder %v1695_v7, %v481_v15 }
  0x86   :  { %3097 = sst [smem:[#allocation37_spill]] %s1692_s0  ;;  %v459_v19 = vsel %vm1728_vm2, 3, %v447_v16  ;;  %v505_v21 = vstv %s1692_s0  ;;  %vm1763_vm5 = vcmp.ge.f32.partialorder %v1695_v7, %v493_v18 }
  0x87   :  { %v471_v22 = vsel %vm1740_vm3, 4, %v459_v19  ;;  %s1756_s21 = sld [smem:[#allocation10 + $0x5]]  ;;  %vm1774_vm6 = vcmp.ge.f32.partialorder %v1695_v7, %v505_v21  ;;  %v529_v29 = vstv %s1699_s7 }
  0x88   :  { %v483_v24 = vsel %vm1752_vm4, 5, %v471_v22  ;;  %s1767_s22 = sld [smem:[#allocation10 + $0x6]]  ;;  %v532_v30 = vstv %s1709_s17 }
  0x89   :  { %v495_v26 = vsel %vm1763_vm5, 6, %v483_v24  ;;  %s1778_s23 = sld [smem:[#allocation10 + $0x7]]  ;;  %v537_v34 = vstv %s1721_s18 }
  0x8a   :  { %v1782_v28 = vsel %vm1774_vm6, 7, %v495_v26  ;;  %s1784_s9 = sld [smem:[#allocation11]]  ;;  %v542_v38 = vstv %s1733_s19 }
  0x8b   :  { %569 = vst [vmem:[#allocation23] sm:$0xff] %v1782_v28  ;;  %s1787_s11 = sld [smem:[#allocation11 + $0x1]]  ;;  %vm531_vm7 = vcmp.ge.s32.totalorder %v1782_v28, 1  ;;  %vm536_vm8 = vcmp.ge.s32.totalorder %v1782_v28, 2  ;;  %vm541_vm9 = vcmp.ge.s32.totalorder %v1782_v28, 3  ;;  %vm546_vm10 = vcmp.ge.s32.totalorder %v1782_v28, 4 }
  0x8c   :  { %s1789_s24 = sld [smem:[#allocation11 + $0x2]]  ;;  %v533_v33 = vsel %vm531_vm7, %v532_v30, %v529_v29  ;;  %v547_v42 = vstv %s1745_s20  ;;  %vm551_vm11 = vcmp.ge.s32.totalorder %v1782_v28, 5  ;;  %vm556_vm12 = vcmp.ge.s32.totalorder %v1782_v28, 6 }
  0x8d   :  { %s1791_s10 = sld [smem:[#allocation11 + $0x3]]  ;;  %v538_v37 = vsel %vm536_vm8, %v537_v34, %v533_v33  ;;  %v552_v46 = vstv %s1756_s21  ;;  %vm561_vm13 = vcmp.ge.s32.totalorder %v1782_v28, 7 }
  0x8e   :  { %s1793_s25 = sld [smem:[#allocation11 + $0x4]]  ;;  %v543_v41 = vsel %vm541_vm9, %v542_v38, %v538_v37  ;;  %v557_v51 = vstv %s1767_s22 }
  0x8f   :  { %3112 = sst [smem:[#allocation38_spill]] %s1778_s23  ;;  %v548_v45 = vsel %vm546_vm10, %v547_v42, %v543_v41 }
  0x90   :  { %s1795_s26 = sld [smem:[#allocation11 + $0x5]]  ;;  %v530_v31 = vstv %s1784_s9  ;;  %v553_v50 = vsel %vm551_vm11, %v552_v46, %v548_v45 }
  0x91   :  { %s1797_s27 = sld [smem:[#allocation11 + $0x6]]  ;;  %v534_v32 = vstv %s1787_s11  ;;  %v558_v60 = vsel %vm556_vm12, %v557_v51, %v553_v50 }
  0x92   :  { %s1799_s28 = sld [smem:[#allocation11 + $0x7]]  ;;  %v535_v35 = vsel %vm531_vm7, %v534_v32, %v530_v31  ;;  %v539_v36 = vstv %s1789_s24 }
  0x93   :  { %s1801_s1 = sld [smem:[#allocation17]]  ;;  %v540_v39 = vsel %vm536_vm8, %v539_v36, %v535_v35  ;;  %v544_v40 = vstv %s1791_s10 }
  0x94   :  { %s1803_s6 = sld [smem:[#allocation17 + $0x1]]  ;;  %v545_v43 = vsel %vm541_vm9, %v544_v40, %v540_v39  ;;  %v549_v44 = vstv %s1793_s25 }
  0x95   :  { %s1805_s16 = sld [smem:[#allocation17 + $0x2]]  ;;  %v550_v47 = vsel %vm546_vm10, %v549_v44, %v545_v43 }
  0x96   :  { %s1807_s15 = sld [smem:[#allocation17 + $0x3]]  ;;  %v554_v48 = vstv %s1795_s26 }
  0x97   :  { %s1809_s13 = sld [smem:[#allocation17 + $0x4]]  ;;  %v555_v56 = vsel %vm551_vm11, %v554_v48, %v550_v47  ;;  %v559_v0 = vstv %s1797_s27 }
  0x98   :  { %3113 = sst [smem:[#allocation39_spill]] %s1799_s28  ;;  %v560_v12 = vsel %vm556_vm12, %v559_v0, %v555_v56 }
  0x99   :  { %3114 = sst [smem:[#allocation40_spill]] %s1801_s1 }
  0x9a   :  { %3115 = sst [smem:[#allocation41_spill]] %s1803_s6 }
  0x9b   :  { %3116 = sst [smem:[#allocation42_spill]] %s1805_s16 }
  0x9c   :  { %3117 = sst [smem:[#allocation43_spill]] %s1807_s15 }
  0x9d   :  { %3118 = sst [smem:[#allocation44_spill]] %s1809_s13 }
  0x9e   :  { %s1811_s14 = sld [smem:[#allocation17 + $0x5]] }
  0x9f   :  { %s1813_s3 = sld [smem:[#allocation17 + $0x6]] }
  0xa0   :  { %s1815_s4 = sld [smem:[#allocation17 + $0x7]] }
  0xa1   :  { %s1817_s0 = sld [smem:[#allocation17 + $0x8]] }
  0xa2   :  { %s1819_s23 = sld [smem:[#allocation17 + $0x9]] }
  0xa3   :  { %s1821_s28 = sld [smem:[#allocation17 + $0xa]] }
  0xa4   :  { %3119 = sst [smem:[#allocation45_spill]] %s1811_s14 }
  0xa5   :  { %3120 = sst [smem:[#allocation46_spill]] %s1813_s3 }
  0xa6   :  { %3121 = sst [smem:[#allocation47_spill]] %s1815_s4 }
  0xa7   :  { %3122 = sst [smem:[#allocation48_spill]] %s1817_s0 }
  0xa8   :  { %3123 = sst [smem:[#allocation49_spill]] %s1819_s23 }
  0xa9   :  { %3124 = sst [smem:[#allocation50_spill]] %s1821_s28 }
  0xaa   :  { %s1823_s1 = sld [smem:[#allocation17 + $0xb]] }
  0xab   :  { %s1825_s6 = sld [smem:[#allocation17 + $0xc]] }
  0xac   :  { %s1827_s16 = sld [smem:[#allocation17 + $0xd]] }
  0xad   :  { %s1829_s15 = sld [smem:[#allocation17 + $0xe]] }
  0xae   :  { %s1831_s13 = sld [smem:[#allocation17 + $0xf]] }
  0xaf   :  { %s1833_s14 = sld [smem:[#allocation17 + $0x10]] }
  0xb0   :  { %3125 = sst [smem:[#allocation51_spill]] %s1823_s1 }
  0xb1   :  { %3126 = sst [smem:[#allocation52_spill]] %s1825_s6 }
  0xb2   :  { %3127 = sst [smem:[#allocation53_spill]] %s1827_s16 }
  0xb3   :  { %3128 = sst [smem:[#allocation54_spill]] %s1829_s15 }
  0xb4   :  { %3129 = sst [smem:[#allocation55_spill]] %s1831_s13 }
  0xb5   :  { %3130 = sst [smem:[#allocation56_spill]] %s1833_s14 }
  0xb6   :  { %s1835_s3 = sld [smem:[#allocation17 + $0x11]] }
  0xb7   :  { %s1837_s4 = sld [smem:[#allocation17 + $0x12]] }
  0xb8   :  { %s1839_s0 = sld [smem:[#allocation17 + $0x13]] }
  0xb9   :  { %s1841_s23 = sld [smem:[#allocation17 + $0x14]] }
  0xba   :  { %s1843_s28 = sld [smem:[#allocation17 + $0x15]] }
  0xbb   :  { %s1845_s1 = sld [smem:[#allocation17 + $0x16]] }
  0xbc   :  { %3131 = sst [smem:[#allocation57_spill]] %s1835_s3 }
  0xbd   :  { %3132 = sst [smem:[#allocation58_spill]] %s1837_s4 }
  0xbe   :  { %3133 = sst [smem:[#allocation59_spill]] %s1839_s0 }
  0xbf   :  { %3134 = sst [smem:[#allocation60_spill]] %s1841_s23 }
  0xc0   :  { %3135 = sst [smem:[#allocation61_spill]] %s1843_s28 }
  0xc1   :  { %3136 = sst [smem:[#allocation62_spill]] %s1845_s1 }
  0xc2   :  { %s1847_s6 = sld [smem:[#allocation17 + $0x17]] }
  0xc3   :  { %s1849_s16 = sld [smem:[#allocation17 + $0x18]] }
  0xc4   :  { %s1851_s15 = sld [smem:[#allocation17 + $0x19]] }
  0xc5   :  { %s1853_s13 = sld [smem:[#allocation17 + $0x1a]] }
  0xc6   :  { %s1855_s14 = sld [smem:[#allocation17 + $0x1b]] }
  0xc7   :  { %s1857_s3 = sld [smem:[#allocation17 + $0x1c]] }
  0xc8   :  { %3137 = sst [smem:[#allocation63_spill]] %s1847_s6 }
  0xc9   :  { %3138 = sst [smem:[#allocation64_spill]] %s1849_s16 }
  0xca   :  { %3139 = sst [smem:[#allocation65_spill]] %s1851_s15 }
  0xcb   :  { %3140 = sst [smem:[#allocation66_spill]] %s1853_s13 }
  0xcc   :  { %3141 = sst [smem:[#allocation67_spill]] %s1855_s14 }
  0xcd   :  { %3142 = sst [smem:[#allocation68_spill]] %s1857_s3 }
  0xce   :  { %s1859_s4 = sld [smem:[#allocation17 + $0x1d]] }
  0xcf   :  { %s1861_s0 = sld [smem:[#allocation17 + $0x1e]] }
  0xd0   :  { %s1863_s23 = sld [smem:[#allocation17 + $0x1f]] }
  0xd1   :  { %s1865_s28 = sld [smem:[#allocation17 + $0x20]] }
  0xd2   :  { %s1867_s1 = sld [smem:[#allocation17 + $0x21]] }
  0xd3   :  { %s1869_s6 = sld [smem:[#allocation17 + $0x22]] }
  0xd4   :  { %3143 = sst [smem:[#allocation69_spill]] %s1859_s4 }
  0xd5   :  { %3144 = sst [smem:[#allocation70_spill]] %s1861_s0 }
  0xd6   :  { %3145 = sst [smem:[#allocation71_spill]] %s1863_s23 }
  0xd7   :  { %3146 = sst [smem:[#allocation72_spill]] %s1865_s28 }
  0xd8   :  { %3147 = sst [smem:[#allocation73_spill]] %s1867_s1 }
  0xd9   :  { %3148 = sst [smem:[#allocation74_spill]] %s1869_s6 }
  0xda   :  { %s1871_s16 = sld [smem:[#allocation17 + $0x23]] }
  0xdb   :  { %s1873_s15 = sld [smem:[#allocation17 + $0x24]] }
  0xdc   :  { %s1875_s13 = sld [smem:[#allocation17 + $0x25]] }
  0xdd   :  { %s1877_s14 = sld [smem:[#allocation17 + $0x26]] }
  0xde   :  { %s1879_s3 = sld [smem:[#allocation17 + $0x27]] }
  0xdf   :  { %s1881_s4 = sld [smem:[#allocation17 + $0x28]] }
  0xe0   :  { %3149 = sst [smem:[#allocation75_spill]] %s1871_s16 }
  0xe1   :  { %3150 = sst [smem:[#allocation76_spill]] %s1873_s15 }
  0xe2   :  { %3151 = sst [smem:[#allocation77_spill]] %s1875_s13 }
  0xe3   :  { %3152 = sst [smem:[#allocation78_spill]] %s1877_s14 }
  0xe4   :  { %3153 = sst [smem:[#allocation79_spill]] %s1879_s3 }
  0xe5   :  { %3154 = sst [smem:[#allocation80_spill]] %s1881_s4 }
  0xe6   :  { %s1883_s0 = sld [smem:[#allocation17 + $0x29]] }
  0xe7   :  { %s1885_s23 = sld [smem:[#allocation17 + $0x2a]] }
  0xe8   :  { %s1887_s28 = sld [smem:[#allocation17 + $0x2b]] }
  0xe9   :  { %s1889_s1 = sld [smem:[#allocation17 + $0x2c]] }
  0xea   :  { %s1891_s6 = sld [smem:[#allocation17 + $0x2d]] }
  0xeb   :  { %s1893_s16 = sld [smem:[#allocation17 + $0x2e]] }
  0xec   :  { %3155 = sst [smem:[#allocation81_spill]] %s1883_s0 }
  0xed   :  { %3156 = sst [smem:[#allocation82_spill]] %s1885_s23 }
  0xee   :  { %3157 = sst [smem:[#allocation83_spill]] %s1887_s28 }
  0xef   :  { %3158 = sst [smem:[#allocation84_spill]] %s1889_s1 }
  0xf0   :  { %3159 = sst [smem:[#allocation85_spill]] %s1891_s6 }
  0xf1   :  { %3160 = sst [smem:[#allocation86_spill]] %s1893_s16 }
  0xf2   :  { %s1895_s15 = sld [smem:[#allocation17 + $0x2f]] }
  0xf3   :  { %s1897_s13 = sld [smem:[#allocation17 + $0x30]] }
  0xf4   :  { %s1899_s14 = sld [smem:[#allocation17 + $0x31]] }
  0xf5   :  { %s1901_s3 = sld [smem:[#allocation17 + $0x32]] }
  0xf6   :  { %s1903_s4 = sld [smem:[#allocation17 + $0x33]] }
  0xf7   :  { %s1905_s0 = sld [smem:[#allocation17 + $0x34]] }
  0xf8   :  { %3161 = sst [smem:[#allocation87_spill]] %s1895_s15 }
  0xf9   :  { %3162 = sst [smem:[#allocation88_spill]] %s1897_s13 }
  0xfa   :  { %3163 = sst [smem:[#allocation89_spill]] %s1899_s14 }
  0xfb   :  { %3164 = sst [smem:[#allocation90_spill]] %s1901_s3 }
  0xfc   :  { %3165 = sst [smem:[#allocation91_spill]] %s1903_s4 }
  0xfd   :  { %3166 = sst [smem:[#allocation92_spill]] %s1905_s0 }
  0xfe   :  { %s1907_s23 = sld [smem:[#allocation17 + $0x35]] }
  0xff   :  { %s1909_s28 = sld [smem:[#allocation17 + $0x36]] }
 0x100   :  { %s1911_s1 = sld [smem:[#allocation17 + $0x37]] }
 0x101   :  { %s1913_s6 = sld [smem:[#allocation17 + $0x38]] }
 0x102   :  { %s1915_s16 = sld [smem:[#allocation17 + $0x39]] }
 0x103   :  { %s1917_s15 = sld [smem:[#allocation17 + $0x3a]] }
 0x104   :  { %3167 = sst [smem:[#allocation93_spill]] %s1907_s23 }
 0x105   :  { %3168 = sst [smem:[#allocation94_spill]] %s1909_s28 }
 0x106   :  { %3169 = sst [smem:[#allocation95_spill]] %s1911_s1 }
 0x107   :  { %3170 = sst [smem:[#allocation96_spill]] %s1913_s6 }
 0x108   :  { %3171 = sst [smem:[#allocation97_spill]] %s1915_s16 }
 0x109   :  { %3172 = sst [smem:[#allocation98_spill]] %s1917_s15 }
 0x10a   :  { %s1919_s13 = sld [smem:[#allocation17 + $0x3b]] }
 0x10b   :  { %s1921_s14 = sld [smem:[#allocation17 + $0x3c]] }
 0x10c   :  { %s1923_s3 = sld [smem:[#allocation17 + $0x3d]] }
 0x10d   :  { %s1925_s4 = sld [smem:[#allocation17 + $0x3e]] }
 0x10e   :  { %s1927_s0 = sld [smem:[#allocation17 + $0x3f]] }
 0x10f   :  { %s1929_s23 = sld [smem:[#allocation17 + $0x40]] }
 0x110   :  { %3173 = sst [smem:[#allocation99_spill]] %s1919_s13 }
 0x111   :  { %3174 = sst [smem:[#allocation100_spill]] %s1921_s14 }
 0x112   :  { %s1931_s28 = sld [smem:[#allocation17 + $0x41]] }
 0x113   :  { %3175 = sst [smem:[#allocation101_spill]] %s1925_s4 }
 0x114   :  { %3176 = sst [smem:[#allocation102_spill]] %s1927_s0 }
 0x115   :  { %3177 = sst [smem:[#allocation103_spill]] %s1929_s23 }
 0x116   :  { %s1933_s1 = sld [smem:[#allocation17 + $0x42]] }
 0x117   :  { %s1935_s6 = sld [smem:[#allocation17 + $0x43]] }
 0x118   :  { %3178 = sst [smem:[#allocation104_spill]] %s1931_s28 }
 0x119   :  { %s1937_s16 = sld [smem:[#allocation17 + $0x44]] }
 0x11a   :  { %s1939_s15 = sld [smem:[#allocation17 + $0x45]] }
 0x11b   :  { %s1941_s13 = sld [smem:[#allocation17 + $0x46]] }
 0x11c   :  { %3179 = sst [smem:[#allocation105_spill]] %s1933_s1 }
 0x11d   :  { %s1943_s14 = sld [smem:[#allocation17 + $0x47]] }
 0x11e   :  { %s1945_s4 = sld [smem:[#allocation17 + $0x48]] }
 0x11f   :  { %3180 = sst [smem:[#allocation106_spill]] %s1937_s16 }
 0x120   :  { %3181 = sst [smem:[#allocation107_spill]] %s1939_s15 }
 0x121   :  { %3182 = sst [smem:[#allocation108_spill]] %s1941_s13 }
 0x122   :  { %s1947_s0 = sld [smem:[#allocation17 + $0x49]] }
 0x123   :  { %3183 = sst [smem:[#allocation109_spill]] %s1943_s14 }
 0x124   :  { %3184 = sst [smem:[#allocation110_spill]] %s1945_s4 }
 0x125   :  { %s1949_s23 = sld [smem:[#allocation17 + $0x4a]] }
 0x126   :  { %s1951_s28 = sld [smem:[#allocation17 + $0x4b]] }
 0x127   :  { %s1953_s1 = sld [smem:[#allocation17 + $0x4c]] }
 0x128   :  { %3185 = sst [smem:[#allocation111_spill]] %s1947_s0 }
 0x129   :  { %s1955_s16 = sld [smem:[#allocation17 + $0x4d]] }
 0x12a   :  { %s1957_s15 = sld [smem:[#allocation17 + $0x4e]] }
 0x12b   :  { %3186 = sst [smem:[#allocation112_spill]] %s1949_s23 }
 0x12c   :  { %3187 = sst [smem:[#allocation113_spill]] %s1951_s28 }
 0x12d   :  { %3188 = sst [smem:[#allocation114_spill]] %s1953_s1 }
 0x12e   :  { %s1959_s13 = sld [smem:[#allocation17 + $0x4f]] }
 0x12f   :  { %3189 = sst [smem:[#allocation115_spill]] %s1955_s16 }
 0x130   :  { %s1961_s14 = sld [smem:[#allocation17 + $0x50]] }
 0x131   :  { %s1963_s4 = sld [smem:[#allocation17 + $0x51]] }
 0x132   :  { %s1965_s0 = sld [smem:[#allocation17 + $0x52]] }
 0x133   :  { %s1967_s23 = sld [smem:[#allocation17 + $0x53]] }
 0x134   :  { %s1969_s28 = sld [smem:[#allocation17 + $0x54]] }
 0x135   :  { %s1971_s1 = sld [smem:[#allocation17 + $0x55]] }
 0x136   :  { %3190 = sst [smem:[#allocation116_spill]] %s1961_s14 }
 0x137   :  { %3191 = sst [smem:[#allocation117_spill]] %s1963_s4 }
 0x138   :  { %s1973_s16 = sld [smem:[#allocation17 + $0x56]] }
 0x139   :  { %3192 = sst [smem:[#allocation118_spill]] %s1967_s23 }
 0x13a   :  { %3193 = sst [smem:[#allocation119_spill]] %s1969_s28 }
 0x13b   :  { %3194 = sst [smem:[#allocation120_spill]] %s1971_s1 }
 0x13c   :  { %s1978_s14 = sld [smem:[#allocation17 + $0x57]] }
 0x13d   :  { %s1980_s4 = sld [smem:[#allocation17 + $0x58]] }
 0x13e   :  { %3195 = sst [smem:[#allocation121_spill]] %s1973_s16 }
 0x13f   :  { %s1984_s23 = sld [smem:[#allocation17 + $0x59]] }
 0x140   :  { %s1990_s7 = sld [smem:[#allocation17 + $0x5a]] }
 0x141   :  { %s1992_s17 = sld [smem:[#allocation17 + $0x5b]] }
 0x142   :  { %3196 = sst [smem:[#allocation122_spill]] %s1978_s14 }
 0x143   :  { %3197 = sst [smem:[#allocation123_spill]] %s1980_s4 }
 0x144   :  { %s1997_s9 = sld [smem:[#allocation17 + $0x5c]] }
 0x145   :  { %3198 = sst [smem:[#allocation124_spill]] %s1984_s23 }
 0x146   :  { %s2003_s18 = sld [smem:[#allocation17 + $0x5d]] }
 0x147   :  { %s2005_s11 = sld [smem:[#allocation17 + $0x5e]] }
 0x148   :  { %s277_s24 = sld [smem:[#allocation13]] }
 0x149   :  { %s285_s16 = sld [smem:[#allocation14]] }
 0x14a   :  { %s1182_s19 = sld [smem:[#allocation14 + $0x1]] }
 0x14b   :  { %s1183_s1 = sld [smem:[#allocation14 + $0x2]] }
 0x14c   :  { %3199 = sst [smem:[#allocation125_spill]] %s2003_s18 }
 0x14d   :  { %3200 = sst [smem:[#allocation126_spill]] %s2005_s11 }
 0x14e   :  { %s1184_s10 = sld [smem:[#allocation14 + $0x3]]  ;;  %v428_v49 = vstv %s277_s24 }
 0x14f   :  { %s2021_s28 = sld [smem:[#allocation14 + $0x4]]  ;;  %v429_v52 = vstv %s285_s16  ;;  %v436_v53 = vsel %vm1704_vm0, %v433_v6, %v428_v49 }
 0x150   :  { %s2026_s20 = sld [smem:[#allocation14 + $0x5]]  ;;  %v437_v54 = vstv %s1182_s19  ;;  %v448_v55 = vsel %vm1716_vm1, %v445_v8, %v436_v53 }
 0x151   :  { %s2032_s25 = sld [smem:[#allocation14 + $0x6]]  ;;  %v438_v57 = vsel %vm1704_vm0, %v437_v54, %v429_v52  ;;  %v449_v58 = vstv %s1183_s1  ;;  %v460_v59 = vsel %vm1728_vm2, %v457_v9, %v448_v55 }
 0x152   :  { %s2038_s21 = sld [smem:[#allocation14 + $0x7]]  ;;  %v450_v61 = vsel %vm1716_vm1, %v449_v58, %v438_v57  ;;  %v472_v63 = vsel %vm1740_vm3, %v469_v11, %v460_v59 }
 0x153   :  { %s2046_s22 = sld [smem:[#allocation16]]  ;;  %v484_v3 = vsel %vm1752_vm4, %v481_v15, %v472_v63 }
 0x154   :  { %s3201_s16 = sld [smem:[#allocation38_spill]]  ;;  %v461_v62 = vstv %s1184_s10  ;;  %v496_v6 = vsel %vm1763_vm5, %v493_v18, %v484_v3 }
 0x155   :  { %s2056_s12 = sld [smem:[#allocation16 + $0x1]]  ;;  %v462_v1 = vsel %vm1728_vm2, %v461_v62, %v450_v61  ;;  %v473_v2 = vstv %s2021_s28  ;;  %v508_v15 = vsel %vm1774_vm6, %v505_v21, %v496_v6 }
 0x156   :  { %s3202_s29 = sld [smem:[#allocation39_spill]]  ;;  %v474_v4 = vsel %vm1740_vm3, %v473_v2, %v462_v1  ;;  %v485_v5 = vstv %s2026_s20  ;;  %v517_v35 = vsub.f32 %v1695_v7, %v508_v15 }
 0x157   :  { %s2065_s2 = sld [smem:[#allocation16 + $0x2]]  ;;  %v486_v9 = vsel %vm1752_vm4, %v485_v5, %v474_v4  ;;  %v497_v11 = vstv %s2032_s25 }
 0x158   :  { %s2075_s1 = sld [smem:[#allocation16 + $0x3]]  ;;  %v498_v21 = vsel %vm1763_vm5, %v497_v11, %v486_v9  ;;  %v509_v22 = vstv %s2038_s21 }
 0x159   :  { %s3204_s30 = sld [smem:[#allocation40_spill]]  ;;  %v510_v38 = vsel %vm1774_vm6, %v509_v22, %v498_v21  ;;  %v430_v41 = vstv %s2046_s22 }
 0x15a   :  { %v562_v8 = vstv %s3201_s16  ;;  %s2085_s27 = sld [smem:[#allocation16 + $0x4]]  ;;  %v2157_v49 = vmul.f32 %v517_v35, %v510_v38 }
 0x15b   :  { %s3205_s5 = sld [smem:[#allocation41_spill]]  ;;  %v2109_v19 = vsel %vm561_vm13, %v562_v8, %v558_v60  ;;  %v431_v33 = vstv %s2056_s12 }
 0x15c   :  { %s3206_s28 = sld [smem:[#allocation42_spill]]  ;;  %v564_v13 = vstv %s3202_s29 }
 0x15d   :  { %s3207_s24 = sld [smem:[#allocation43_spill]]  ;;  %v2118_v24 = vsel %vm561_vm13, %v564_v13, %v560_v12  ;;  %v432_v34 = vstv %s2065_s2 }
 0x15e   :  { %s3208_s8 = sld [smem:[#allocation44_spill]]  ;;  %v439_v44 = vstv %s2075_s1 }
 0x15f   :  { %s2093_s19 = sld [smem:[#allocation16 + $0x5]]  ;;  %v570_v26 = vstv %s3204_s30  ;;  %v440_v56 = vsel %vm1704_vm0, %v439_v44, %v430_v41 }
 0x160   :  { %s2095_s10 = sld [smem:[#allocation16 + $0x6]]  ;;  %v441_v37 = vstv %s2085_s27 }
 0x161   :  { %s3209_s23 = sld [smem:[#allocation129_spill]]  ;;  %v571_v29 = vstv %s3205_s5  ;;  %v442_v45 = vsel %vm1704_vm0, %v441_v37, %v431_v33 }
 0x162   :  { %s3210_s11 = sld [smem:[#allocation128_spill]]  ;;  %v572_v30 = vstv %s3206_s28 }
 0x163   :  { %s3211_s29 = sld [smem:[#allocation45_spill]]  ;;  %v573_v31 = vstv %s3207_s24 }
 0x164   :  { %s2111_s18 = sld [smem:[#allocation16 + $0x7]]  ;;  %v574_v32 = vstv %s3208_s8 }
 0x165   :  { %s3212_s26 = sld [smem:[#allocation46_spill]]  ;;  %v443_v42 = vstv %s2093_s19 }
 0x166   :  { %s3213_s20 = sld [smem:[#allocation47_spill]]  ;;  %v444_v46 = vsel %vm1704_vm0, %v443_v42, %v432_v34  ;;  %v451_v57 = vstv %s2095_s10 }
 0x167   :  { %v523_v16 = vstv %s3209_s23  ;;  %s2121_s4 = sld [smem:[#allocation16 + $0x8]]  ;;  %v452_v3 = vsel %vm1716_vm1, %v451_v57, %v440_v56 }
 0x168   :  { %v526_v18 = vstv %s3210_s11  ;;  %s3214_s16 = sld [smem:[#allocation48_spill]] }
 0x169   :  { %s3215_s25 = sld [smem:[#allocation52_spill]]  ;;  %v575_v36 = vstv %s3211_s29 }
 0x16a   :  { %s2127_s14 = sld [smem:[#allocation16 + $0x9]]  ;;  %v453_v48 = vstv %s2111_s18 }
 0x16b   :  { %s3216_s21 = sld [smem:[#allocation49_spill]]  ;;  %v576_v39 = vstv %s3212_s26  ;;  %v454_v58 = vsel %vm1716_vm1, %v453_v48, %v442_v45 }
 0x16c   :  { %s2133_s30 = sld [smem:[#allocation16 + $0xa]]  ;;  %v577_v40 = vstv %s3213_s20 }
 0x16d   :  { %s3217_s5 = sld [smem:[#allocation53_spill]]  ;;  %v455_v52 = vstv %s2121_s4 }
 0x16e   :  { %s3218_s28 = sld [smem:[#allocation54_spill]]  ;;  %v578_v7 = vstv %s3214_s16  ;;  %v456_v59 = vsel %vm1716_vm1, %v455_v52, %v444_v46 }
 0x16f   :  { %s2140_s24 = sld [smem:[#allocation16 + $0xb]]  ;;  %v582_v43 = vstv %s3215_s25 }
 0x170   :  { %s3219_s12 = sld [smem:[#allocation50_spill]]  ;;  %v583_v55 = vsel %vm531_vm7, %v582_v43, %v570_v26  ;;  %v463_v4 = vstv %s2127_s14 }
 0x171   :  { %s3220_s2 = sld [smem:[#allocation51_spill]]  ;;  %v579_v47 = vstv %s3216_s21  ;;  %v464_v22 = vsel %vm1728_vm2, %v463_v4, %v452_v3 }
 0x172   :  { %s2146_s8 = sld [smem:[#allocation16 + $0xc]]  ;;  %v465_v60 = vstv %s2133_s30 }
 0x173   :  { %s2154_s27 = sld [smem:[#allocation16 + $0xd]]  ;;  %v584_v50 = vstv %s3217_s5  ;;  %v466_v5 = vsel %vm1728_vm2, %v465_v60, %v454_v58 }
 0x174   :  { %s3221_s22 = sld [smem:[#allocation55_spill]]  ;;  %v586_v51 = vstv %s3218_s28  ;;  %v585_v61 = vsel %vm531_vm7, %v584_v50, %v571_v29 }
 0x175   :  { %s2161_s19 = sld [smem:[#allocation16 + $0xe]]  ;;  %v587_v10 = vsel %vm531_vm7, %v586_v51, %v572_v30  ;;  %v467_v63 = vstv %s2140_s24 }
 0x176   :  { %s3222_s1 = sld [smem:[#allocation56_spill]]  ;;  %v580_v53 = vstv %s3219_s12  ;;  %v468_v6 = vsel %vm1728_vm2, %v467_v63, %v456_v59 }
 0x177   :  { %s3223_s29 = sld [smem:[#allocation57_spill]]  ;;  %v581_v54 = vstv %s3220_s2 }
 0x178   :  { %s3224_s26 = sld [smem:[#allocation58_spill]]  ;;  %v475_v26 = vstv %s2146_s8 }
 0x179   :  { %s2168_s20 = sld [smem:[#allocation16 + $0xf]]  ;;  %v477_v8 = vstv %s2154_s27  ;;  %v476_v38 = vsel %vm1740_vm3, %v475_v26, %v464_v22 }
 0x17a   :  { %s2177_s18 = sld [smem:[#allocation16 + $0x10]]  ;;  %v588_v62 = vstv %s3221_s22  ;;  %v478_v29 = vsel %vm1740_vm3, %v477_v8, %v466_v5 }
 0x17b   :  { %s3225_s4 = sld [smem:[#allocation59_spill]]  ;;  %v2205_v9 = vsel %vm531_vm7, %v588_v62, %v573_v31  ;;  %v479_v12 = vstv %s2161_s19 }
 0x17c   :  { %s3226_s16 = sld [smem:[#allocation60_spill]]  ;;  %v590_v0 = vstv %s3222_s1  ;;  %v480_v30 = vsel %vm1740_vm3, %v479_v12, %v468_v6 }
 0x17d   :  { %s2185_s10 = sld [smem:[#allocation16 + $0x11]]  ;;  %v592_v1 = vstv %s3223_s29  ;;  %v591_v13 = vsel %vm531_vm7, %v590_v0, %v574_v32 }
 0x17e   :  { %v594_v2 = vstv %s3224_s26  ;;  %s2191_s25 = sld [smem:[#allocation16 + $0x12]]  ;;  %v593_v15 = vsel %vm531_vm7, %v592_v1, %v575_v36 }
 0x17f   :  { %s2200_s30 = sld [smem:[#allocation16 + $0x13]]  ;;  %v2218_v21 = vsel %vm531_vm7, %v594_v2, %v576_v39  ;;  %v487_v39 = vstv %s2168_s20 }
 0x180   :  { %s3227_s5 = sld [smem:[#allocation61_spill]]  ;;  %v489_v31 = vstv %s2177_s18 }
 0x181   :  { %v596_v11 = vstv %s3225_s4  ;;  %s2209_s28 = sld [smem:[#allocation16 + $0x14]] }
 0x182   :  { %v598_v14 = vstv %s3226_s16  ;;  %s3228_s14 = sld [smem:[#allocation62_spill]]  ;;  %v597_v32 = vsel %vm531_vm7, %v596_v11, %v577_v40  ;;  %v490_v40 = vsel %vm1752_vm4, %v489_v31, %v478_v29 }
 0x183   :  { %s3229_s24 = sld [smem:[#allocation63_spill]]  ;;  %v599_v17 = vsel %vm531_vm7, %v598_v14, %v578_v7  ;;  %v491_v34 = vstv %s2185_s10 }
 0x184   :  { %s3230_s12 = sld [smem:[#allocation64_spill]]  ;;  %v492_v41 = vsel %vm1752_vm4, %v491_v34, %v480_v30  ;;  %v499_v50 = vstv %s2191_s25 }
 0x185   :  { %s2220_s2 = sld [smem:[#allocation16 + $0x15]]  ;;  %v501_v42 = vstv %s2200_s30 }
 0x186   :  { %s2229_s27 = sld [smem:[#allocation16 + $0x16]]  ;;  %v600_v33 = vstv %s3227_s5  ;;  %v502_v51 = vsel %vm1763_vm5, %v501_v42, %v490_v40 }
 0x187   :  { %s3231_s22 = sld [smem:[#allocation65_spill]]  ;;  %v601_v7 = vsel %vm531_vm7, %v600_v33, %v579_v47  ;;  %v503_v44 = vstv %s2209_s28  ;;  %v488_v47 = vsel %vm1752_vm4, %v487_v39, %v476_v38 }
 0x188   :  { %s3232_s19 = sld [smem:[#allocation66_spill]]  ;;  %v602_v35 = vstv %s3228_s14  ;;  %v504_v52 = vsel %vm1763_vm5, %v503_v44, %v492_v41  ;;  %v500_v60 = vsel %vm1763_vm5, %v499_v50, %v488_v47 }
 0x189   :  { %s2237_s8 = sld [smem:[#allocation16 + $0x17]]  ;;  %v604_v36 = vstv %s3229_s24  ;;  %v603_v45 = vsel %vm531_vm7, %v602_v35, %v580_v53 }
 0x18a   :  { %v606_v37 = vstv %s3230_s12  ;;  %s2243_s1 = sld [smem:[#allocation17 + $0x5f]]  ;;  %v605_v46 = vsel %vm531_vm7, %v604_v36, %v581_v54 }
 0x18b   :  { %s2252_s29 = sld [smem:[#allocation19]]  ;;  %v607_v48 = vsel %vm536_vm8, %v606_v37, %v583_v55  ;;  %v511_v63 = vstv %s2220_s2 }
 0x18c   :  { %s3233_s26 = sld [smem:[#allocation67_spill]]  ;;  %v513_v53 = vstv %s2229_s27  ;;  %v512_v14 = vsel %vm1774_vm6, %v511_v63, %v500_v60 }
 0x18d   :  { %v608_v43 = vstv %s3231_s22  ;;  %s2261_s18 = sld [smem:[#allocation19 + $0x1]] }
 0x18e   :  { %v610_v20 = vstv %s3232_s19  ;;  %s3234_s20 = sld [smem:[#allocation68_spill]]  ;;  %v609_v54 = vsel %vm536_vm8, %v608_v43, %v585_v61  ;;  %v514_v61 = vsel %vm1774_vm6, %v513_v53, %v502_v51 }
 0x18f   :  { %s3235_s4 = sld [smem:[#allocation69_spill]]  ;;  %v611_v23 = vsel %vm536_vm8, %v610_v20, %v587_v10  ;;  %v515_v56 = vstv %s2237_s8 }
 0x190   :  { %s3236_s21 = sld [smem:[#allocation70_spill]]  ;;  %v516_v10 = vsel %vm1774_vm6, %v515_v56, %v504_v52 }
 0x191   :  { %s2270_s16 = sld [smem:[#allocation19 + $0x2]]  ;;  %v519_v0 = vmul.f32 %v2157_v49, %v516_v10 }
 0x192   :  { %s3237_s10 = sld [smem:[#allocation71_spill]]  ;;  %v612_v55 = vstv %s3233_s26 }
 0x193   :  { %s2279_s30 = sld [smem:[#allocation19 + $0x3]]  ;;  %v613_v25 = vsel %vm536_vm8, %v612_v55, %v2205_v9  ;;  %v520_v6 = vadd.f32 %v519_v0, %v514_v61 }
 0x194   :  { %s3238_s5 = sld [smem:[#allocation72_spill]]  ;;  %v614_v57 = vstv %s3234_s20 }
 0x195   :  { %s3239_s28 = sld [smem:[#allocation73_spill]]  ;;  %v616_v58 = vstv %s3235_s4  ;;  %v615_v3 = vsel %vm536_vm8, %v614_v57, %v591_v13 }
 0x196   :  { %s2287_s25 = sld [smem:[#allocation19 + $0x4]]  ;;  %v618_v59 = vstv %s3236_s21  ;;  %v617_v4 = vsel %vm536_vm8, %v616_v58, %v593_v15 }
 0x197   :  { %s3241_s14 = sld [smem:[#allocation74_spill]]  ;;  %v619_v8 = vsel %vm536_vm8, %v618_v59, %v2218_v21  ;;  %v521_v21 = vmul.f32 %v520_v6, %v2157_v49 }
 0x198   :  { %s2293_s24 = sld [smem:[#allocation19 + $0x5]]  ;;  %v620_v62 = vstv %s3237_s10 }
 0x199   :  { %s3243_s12 = sld [smem:[#allocation75_spill]]  ;;  %v621_v12 = vsel %vm536_vm8, %v620_v62, %v597_v32  ;;  %v522_v49 = vadd.f32 %v521_v21, %v512_v14 }
 0x19a   :  { %s3244_s27 = sld [smem:[#allocation76_spill]]  ;;  %v622_v1 = vstv %s3238_s5 }
 0x19b   :  { %s2302_s22 = sld [smem:[#allocation19 + $0x6]]  ;;  %v624_v2 = vstv %s3239_s28  ;;  %v623_v13 = vsel %vm536_vm8, %v622_v1, %v599_v17  ;;  %v524_v39 = vmul.f32 %v523_v16, %v522_v49 }
 0x19c   :  { %3240 = sst [smem:[#allocation38_spill]] %s2287_s25  ;;  %v625_v15 = vsel %vm536_vm8, %v624_v2, %v601_v7 }
 0x19d   :  { %s2308_s19 = sld [smem:[#allocation19 + $0x7]]  ;;  %v626_v5 = vstv %s3241_s14  ;;  %v525_v44 = vfloor.f32 %v524_v39 }
 0x19e   :  { %3242 = sst [smem:[#allocation39_spill]] %s2293_s24  ;;  %v627_v27 = vsel %vm536_vm8, %v626_v5, %v603_v45 }
 0x19f   :  { %s3247_s8 = sld [smem:[#allocation77_spill]]  ;;  %v628_v11 = vstv %s3243_s12  ;;  %v527_v53 = vmul.f32 %v526_v18, %v525_v44  ;;  %v722_v44 = vstv %s1965_s0 }
 0x1a0   :  { %s3248_s26 = sld [smem:[#allocation78_spill]]  ;;  %v630_v9 = vstv %s3244_s27  ;;  %v629_v29 = vsel %vm536_vm8, %v628_v11, %v605_v46  ;;  %v680_v11 = vstv %s1923_s3 }
 0x1a1   :  { %3245 = sst [smem:[#allocation37_spill]] %s2302_s22  ;;  %v631_v30 = vsel %vm541_vm9, %v630_v9, %v607_v48  ;;  %v528_v60 = vsub.f32 %v522_v49, %v527_v53 }
 0x1a2   :  { %s2318_s2 = sld [smem:[#allocation19 + $0x8]] }
 0x1a3   :  { %3246 = sst [smem:[#allocation40_spill]] %s2308_s19  ;;  %568 = vst [vmem:[#allocation22] sm:$0xff] %v528_v60  ;;  %v566_v9 = vsub.f32 %v528_v60, %v2109_v19  ;;  %v742_v60 = vstv %s1997_s9 }
 0x1a4   :  { %s3250_s20 = sld [smem:[#allocation79_spill]] }
 0x1a5   :  { %s3251_s4 = sld [smem:[#allocation80_spill]]  ;;  %v632_v22 = vstv %s3247_s8 }
 0x1a6   :  { %s2325_s21 = sld [smem:[#allocation19 + $0x9]]  ;;  %v634_v26 = vstv %s3248_s26  ;;  %v633_v35 = vsel %vm541_vm9, %v632_v22, %v609_v54  ;;  %v692_v22 = vstv %s1935_s6 }
 0x1a7   :  { %s3252_s10 = sld [smem:[#allocation81_spill]]  ;;  %v635_v36 = vsel %vm541_vm9, %v634_v26, %v611_v23 }
 0x1a8   :  { %3249 = sst [smem:[#allocation41_spill]] %s2318_s2 }
 0x1a9   :  { %s3253_s5 = sld [smem:[#allocation82_spill]] }
 0x1aa   :  { %s3254_s28 = sld [smem:[#allocation83_spill]]  ;;  %v636_v31 = vstv %s3250_s20 }
 0x1ab   :  { %s2335_s14 = sld [smem:[#allocation19 + $0xa]]  ;;  %v638_v32 = vstv %s3251_s4  ;;  %v637_v40 = vsel %vm541_vm9, %v636_v31, %v613_v25 }
 0x1ac   :  { %s3255_s12 = sld [smem:[#allocation84_spill]]  ;;  %v639_v7 = vsel %vm541_vm9, %v638_v32, %v615_v3 }
 0x1ad   :  { %s3256_s27 = sld [smem:[#allocation85_spill]]  ;;  %v640_v17 = vstv %s3252_s10 }
 0x1ae   :  { %s2342_s2 = sld [smem:[#allocation19 + $0xb]]  ;;  %v641_v43 = vsel %vm541_vm9, %v640_v17, %v617_v4 }
 0x1af   :  { %s3258_s19 = sld [smem:[#allocation86_spill]]  ;;  %v642_v33 = vstv %s3253_s5 }
 0x1b0   :  { %s3259_s22 = sld [smem:[#allocation87_spill]]  ;;  %v644_v34 = vstv %s3254_s28  ;;  %v643_v16 = vsel %vm541_vm9, %v642_v33, %v619_v8  ;;  %v2486_v33 = vmul.f32 %v566_v9, %v2118_v24 }
 0x1b1   :  { %s2350_s24 = sld [smem:[#allocation19 + $0xc]]  ;;  %v645_v20 = vsel %vm541_vm9, %v644_v34, %v621_v12 }
 0x1b2   :  { %s2355_s8 = sld [smem:[#allocation19 + $0xd]]  ;;  %v646_v37 = vstv %s3255_s12 }
 0x1b3   :  { %s3262_s26 = sld [smem:[#allocation88_spill]]  ;;  %v648_v38 = vstv %s3256_s27  ;;  %v647_v45 = vsel %vm541_vm9, %v646_v37, %v623_v13 }
 0x1b4   :  { %3257 = sst [smem:[#allocation42_spill]] %s2342_s2  ;;  %v649_v46 = vsel %vm541_vm9, %v648_v38, %v625_v15 }
 0x1b5   :  { %s2363_s20 = sld [smem:[#allocation19 + $0xe]]  ;;  %v650_v41 = vstv %s3258_s19 }
 0x1b6   :  { %s3264_s10 = sld [smem:[#allocation89_spill]]  ;;  %v652_v42 = vstv %s3259_s22  ;;  %v651_v47 = vsel %vm541_vm9, %v650_v41, %v627_v27 }
 0x1b7   :  { %3260 = sst [smem:[#allocation43_spill]] %s2350_s24  ;;  %v653_v50 = vsel %vm541_vm9, %v652_v42, %v629_v29 }
 0x1b8   :  { %3261 = sst [smem:[#allocation44_spill]] %s2355_s8 }
 0x1b9   :  { %s3265_s5 = sld [smem:[#allocation90_spill]]  ;;  %v654_v48 = vstv %s3262_s26 }
 0x1ba   :  { %s2373_s28 = sld [smem:[#allocation19 + $0xf]]  ;;  %v655_v56 = vsel %vm546_vm10, %v654_v48, %v631_v30 }
 0x1bb   :  { %3263 = sst [smem:[#allocation45_spill]] %s2363_s20 }
 0x1bc   :  { %s3267_s12 = sld [smem:[#allocation91_spill]]  ;;  %v656_v51 = vstv %s3264_s10 }
 0x1bd   :  { %s3268_s23 = sld [smem:[#allocation92_spill]]  ;;  %v657_v61 = vsel %vm546_vm10, %v656_v51, %v633_v35 }
 0x1be   :  { %s3269_s2 = sld [smem:[#allocation93_spill]]  ;;  %v2468_v19 = vsel %vm551_vm11, %v680_v11, %v657_v61 }
 0x1bf   :  { %s2383_s19 = sld [smem:[#allocation19 + $0x10]]  ;;  %v658_v52 = vstv %s3265_s5 }
 0x1c0   :  { %3266 = sst [smem:[#allocation46_spill]] %s2373_s28  ;;  %v659_v62 = vsel %vm546_vm10, %v658_v52, %v635_v36 }
 0x1c1   :  { %s3271_s22 = sld [smem:[#allocation94_spill]] }
 0x1c2   :  { %s3272_s27 = sld [smem:[#allocation95_spill]]  ;;  %v660_v54 = vstv %s3267_s12 }
 0x1c3   :  { %s3273_s4 = sld [smem:[#allocation96_spill]]  ;;  %v662_v23 = vstv %s3268_s23  ;;  %v661_v63 = vsel %vm546_vm10, %v660_v54, %v637_v40 }
 0x1c4   :  { %s2390_s28 = sld [smem:[#allocation19 + $0x11]]  ;;  %v664_v55 = vstv %s3269_s2  ;;  %v663_v0 = vsel %vm546_vm10, %v662_v23, %v639_v7  ;;  %v714_v7 = vstv %s1957_s15 }
 0x1c5   :  { %3270 = sst [smem:[#allocation47_spill]] %s2383_s19  ;;  %v665_v1 = vsel %vm546_vm10, %v664_v55, %v641_v43  ;;  %v716_v43 = vstv %s1959_s13 }
 0x1c6   :  { %s3274_s19 = sld [smem:[#allocation97_spill]] }
 0x1c7   :  { %s3275_s20 = sld [smem:[#allocation98_spill]]  ;;  %v666_v57 = vstv %s3271_s22 }
 0x1c8   :  { %s2398_s8 = sld [smem:[#allocation19 + $0x12]]  ;;  %v668_v58 = vstv %s3272_s27  ;;  %v667_v2 = vsel %vm546_vm10, %v666_v57, %v643_v16 }
 0x1c9   :  { %s2407_s26 = sld [smem:[#allocation19 + $0x13]]  ;;  %v670_v59 = vstv %s3273_s4  ;;  %v669_v25 = vsel %vm546_vm10, %v668_v58, %v645_v20  ;;  %v738_v58 = vstv %s1990_s7 }
 0x1ca   :  { %s3276_s10 = sld [smem:[#allocation99_spill]]  ;;  %v671_v3 = vsel %vm546_vm10, %v670_v59, %v647_v45  ;;  %v693_v36 = vsel %vm551_vm11, %v692_v22, %v669_v25  ;;  %v740_v59 = vstv %s1992_s17 }
 0x1cb   :  { %s2414_s5 = sld [smem:[#allocation19 + $0x14]]  ;;  %v717_v54 = vsel %vm556_vm12, %v716_v43, %v693_v36 }
 0x1cc   :  { %v672_v10 = vstv %s3274_s19  ;;  %s3277_s11 = sld [smem:[#allocation100_spill]] }
 0x1cd   :  { %v674_v18 = vstv %s3275_s20  ;;  %s2420_s25 = sld [smem:[#allocation19 + $0x15]]  ;;  %v673_v5 = vsel %vm546_vm10, %v672_v10, %v649_v46 }
 0x1ce   :  { %s3279_s24 = sld [smem:[#allocation101_spill]]  ;;  %v675_v6 = vsel %vm546_vm10, %v674_v18, %v651_v47 }
 0x1cf   :  { %s3280_s12 = sld [smem:[#allocation102_spill]] }
 0x1d0   :  { %s3281_s23 = sld [smem:[#allocation103_spill]]  ;;  %v676_v4 = vstv %s3276_s10 }
 0x1d1   :  { %s2430_s2 = sld [smem:[#allocation19 + $0x16]]  ;;  %v677_v15 = vsel %vm546_vm10, %v676_v4, %v653_v50 }
 0x1d2   :  { %s3283_s20 = sld [smem:[#allocation104_spill]]  ;;  %v678_v8 = vstv %s3277_s11 }
 0x1d3   :  { %3278 = sst [smem:[#allocation48_spill]] %s2420_s25  ;;  %v2464_v26 = vsel %vm551_vm11, %v678_v8, %v655_v56 }
 0x1d4   :  { %s3284_s19 = sld [smem:[#allocation105_spill]]  ;;  %v682_v14 = vstv %s3279_s24 }
 0x1d5   :  { %s2439_s22 = sld [smem:[#allocation19 + $0x17]]  ;;  %v684_v12 = vstv %s3280_s12  ;;  %v2476_v31 = vsel %vm551_vm11, %v682_v14, %v659_v62 }
 0x1d6   :  { %s3286_s27 = sld [smem:[#allocation106_spill]]  ;;  %v686_v13 = vstv %s3281_s23  ;;  %v685_v32 = vsel %vm551_vm11, %v684_v12, %v661_v63  ;;  %v741_v63 = vsel %vm561_vm13, %v740_v59, %v717_v54 }
 0x1d7   :  { %3282 = sst [smem:[#allocation52_spill]] %s2430_s2  ;;  %v687_v49 = vsel %vm551_vm11, %v686_v13, %v663_v0 }
 0x1d8   :  { %s3287_s4 = sld [smem:[#allocation107_spill]]  ;;  %v688_v21 = vstv %s3283_s20 }
 0x1d9   :  { %s2447_s2 = sld [smem:[#allocation19 + $0x18]]  ;;  %v689_v34 = vsel %vm551_vm11, %v688_v21, %v665_v1 }
 0x1da   :  { %s3288_s25 = sld [smem:[#allocation108_spill]]  ;;  %v690_v27 = vstv %s3284_s19 }
 0x1db   :  { %3285 = sst [smem:[#allocation49_spill]] %s2439_s22  ;;  %v691_v35 = vsel %vm551_vm11, %v690_v27, %v667_v2  ;;  %v748_v2 = vstv %s2243_s1 }
 0x1dc   :  { %s2453_s10 = sld [smem:[#allocation19 + $0x19]]  ;;  %v694_v29 = vstv %s3286_s27  ;;  %v715_v53 = vsel %vm556_vm12, %v714_v7, %v691_v35 }
 0x1dd   :  { %s2460_s22 = sld [smem:[#allocation19 + $0x1a]]  ;;  %v695_v37 = vsel %vm551_vm11, %v694_v29, %v671_v3  ;;  %v739_v18 = vsel %vm561_vm13, %v738_v58, %v715_v53 }
 0x1de   :  { %s3291_s3 = sld [smem:[#allocation109_spill]]  ;;  %v696_v30 = vstv %s3287_s4 }
 0x1df   :  { %s3292_s11 = sld [smem:[#allocation110_spill]]  ;;  %v697_v24 = vsel %vm551_vm11, %v696_v30, %v673_v5 }
 0x1e0   :  { %s2472_s24 = sld [smem:[#allocation19 + $0x1b]]  ;;  %v698_v17 = vstv %s3288_s25 }
 0x1e1   :  { %s3294_s6 = sld [smem:[#allocation113_spill]]  ;;  %v699_v40 = vsel %vm551_vm11, %v698_v17, %v675_v6 }
 0x1e2   :  { %3289 = sst [smem:[#allocation53_spill]] %s2453_s10  ;;  %v723_v56 = vsel %vm556_vm12, %v722_v44, %v699_v40  ;;  %v775_v44 = vstv %s2270_s16 }
 0x1e3   :  { %3290 = sst [smem:[#allocation54_spill]] %s2460_s22 }
 0x1e4   :  { %s3295_s12 = sld [smem:[#allocation114_spill]]  ;;  %v700_v38 = vstv %s3291_s3 }
 0x1e5   :  { %s2483_s23 = sld [smem:[#allocation19 + $0x1c]]  ;;  %v702_v39 = vstv %s3292_s11  ;;  %v701_v45 = vsel %vm551_vm11, %v700_v38, %v677_v15 }
 0x1e6   :  { %3293 = sst [smem:[#allocation50_spill]] %s2472_s24  ;;  %v703_v14 = vsel %vm556_vm12, %v702_v39, %v2464_v26 }
 0x1e7   :  { %s3297_s20 = sld [smem:[#allocation116_spill]]  ;;  %v708_v41 = vstv %s3294_s6 }
 0x1e8   :  { %s3298_s19 = sld [smem:[#allocation117_spill]]  ;;  %v709_v50 = vsel %vm556_vm12, %v708_v41, %v685_v32 }
 0x1e9   :  { %s2494_s27 = sld [smem:[#allocation19 + $0x1d]] }
 0x1ea   :  { %s3300_s25 = sld [smem:[#allocation111_spill]]  ;;  %v710_v42 = vstv %s3295_s12 }
 0x1eb   :  { %3296 = sst [smem:[#allocation51_spill]] %s2483_s23  ;;  %v711_v51 = vsel %vm556_vm12, %v710_v42, %v687_v49 }
 0x1ec   :  { %s3301_s4 = sld [smem:[#allocation112_spill]] }
 0x1ed   :  { %s3302_s23 = sld [smem:[#allocation118_spill]]  ;;  %v718_v16 = vstv %s3297_s20 }
 0x1ee   :  { %s2502_s24 = sld [smem:[#allocation19 + $0x1e]]  ;;  %v720_v20 = vstv %s3298_s19  ;;  %v719_v23 = vsel %vm556_vm12, %v718_v16, %v695_v37  ;;  %v773_v16 = vstv %s2252_s29 }
 0x1ef   :  { %3299 = sst [smem:[#allocation55_spill]] %s2494_s27  ;;  %v721_v55 = vsel %vm556_vm12, %v720_v20, %v697_v24  ;;  %v743_v25 = vsel %vm561_vm13, %v742_v60, %v719_v23  ;;  %v774_v20 = vstv %s2261_s18 }
 0x1f0   :  { %s3303_s22 = sld [smem:[#allocation115_spill]]  ;;  %v704_v46 = vstv %s3300_s25 }
 0x1f1   :  { %s2509_s27 = sld [smem:[#allocation19 + $0x1f]]  ;;  %v705_v12 = vsel %vm556_vm12, %v704_v46, %v2468_v19  ;;  %v782_v46 = vstv %s2325_s21 }
 0x1f2   :  { %s2515_s10 = sld [smem:[#allocation19 + $0x20]]  ;;  %v706_v48 = vstv %s3301_s4 }
 0x1f3   :  { %v724_v47 = vstv %s3302_s23  ;;  %s2522_s3 = sld [smem:[#allocation19 + $0x21]]  ;;  %v707_v15 = vsel %vm556_vm12, %v706_v48, %v2476_v31  ;;  %v784_v48 = vstv %s2335_s14 }
 0x1f4   :  { %s3305_s13 = sld [smem:[#allocation122_spill]]  ;;  %v725_v57 = vsel %vm556_vm12, %v724_v47, %v701_v45  ;;  %v776_v45 = vstv %s2279_s30  ;;  %v785_v58 = vsel %vm531_vm7, %v784_v48, %v774_v20 }
 0x1f5   :  { %s3306_s15 = sld [smem:[#allocation125_spill]]  ;;  %v749_v4 = vsel %vm561_vm13, %v748_v2, %v725_v57  ;;  %v783_v57 = vsel %vm531_vm7, %v782_v46, %v773_v16 }
 0x1f6   :  { %v712_v52 = vstv %s3303_s22  ;;  %s2531_s0 = sld [smem:[#allocation19 + $0x22]]  ;;  %v765_v9 = vmul.f32 %v749_v4, %v2486_v33 }
 0x1f7   :  { %s3307_s11 = sld [smem:[#allocation126_spill]]  ;;  %v713_v61 = vsel %vm556_vm12, %v712_v52, %v689_v34 }
 0x1f8   :  { %3304 = sst [smem:[#allocation56_spill]] %s2515_s10  ;;  %v766_v22 = vadd.f32 %v765_v9, %v743_v25  ;;  %v804_v25 = vstv %s2414_s5 }
 0x1f9   :  { %s2541_s22 = sld [smem:[#allocation19 + $0x23]] }
 0x1fa   :  { %s2548_s6 = sld [smem:[#allocation19 + $0x24]]  ;;  %v732_v10 = vstv %s3305_s13  ;;  %v767_v17 = vmul.f32 %v766_v22, %v2486_v33 }
 0x1fb   :  { %s3309_s12 = sld [smem:[#allocation123_spill]]  ;;  %v744_v62 = vstv %s3306_s15  ;;  %v733_v21 = vsel %vm561_vm13, %v732_v10, %v709_v50 }
 0x1fc   :  { %s3310_s23 = sld [smem:[#allocation124_spill]]  ;;  %v745_v0 = vsel %vm561_vm13, %v744_v62, %v721_v55 }
 0x1fd   :  { %s2556_s20 = sld [smem:[#allocation19 + $0x25]]  ;;  %v746_v1 = vstv %s3307_s11  ;;  %v750_v5 = vmul.f32 %v745_v0, %v2486_v33  ;;  %v800_v0 = vstv %s2398_s8 }
 0x1fe   :  { %s2564_s7 = sld [smem:[#allocation19 + $0x26]]  ;;  %v747_v3 = vsel %vm561_vm13, %v746_v1, %v723_v56  ;;  %v802_v1 = vstv %s2407_s26  ;;  %v801_v9 = vsel %vm536_vm8, %v800_v0, %v783_v57 }
 0x1ff   :  { %s3313_s17 = sld [smem:[#allocation119_spill]]  ;;  %v757_v11 = vmul.f32 %v747_v3, %v2486_v33  ;;  %v751_v13 = vadd.f32 %v750_v5, %v739_v18  ;;  %v798_v18 = vstv %s2390_s28 }
 0x200   :  { %3308 = sst [smem:[#allocation57_spill]] %s2548_s6 }
 0x201   :  { %s2573_s9 = sld [smem:[#allocation19 + $0x27]]  ;;  %v734_v6 = vstv %s3309_s12  ;;  %v758_v27 = vadd.f32 %v757_v11, %v741_v63  ;;  %v752_v30 = vmul.f32 %v751_v13, %v2486_v33  ;;  %v812_v11 = vstv %s2447_s2 }
 0x202   :  { %v736_v8 = vstv %s3310_s23  ;;  %s3314_s1 = sld [smem:[#allocation120_spill]]  ;;  %v735_v26 = vsel %vm561_vm13, %v734_v6, %v711_v51 }
 0x203   :  { %3311 = sst [smem:[#allocation58_spill]] %s2556_s20  ;;  %v737_v19 = vsel %vm561_vm13, %v736_v8, %v713_v61  ;;  %v759_v49 = vmul.f32 %v758_v27, %v2486_v33  ;;  %v753_v34 = vadd.f32 %v752_v30, %v733_v21  ;;  %v830_v30 = vstv %s2522_s3 }
 0x204   :  { %3312 = sst [smem:[#allocation59_spill]] %s2564_s7  ;;  %v768_v37 = vadd.f32 %v767_v17, %v737_v19  ;;  %v824_v19 = vstv %s2502_s24  ;;  %v832_v17 = vstv %s2531_s0 }
 0x205   :  { %s2579_s19 = sld [smem:[#allocation19 + $0x28]]  ;;  %v726_v29 = vstv %s3313_s17  ;;  %v760_v36 = vadd.f32 %v759_v49, %v735_v26  ;;  %v754_v39 = vmul.f32 %v753_v34, %v2486_v33  ;;  %v826_v49 = vstv %s2509_s27 }
 0x206   :  { %s3315_s25 = sld [smem:[#allocation121_spill]]  ;;  %v727_v35 = vsel %vm561_vm13, %v726_v29, %v703_v14  ;;  %v769_v41 = vmul.f32 %v768_v37, %v2486_v33  ;;  %v803_v14 = vsel %vm536_vm8, %v802_v1, %v785_v58  ;;  %v834_v37 = vstv %s2541_s22 }
 0x207   :  { %s2587_s4 = sld [smem:[#allocation19 + $0x29]]  ;;  %v761_v40 = vmul.f32 %v760_v36, %v2486_v33  ;;  %v755_v42 = vadd.f32 %v754_v39, %v727_v35  ;;  %v842_v39 = vstv %s2573_s9 }
 0x208   :  { %s2594_s13 = sld [smem:[#allocation19 + $0x2a]]  ;;  %v728_v32 = vstv %s3314_s1 }
 0x209   :  { %s2602_s15 = sld [smem:[#allocation19 + $0x2b]]  ;;  %v729_v24 = vsel %vm561_vm13, %v728_v32, %v705_v12  ;;  %756 = vst [vmem:[#allocation25] sm:$0xff] %v755_v42 }
 0x20a   :  { %s2608_s11 = sld [smem:[#allocation19 + $0x2c]]  ;;  %v762_v7 = vadd.f32 %v761_v40, %v729_v24 }
 0x20b   :  { %s2610_s12 = sld [smem:[#allocation19 + $0x2d]] }
 0x20c   :  { %v730_v31 = vstv %s3315_s25  ;;  %s2614_s23 = sld [smem:[#allocation19 + $0x2e]]  ;;  %764 = vst [vmem:[#allocation25 + $0x8] sm:$0xff] %v762_v7  ;;  %v844_v7 = vstv %s2579_s19 }
 0x20d   :  { %3316 = sst [smem:[#allocation60_spill]] %s2587_s4  ;;  %v731_v38 = vsel %vm561_vm13, %v730_v31, %v707_v15 }
 0x20e   :  { %s2621_s17 = sld [smem:[#allocation19 + $0x2f]]  ;;  %v770_v43 = vadd.f32 %v769_v41, %v731_v38  ;;  %v848_v40 = vstv %s2594_s13 }
 0x20f   :  { %3317 = sst [smem:[#allocation61_spill]] %s2602_s15 }
 0x210   :  { %3318 = sst [smem:[#allocation62_spill]] %s2608_s11  ;;  %772 = vst [vmem:[#allocation25 + $0x10] sm:$0xff] %v770_v43 }
 0x211   :  { %3319 = sst [smem:[#allocation63_spill]] %s2610_s12 }
 0x212   :  { %3320 = sst [smem:[#allocation64_spill]] %s2614_s23 }
 0x213   :  { %s2625_s1 = sld [smem:[#allocation19 + $0x30]] }
 0x214   :  { %3321 = sst [smem:[#allocation65_spill]] %s2621_s17 }
 0x215   :  { %s3323_s25 = sld [smem:[#allocation38_spill]] }
 0x216   :  { %s3324_s23 = sld [smem:[#allocation39_spill]] }
 0x217   :  { %s2627_s12 = sld [smem:[#allocation19 + $0x31]] }
 0x218   :  { %s3326_s7 = sld [smem:[#allocation42_spill]] }
 0x219   :  { %3322 = sst [smem:[#allocation66_spill]] %s2625_s1 }
 0x21a   :  { %s3327_s4 = sld [smem:[#allocation43_spill]] }
 0x21b   :  { %s3328_s20 = sld [smem:[#allocation37_spill]]  ;;  %v777_v47 = vstv %s3323_s25 }
 0x21c   :  { %s3329_s6 = sld [smem:[#allocation40_spill]]  ;;  %v778_v50 = vstv %s3324_s23 }
 0x21d   :  { %3325 = sst [smem:[#allocation67_spill]] %s2627_s12 }
 0x21e   :  { %s2631_s17 = sld [smem:[#allocation19 + $0x32]]  ;;  %v786_v51 = vstv %s3326_s7 }
 0x21f   :  { %s3330_s11 = sld [smem:[#allocation44_spill]]  ;;  %v787_v60 = vsel %vm531_vm7, %v786_v51, %v775_v44 }
 0x220   :  { %s3331_s10 = sld [smem:[#allocation45_spill]]  ;;  %v788_v52 = vstv %s3327_s4  ;;  %v2700_v15 = vsel %vm536_vm8, %v804_v25, %v787_v60 }
 0x221   :  { %s3332_s1 = sld [smem:[#allocation41_spill]]  ;;  %v779_v53 = vstv %s3328_s20  ;;  %v789_v61 = vsel %vm531_vm7, %v788_v52, %v776_v45 }
 0x222   :  { %s2637_s15 = sld [smem:[#allocation19 + $0x33]]  ;;  %v780_v54 = vstv %s3329_s6 }
 0x223   :  { %s3333_s12 = sld [smem:[#allocation46_spill]] }
 0x224   :  { %s3334_s29 = sld [smem:[#allocation47_spill]] }
 0x225   :  { %s2643_s18 = sld [smem:[#allocation19 + $0x34]]  ;;  %v790_v23 = vstv %s3330_s11 }
 0x226   :  { %v792_v55 = vstv %s3331_s10  ;;  %s2649_s16 = sld [smem:[#allocation19 + $0x35]]  ;;  %v791_v62 = vsel %vm531_vm7, %v790_v23, %v777_v47 }
 0x227   :  { %v781_v56 = vstv %s3332_s1  ;;  %s3335_s30 = sld [smem:[#allocation48_spill]]  ;;  %v793_v63 = vsel %vm531_vm7, %v792_v55, %v778_v50 }
 0x228   :  { %s3336_s21 = sld [smem:[#allocation52_spill]]  ;;  %v799_v6 = vsel %vm531_vm7, %v798_v18, %v781_v56  ;;  %v866_v50 = vstv %s2637_s15 }
 0x229   :  { %v794_v59 = vstv %s3333_s12  ;;  %s2657_s14 = sld [smem:[#allocation19 + $0x36]] }
 0x22a   :  { %s3337_s10 = sld [smem:[#allocation49_spill]]  ;;  %v796_v10 = vstv %s3334_s29  ;;  %v795_v2 = vsel %vm531_vm7, %v794_v59, %v779_v53 }
 0x22b   :  { %s2665_s6 = sld [smem:[#allocation19 + $0x37]]  ;;  %v797_v5 = vsel %vm531_vm7, %v796_v10, %v780_v54  ;;  %v813_v26 = vsel %vm536_vm8, %v812_v11, %v795_v2  ;;  %v868_v54 = vstv %s2643_s18 }
 0x22c   :  { %s3338_s20 = sld [smem:[#allocation53_spill]]  ;;  %v831_v38 = vsel %vm541_vm9, %v830_v30, %v813_v26  ;;  %v870_v57 = vstv %s2649_s16 }
 0x22d   :  { %s3339_s7 = sld [smem:[#allocation54_spill]]  ;;  %v806_v3 = vstv %s3335_s30  ;;  %v849_v48 = vsel %vm546_vm10, %v848_v40, %v831_v38 }
 0x22e   :  { %s2673_s4 = sld [smem:[#allocation19 + $0x38]]  ;;  %v808_v4 = vstv %s3336_s21  ;;  %v807_v21 = vsel %vm536_vm8, %v806_v3, %v789_v61  ;;  %v867_v61 = vsel %vm551_vm11, %v866_v50, %v849_v48 }
 0x22f   :  { %s3340_s28 = sld [smem:[#allocation50_spill]]  ;;  %v809_v27 = vsel %vm536_vm8, %v808_v4, %v791_v62  ;;  %v825_v24 = vsel %vm541_vm9, %v824_v19, %v807_v21 }
 0x230   :  { %s2680_s11 = sld [smem:[#allocation19 + $0x39]]  ;;  %v810_v8 = vstv %s3337_s10  ;;  %v827_v41 = vsel %vm541_vm9, %v826_v49, %v809_v27  ;;  %v843_v46 = vsel %vm546_vm10, %v842_v39, %v825_v24 }
 0x231   :  { %s2688_s8 = sld [smem:[#allocation19 + $0x3a]]  ;;  %v811_v29 = vsel %vm536_vm8, %v810_v8, %v793_v63  ;;  %v845_v51 = vsel %vm546_vm10, %v844_v7, %v827_v41  ;;  %v872_v7 = vstv %s2657_s14 }
 0x232   :  { %v814_v12 = vstv %s3338_s20  ;;  %s2696_s26 = sld [smem:[#allocation19 + $0x3b]] }
 0x233   :  { %v816_v13 = vstv %s3339_s7  ;;  %s3341_s5 = sld [smem:[#allocation51_spill]]  ;;  %v815_v32 = vsel %vm536_vm8, %v814_v12, %v797_v5 }
 0x234   :  { %s3342_s2 = sld [smem:[#allocation55_spill]]  ;;  %v817_v31 = vsel %vm536_vm8, %v816_v13, %v799_v6  ;;  %v833_v42 = vsel %vm541_vm9, %v832_v17, %v815_v32 }
 0x235   :  { %v818_v22 = vstv %s3340_s28  ;;  %s2707_s12 = sld [smem:[#allocation19 + $0x3c]]  ;;  %v835_v44 = vsel %vm541_vm9, %v834_v37, %v817_v31 }
 0x236   :  { %s2715_s23 = sld [smem:[#allocation19 + $0x3d]]  ;;  %v819_v34 = vsel %vm541_vm9, %v818_v22, %v801_v9  ;;  %v878_v1 = vstv %s2680_s11  ;;  %v864_v9 = vstv %s2631_s17 }
 0x237   :  { %s3343_s1 = sld [smem:[#allocation61_spill]]  ;;  %v880_v2 = vstv %s2688_s8 }
 0x238   :  { %s2723_s25 = sld [smem:[#allocation19 + $0x3e]]  ;;  %v882_v30 = vstv %s2696_s26 }
 0x239   :  { %s3344_s24 = sld [smem:[#allocation56_spill]]  ;;  %v820_v35 = vstv %s3341_s5 }
 0x23a   :  { %v822_v36 = vstv %s3342_s2  ;;  %s3345_s3 = sld [smem:[#allocation62_spill]]  ;;  %v821_v16 = vsel %vm541_vm9, %v820_v35, %v803_v14 }
 0x23b   :  { %s2730_s29 = sld [smem:[#allocation19 + $0x3f]]  ;;  %v884_v62 = vstv %s2707_s12  ;;  %v823_v3 = vsel %vm541_vm9, %v822_v36, %v2700_v15 }
 0x23c   :  { %s3346_s27 = sld [smem:[#allocation66_spill]]  ;;  %v886_v63 = vstv %s2715_s23  ;;  %v885_v6 = vsel %vm556_vm12, %v884_v62, %v867_v61 }
 0x23d   :  { %s2738_s0 = sld [smem:[#allocation19 + $0x40]]  ;;  %v850_v43 = vstv %s3343_s1 }
 0x23e   :  { %s3347_s22 = sld [smem:[#allocation67_spill]]  ;;  %v851_v52 = vsel %vm546_vm10, %v850_v43, %v833_v42  ;;  %v888_v25 = vstv %s2723_s25  ;;  %v874_v43 = vstv %s2665_s6 }
 0x23f   :  { %s2746_s30 = sld [smem:[#allocation19 + $0x41]]  ;;  %v828_v20 = vstv %s3344_s24  ;;  %v869_v18 = vsel %vm551_vm11, %v868_v54, %v851_v52 }
 0x240   :  { %s3348_s9 = sld [smem:[#allocation57_spill]]  ;;  %v852_v45 = vstv %s3345_s3  ;;  %v829_v23 = vsel %vm541_vm9, %v828_v20, %v811_v29  ;;  %v887_v14 = vsel %vm556_vm12, %v886_v63, %v869_v18 }
 0x241   :  { %s2754_s13 = sld [smem:[#allocation19 + $0x42]]  ;;  %v853_v56 = vsel %vm546_vm10, %v852_v45, %v835_v44  ;;  %v890_v50 = vstv %s2730_s29 }
 0x242   :  { %s3349_s21 = sld [smem:[#allocation58_spill]]  ;;  %v860_v47 = vstv %s3346_s27  ;;  %v871_v0 = vsel %vm551_vm11, %v870_v57, %v853_v56 }
 0x243   :  { %s3350_s19 = sld [smem:[#allocation60_spill]]  ;;  %v861_v60 = vsel %vm551_vm11, %v860_v47, %v843_v46  ;;  %v889_v15 = vsel %vm556_vm12, %v888_v25, %v871_v0 }
 0x244   :  { %s2762_s10 = sld [smem:[#allocation19 + $0x43]]  ;;  %v862_v53 = vstv %s3347_s22  ;;  %v879_v12 = vsel %vm556_vm12, %v878_v1, %v861_v60 }
 0x245   :  { %s2770_s20 = sld [smem:[#allocation19 + $0x45]]  ;;  %v863_v10 = vsel %vm551_vm11, %v862_v53, %v845_v51  ;;  %v892_v51 = vstv %s2738_s0  ;;  %v876_v53 = vstv %s2673_s4 }
 0x246   :  { %v836_v55 = vstv %s3348_s9  ;;  %s2778_s15 = sld [smem:[#allocation19 + $0x46]]  ;;  %v881_v13 = vsel %vm556_vm12, %v880_v2, %v863_v10 }
 0x247   :  { %s3351_s18 = sld [smem:[#allocation59_spill]]  ;;  %v837_v4 = vsel %vm546_vm10, %v836_v55, %v819_v34  ;;  %v896_v27 = vstv %s2754_s13 }
 0x248   :  { %v838_v58 = vstv %s3349_s21  ;;  %s2786_s7 = sld [smem:[#allocation19 + $0x47]]  ;;  %v897_v36 = vsel %vm561_vm13, %v896_v27, %v879_v12 }
 0x249   :  { %v846_v59 = vstv %s3350_s19  ;;  %s2794_s16 = sld [smem:[#allocation19 + $0x44]]  ;;  %v839_v8 = vsel %vm546_vm10, %v838_v58, %v821_v16 }
 0x24a   :  { %s2801_s28 = sld [smem:[#allocation20]]  ;;  %v847_v11 = vsel %vm546_vm10, %v846_v59, %v829_v23  ;;  %v898_v22 = vstv %s2762_s10  ;;  %v894_v59 = vstv %s2746_s30 }
 0x24b   :  { %s2811_s11 = sld [smem:[#allocation20 + $0x1]]  ;;  %v902_v21 = vstv %s2770_s20  ;;  %v865_v19 = vsel %vm551_vm11, %v864_v9, %v847_v11  ;;  %v899_v37 = vsel %vm561_vm13, %v898_v22, %v881_v13 }
 0x24c   :  { %s2820_s8 = sld [smem:[#allocation20 + $0x2]]  ;;  %v903_v29 = vsel %vm561_vm13, %v902_v21, %v885_v6  ;;  %v904_v26 = vstv %s2778_s15  ;;  %v883_v39 = vsel %vm556_vm12, %v882_v30, %v865_v19 }
 0x24d   :  { %v840_v5 = vstv %s3351_s18  ;;  %s3352_s5 = sld [smem:[#allocation63_spill]]  ;;  %v905_v32 = vsel %vm561_vm13, %v904_v26, %v887_v14  ;;  %v908_v34 = vmul.f32 %v903_v29, %v2486_v33 }
 0x24e   :  { %s3353_s2 = sld [smem:[#allocation64_spill]]  ;;  %v906_v31 = vstv %s2786_s7  ;;  %v912_v35 = vmul.f32 %v905_v32, %v2486_v33  ;;  %v841_v38 = vsel %vm546_vm10, %v840_v5, %v823_v3  ;;  %s1556_s7 = smov [#allocation23]  }
 0x24f   :  { %s2829_s12 = sld [smem:[#allocation20 + $0x3]]  ;;  %v907_v24 = vsel %vm561_vm13, %v906_v31, %v889_v15  ;;  %v900_v40 = vstv %s2794_s16  ;;  %v909_v20 = vadd.f32 %v908_v34, %v897_v36  ;;  %s1017_s16 = sshll.u32 %s1556_s7, 4  ;;  %s1018_s16 = int_to_ptr.vmem [resolvable:$true] %s1017_s16 }
 0x250   :  { %s2836_s17 = sld [smem:[#allocation20 + $0x4]]  ;;  %v913_v44 = vadd.f32 %v912_v35, %v899_v37  ;;  %v916_v45 = vmul.f32 %v907_v24, %v2486_v33  ;;  %v901_v46 = vsel %vm561_vm13, %v900_v40, %v883_v39  ;;  %v920_v22 = vstv %s2801_s28  ;;  %s1557_s28 = smov [#allocation22]  }
 0x251   :  { %s2844_s23 = sld [smem:[#allocation20 + $0x5]]  ;;  %v910_v54 = vmul.f32 %v909_v20, %v2486_v33  ;;  %v921_v5 = vstv %s2811_s11  ;;  %p1453_p4 = scmp.lt.s32.totalorder %s1018_s16, %s1018_s16 }
 0x252   :  { %s3354_s1 = sld [smem:[#allocation65_spill]]  ;;  %v914_v23 = vmul.f32 %v913_v44, %v2486_v33  ;;  %v917_v55 = vadd.f32 %v916_v45, %v901_v46  ;;  %v922_v60 = vstv %s2820_s8  ;;  %s1007_s8 = sshll.u32 %s1557_s28, 4  ;;  %s1008_s8 = int_to_ptr.vmem [resolvable:$true] %s1007_s8 }
 0x253   :  { %v854_v49 = vstv %s3352_s5  ;;  %s2850_s25 = sld [smem:[#allocation20 + $0x6]] }
 0x254   :  { %v856_v17 = vstv %s3353_s2  ;;  %s2858_s26 = sld [smem:[#allocation20 + $0x7]]  ;;  %v855_v41 = vsel %vm551_vm11, %v854_v49, %v837_v4  ;;  %v918_v0 = vmul.f32 %v917_v55, %v2486_v33 }
 0x255   :  { %s2865_s24 = sld [smem:[#allocation20 + $0x8]]  ;;  %v857_v42 = vsel %vm551_vm11, %v856_v17, %v839_v8  ;;  %v873_v48 = vsel %vm556_vm12, %v872_v7, %v855_v41  ;;  %v923_v61 = vstv %s2829_s12 }
 0x256   :  { %s2873_s3 = sld [smem:[#allocation20 + $0x9]]  ;;  %v875_v47 = vsel %vm556_vm12, %v874_v43, %v857_v42  ;;  %v891_v56 = vsel %vm561_vm13, %v890_v50, %v873_v48  ;;  %v924_v29 = vstv %s2836_s17 }
 0x257   :  { %s2877_s27 = sld [smem:[#allocation20 + $0xa]]  ;;  %v893_v57 = vsel %vm561_vm13, %v892_v51, %v875_v47  ;;  %v2917_v62 = vadd.f32 %v910_v54, %v891_v56  ;;  %v926_v6 = vstv %s2844_s23  ;;  %v925_v35 = vsel %vm531_vm7, %v924_v29, %v920_v22  ;;  %s1558_s23 = smov [#allocation25]  }
 0x258   :  { %v858_v16 = vstv %s3354_s1  ;;  %s2881_s22 = sld [smem:[#allocation20 + $0xb]]  ;;  %v2919_v63 = vadd.f32 %v914_v23, %v893_v57  ;;  %v927_v21 = vsel %vm531_vm7, %v926_v6, %v921_v5  ;;  %s1026_s1 = sshll.u32 %s1558_s23, 4  ;;  %s1027_s1 = int_to_ptr.vmem [resolvable:$true] %s1026_s1 }
 0x259   :  { %s2889_s14 = sld [smem:[#allocation20 + $0xc]]  ;;  %v859_v52 = vsel %vm551_vm11, %v858_v16, %v841_v38  ;;  %v928_v10 = vstv %s2850_s25  ;;  %v986_v11 = vmul.f32 %v2917_v62, %v2917_v62  ;;  %s1448_s25 = scalar_lea.vmem %s1018_s16, 128 }
 0x25a   :  { %s2894_s6 = sld [smem:[#allocation20 + $0xe]]  ;;  %v877_v58 = vsel %vm556_vm12, %v876_v53, %v859_v52  ;;  %v930_v18 = vstv %s2858_s26  ;;  %v929_v2 = vsel %vm531_vm7, %v928_v10, %v922_v60  ;;  %v987_v9 = vmul.f32 %v2919_v63, %v2919_v63  ;;  %p1449_p3 = scmp.ne.s32.totalorder %s1018_s16, %s1448_s25 }
 0x25b   :  { %s2898_s9 = sld [smem:[#allocation20 + $0xf]]  ;;  %v895_v1 = vsel %vm561_vm13, %v894_v59, %v877_v58  ;;  %v931_v25 = vsel %vm531_vm7, %v930_v18, %v923_v61  ;;  %v932_v36 = vstv %s2865_s24  ;;  %p1454_p5 = scmp.lt.s32.totalorder %s1448_s25, %s1448_s25 }
 0x25c   :  { %s2904_s29 = sld [smem:[#allocation20 + $0xd]]  ;;  %v2940_v8 = vadd.f32 %v918_v0, %v895_v1  ;;  %v934_v27 = vstv %s2873_s3  ;;  %v988_v17 = vadd.f32 %v987_v9, %v986_v11  ;;  %v933_v42 = vsel %vm536_vm8, %v932_v36, %v925_v35 }
 0x25d   :  { %s2909_s4 = sld [smem:[#allocation20 + $0x10]]  ;;  %v936_v3 = vstv %s2877_s27  ;;  %v935_v31 = vsel %vm536_vm8, %v934_v27, %v927_v21  ;;  %p1455_p6 = por %p1454_p5, %p1453_p4 }
 0x25e   :  { %s2915_s0 = sld [smem:[#allocation20 + $0x12]]  ;;  %v938_v4 = vstv %s2881_s22  ;;  %v937_v14 = vsel %vm536_vm8, %v936_v3, %v929_v2  ;;  %v989_v34 = vmul.f32 %v2940_v8, %v2940_v8 }
 0x25f   :  { %s2922_s13 = sld [smem:[#allocation20 + $0x13]]  ;;  %v939_v12 = vsel %vm536_vm8, %v938_v4, %v931_v25  ;;  %v940_v7 = vstv %s2889_s14  ;;  %p1456_p7 = pnand %p1455_p6, %p1449_p3 }
 0x260   :  { %s2926_s30 = sld [smem:[#allocation20 + $0x11]]  ;;  %v944_v13 = vstv %s2894_s6  ;;  %v990_v43 = vadd.f32 %v989_v34, %v988_v17 }
 0x261   :  { %s2934_s21 = sld [smem:[#allocation20 + $0x14]]  ;;  %v946_v15 = vstv %s2898_s9  ;;  %v945_v26 = vsel %vm541_vm9, %v944_v13, %v937_v14 }
 0x262   :  { %s2938_s19 = sld [smem:[#allocation20 + $0x16]]  ;;  %v947_v19 = vsel %vm541_vm9, %v946_v15, %v939_v12  ;;  %v942_v49 = vstv %s2904_s29 }
 0x263   :  { %s2946_s10 = sld [smem:[#allocation20 + $0x17]]  ;;  %v943_v40 = vsel %vm541_vm9, %v942_v49, %v935_v31 }
 0x264   :  { %s2954_s20 = sld [smem:[#allocation20 + $0x15]]  ;;  %v952_v30 = vstv %s2915_s0 }
 0x265   :  { %s2959_s15 = sld [smem:[#allocation20 + $0x18]]  ;;  %v954_v32 = vstv %s2922_s13  ;;  %v953_v37 = vsel %vm546_vm10, %v952_v30, %v945_v26 }
 0x266   :  { %s2963_s18 = sld [smem:[#allocation20 + $0x1a]]  ;;  %v955_v24 = vsel %vm546_vm10, %v954_v32, %v947_v19  ;;  %v950_v41 = vstv %s2926_s30 }
 0x267   :  { %s2971_s11 = sld [smem:[#allocation20 + $0x1b]] }
 0x268   :  { %s2978_s5 = sld [smem:[#allocation20 + $0x19]]  ;;  %v960_v38 = vstv %s2938_s19 }
 0x269   :  { %s2983_s2 = sld [smem:[#allocation20 + $0x1d]]  ;;  %v962_v39 = vstv %s2946_s10  ;;  %v961_v16 = vsel %vm551_vm11, %v960_v38, %v953_v37 }
 0x26a   :  { %s2991_s12 = sld [smem:[#allocation20 + $0x1e]]  ;;  %v963_v20 = vsel %vm551_vm11, %v962_v39, %v955_v24 }
 0x26b   :  { %s2996_s17 = sld [smem:[#allocation20 + $0x1f]] }
 0x26c   :  { %v968_v44 = vstv %s2963_s18 }
 0x26d   :  { %1459 = shalt.err (!%p1456_p7)
}
 0x26e   :  { %s3355_s3 = sld [smem:[#allocation131_spill]]  ;;  %v951_v45 = vsel %vm546_vm10, %v950_v41, %v943_v40  ;;  %v958_v46 = vstv %s2954_s20  ;;  %v970_v48 = vstv %s2971_s11  ;;  %s1468_s27 = scalar_lea.vmem %s1008_s8, 128 }
 0x26f   :  { %p1469_p8 = scmp.ne.s32.totalorder %s1008_s8, %s1468_s27  ;;  %p1473_p9 = scmp.lt.s32.totalorder %s1008_s8, %s1008_s8 }
 0x270   :  { %p1474_p10 = scmp.lt.s32.totalorder %s1468_s27, %s1468_s27 }
 0x272   :  { %p1475_p11 = por %p1474_p10, %p1473_p9 }
 0x274   :  { %1020 = dma.vmem_to_hbm [thread:$0]  %s1018_s16, 128, %s3355_s3, [#allocation24]  }
 0x275   :  { %p1476_p12 = pnand %p1475_p11, %p1469_p8 }
 0x277   :  { %1479 = shalt.err (!%p1476_p12)
}
 0x278   :  { %s3356_s6 = sld [smem:[#allocation130_spill]]  ;;  %v941_v47 = vsel %vm541_vm9, %v940_v7, %v933_v42  ;;  %v948_v50 = vstv %s2909_s4  ;;  %v969_v51 = vsel %vm556_vm12, %v968_v44, %v961_v16  ;;  %v971_v52 = vsel %vm556_vm12, %v970_v48, %v963_v20  ;;  %s1488_s29 = scalar_lea.vmem %s1027_s1, 384 }
 0x279   :  { %s3019_s9 = sld [smem:[#allocation20 + $0x1c]]  ;;  %1330 = vrsqrt.f32 %v990_v43  ;;  %v959_v53 = vsel %vm551_vm11, %v958_v46, %v951_v45  ;;  %v966_v54 = vstv %s2978_s5  ;;  %v976_v23 = vstv %s2991_s12  ;;  %p1489_p13 = scmp.ne.s32.totalorder %s1027_s1, %s1488_s29 }
 0x27a   :  { %v949_v55 = vsel %vm546_vm10, %v948_v50, %v941_v47  ;;  %v956_v56 = vstv %s2934_s21  ;;  %v978_v57 = vstv %s2996_s17  ;;  %v977_v58 = vsel %vm561_vm13, %v976_v23, %v969_v51  ;;  %p1493_p0 = scmp.lt.s32.totalorder %s1027_s1, %s1027_s1  ;;  %p1494_p1 = scmp.lt.s32.totalorder %s1488_s29, %s1488_s29 }
 0x27b   :  { %v979_v59 = vsel %vm561_vm13, %v978_v57, %v971_v52 }
 0x27c   :  { %p1495_p2 = por %p1494_p1, %p1493_p0 }
 0x27e   :  { %1010 = dma.vmem_to_hbm [thread:$0]  %s1008_s8, 128, %s3356_s6, [#allocation8]  }
 0x27f   :  { %p1496_p3 = pnand %p1495_p2, %p1489_p13 }
 0x281   :  { %1499 = shalt.err (!%p1496_p3)
}
 0x282   :  { %s1559_s4 = smov 128   ;;  %s1560_s0 = smov 8   ;;  %v967_v60 = vsel %vm556_vm12, %v966_v54, %v959_v53  ;;  %v974_v61 = vstv %s2983_s2  ;;  %v980_v10 = vmul.f32 %v979_v59, %v2486_v33  ;;  %v957_v18 = vsel %vm551_vm11, %v956_v56, %v949_v55 }
 0x283   :  { %s3357_s21 = sld [smem:[#allocation132_spill]]  ;;  %v964_v0 = vstv %s2959_s15  ;;  %v975_v2 = vsel %vm561_vm13, %v974_v61, %v967_v60  ;;  %v972_v3 = vstv %s3019_s9  ;;  %s1561_s19 = smov [#allocation26]  }
 0x284   :  { %v981_v1 = vadd.f32 %v980_v10, %v977_v58  ;;  %v965_v25 = vsel %vm556_vm12, %v964_v0, %v957_v18  ;;  %s1038_s10 = sshll.u32 %s1561_s19, 4  ;;  %s1039_s10 = int_to_ptr.vmem [resolvable:$true] %s1038_s10 }
 0x285   :  { %v973_v6 = vsel %vm561_vm13, %v972_v3, %v965_v25  ;;  %s1508_s20 = scalar_lea.vmem %s1039_s10, 384  ;;  %p1513_p5 = scmp.lt.s32.totalorder %s1039_s10, %s1039_s10 }
 0x286   :  { %v982_v4 = vmul.f32 %v981_v1, %v2486_v33  ;;  %v1331_v9 = vpop.eup %1330  ;;  %p1509_p4 = scmp.ne.s32.totalorder %s1039_s10, %s1508_s20  ;;  %p1514_p6 = scmp.lt.s32.totalorder %s1508_s20, %s1508_s20 }
 0x288   :  { %v983_v5 = vadd.f32 %v982_v4, %v975_v2  ;;  %p1515_p7 = por %p1514_p6, %p1513_p5 }
 0x289   :  { %1032 = dma.vmem_to_hbm [thread:$0]  %s1027_s1, 384, %s3357_s21, [#allocation24], %s1559_s4, %s1559_s4, %s1560_s0  }
 0x28a   :  { %v984_v11 = vmul.f32 %v983_v5, %v2486_v33  ;;  %p1516_p8 = pnand %p1515_p7, %p1509_p4 }
 0x28c   :  { %v985_v14 = vadd.f32 %v984_v11, %v973_v6 }
 0x28e   :  { %v992_v12 = vmul.f32 %v1331_v9, %v985_v14 }
 0x290   :  { %v993_v13 = vmul.f32 %v992_v12, %v2917_v62  ;;  %v995_v15 = vmul.f32 %v992_v12, %v2919_v63  ;;  %v998_v21 = vmul.f32 %v992_v12, %v2940_v8 }
 0x292   :  { %994 = vst [vmem:[#allocation26] sm:$0xff] %v993_v13  ;;  %997 = vst [vmem:[#allocation26 + $0x8] sm:$0xff] %v995_v15 }
 0x293   :  { %1000 = vst [vmem:[#allocation26 + $0x10] sm:$0xff] %v998_v21 }
 0x294   :  { %1519 = shalt.err (!%p1516_p8)
}
 0x295   :  { %s3358_s7 = sld [smem:[#allocation133_spill]] }
 0x29b   :  { %1044 = dma.vmem_to_hbm [thread:$0]  %s1039_s10, 384, %s3358_s7, [#allocation27], %s1559_s4, %s1559_s4, %s1560_s0  }
 0x29c   :  { %1540 = dma.done.wait [#allocation8], 128  }
 0x29d   :  { %1541 = vsyncadd [#allocation8], 4294967168 }
 0x29e   :  { %1542 = dma.done.wait [#allocation24], 512  }
 0x29f   :  { %1543 = vsyncadd [#allocation24], 4294966784 }
 0x2a0   :  { %1544 = dma.done.wait [#allocation27], 384  }
 0x2a1   :  { %1545 = vsyncadd [#allocation27], 4294966912 }
 0x2a2   :  { %1057 = vsyncpa [#allocation7], 1 }
 0x2a3   :  { %1058 = vsyncpa [#allocation8], 1 }
 0x2a4   :  { %1059 = vsyncpa [#allocation24], 1 }
 0x2a5   :  { %1060 = vsyncpa [#allocation27], 1 }
 0x2a6   :  { %1061 = vsyncpa [#allocation9], 1 }
 0x2a7   :  { %1062 = vsyncpa [#allocation12], 1 }
 0x2a8   :  { %1063 = vsyncpa [#allocation15], 1 }
 0x2a9   :  { %1064 = vsyncpa [#allocation18], 1 }
 0x2aa   :  { %1065 = vsyncpa [#allocation21], 1 }

</bundles_post_ra>
